<compile_context>
chip_gen: v5e
topology: v5e:2x2
jax: 0.10.0
libtpu: 0.0.40
codegen_flags: <defaults>
</compile_context>

<pallas_src>
import numpy as np
import jax
import jax.numpy as jnp
from jax.experimental import pallas as pl
from jax.experimental.pallas import tpu as pltpu


# ----------------------------------------------------------------------------
# Model hyper-parameters (toy-sized instance of the PyTorch CNN3D spec)
# ----------------------------------------------------------------------------
CH_IN = 3
CH1, CH2 = 8, 16
K1, S1 = (5, 5, 5), (2, 2, 2)
K2, S2 = (3, 3, 3), (2, 2, 2)
FC_HIDDEN1, FC_HIDDEN2 = 32, 32
BN_EPS = 1e-5
N_BATCH, T_DIM, IMG_X, IMG_Y = 2, 12, 16, 16


def conv3d_out_size(sz, k, s):
    return tuple((sz[i] - (k[i] - 1) - 1) // s[i] + 1 for i in range(3))


OD1, OH1, OW1 = conv3d_out_size((T_DIM, IMG_X, IMG_Y), K1, S1)   # (4, 6, 6)
OD2, OH2, OW2 = conv3d_out_size((OD1, OH1, OW1), K2, S2)         # (1, 2, 2)

PD = S1[0]                       # depth phases of the host input layout
D2 = T_DIM // S1[0]              # depth positions per phase
HWC = IMG_X * IMG_Y * CH_IN      # 768  conv1 contraction width
COLS1 = OH1 * OW1 * CH1          # 288  conv1 output lanes = (oh1, ow1, c1)
COLS2 = OH2 * OW2 * CH2          # 64   conv2 output lanes = (oh2, ow2, c2)
FLAT = CH2 * OD2 * OH2 * OW2     # 64   fc1 input features

# Layout assumptions used by the fused kernel.
assert T_DIM % S1[0] == 0 and (K1[0] - 1) // S1[0] + OD1 <= D2
assert OD2 == 1                  # conv2 depth taps index conv1 depth-rows directly
assert FLAT == COLS2


# ----------------------------------------------------------------------------
# Fused Pallas kernel (one grid step == one sample)
# ----------------------------------------------------------------------------
def _cnn3d_fused_kernel(x_ref, b1_ref, s1_ref, b2_ref, s2_ref,
                        wf1_ref, bf1_ref, wf2_ref, bf2_ref, o_ref):
    x = x_ref[...]                                            # (PD, 1, D2, HWC) f32

    # conv1 + bn1 + relu: explicit depth taps; H/W window, C and BN scale are
    # folded into the banded slabs b1[i].  Rows = output depth positions.
    acc1 = None
    for i in range(K1[0]):
        pd, qd = i % S1[0], i // S1[0]
        a = x[pd, 0, qd:qd + OD1, :].astype(jnp.bfloat16)     # (OD1, HWC)
        t = jnp.dot(a, b1_ref[i], preferred_element_type=jnp.float32)
        acc1 = t if acc1 is None else acc1 + t
    h1 = jnp.maximum(acc1 + s1_ref[...], 0.0)                 # (OD1, COLS1) f32
    # Dropout3d -> identity (eval mode)

    # conv2 + bn2 + relu (output depth == 1: depth tap i reads conv1 row i).
    acc2 = None
    for i in range(K2[0]):
        a = h1[i:i + 1, :].astype(jnp.bfloat16)               # (1, COLS1)
        t = jnp.dot(a, b2_ref[i], preferred_element_type=jnp.float32)
        acc2 = t if acc2 is None else acc2 + t
    h2 = jnp.maximum(acc2 + s2_ref[...], 0.0)                 # (1, COLS2) f32
    # Dropout3d -> identity (eval mode)

    # flatten (already flat, fc1 columns pre-permuted) -> fc1+relu -> fc2+relu.
    h3 = jnp.dot(h2.astype(jnp.bfloat16), wf1_ref[...],
                 preferred_element_type=jnp.float32) + bf1_ref[...]
    h3 = jnp.maximum(h3, 0.0)                                 # (1, FC_HIDDEN1)
    y = jnp.dot(h3.astype(jnp.bfloat16), wf2_ref[...],
                preferred_element_type=jnp.float32) + bf2_ref[...]
    o_ref[0] = jnp.maximum(y, 0.0)                            # (1, FC_HIDDEN2)
    # F.dropout -> identity (eval mode)


# ----------------------------------------------------------------------------
# Forward wrapper
# ----------------------------------------------------------------------------
def _prepare_input(x):
    """NCDHW f32 -> (PD, N, D2, H*W*C) f32.  The depth dim is phase-split by the
    conv1 stride so every in-kernel depth-tap read is a contiguous slice."""
    n, c, d, h, w = x.shape
    xt = jnp.transpose(x, (2, 0, 3, 4, 1))                    # (D, N, H, W, C)
    xt = xt.reshape(d // S1[0], S1[0], n, h, w, c)            # (D2, PD, N, H, W, C)
    xt = jnp.transpose(xt, (1, 2, 0, 3, 4, 5))                # (PD, N, D2, H, W, C)
    return xt.reshape(S1[0], n, d // S1[0], h * w * c)


def cnn3d_forward_pallas(x, fp):
    n = x.shape[0]
    x1 = _prepare_input(x)                                    # (PD, N, D2, HWC) f32

    flops = 2 * n * (OD1 * HWC * COLS1 * K1[0]
                     + COLS1 * COLS2 * K2[0]
                     + FLAT * FC_HIDDEN1 + FC_HIDDEN1 * FC_HIDDEN2)
    bytes_accessed = int(
        x1.size * 4
        + (fp["b1"].size + fp["b2"].size + fp["wf1"].size + fp["wf2"].size) * 2
        + (fp["s1"].size + fp["s2"].size + fp["bf1"].size + fp["bf2"].size) * 4
        + n * FC_HIDDEN2 * 4)

    out = pl.pallas_call(
        _cnn3d_fused_kernel,
        out_shape=jax.ShapeDtypeStruct((n, 1, FC_HIDDEN2), jnp.float32),
        grid=(n,),
        in_specs=[
            pl.BlockSpec((PD, 1, D2, HWC), lambda b: (0, b, 0, 0)),
            pl.BlockSpec((K1[0], HWC, COLS1), lambda b: (0, 0, 0)),
            pl.BlockSpec((1, COLS1), lambda b: (0, 0)),
            pl.BlockSpec((K2[0], COLS1, COLS2), lambda b: (0, 0, 0)),
            pl.BlockSpec((1, COLS2), lambda b: (0, 0)),
            pl.BlockSpec((FLAT, FC_HIDDEN1), lambda b: (0, 0)),
            pl.BlockSpec((1, FC_HIDDEN1), lambda b: (0, 0)),
            pl.BlockSpec((FC_HIDDEN1, FC_HIDDEN2), lambda b: (0, 0)),
            pl.BlockSpec((1, FC_HIDDEN2), lambda b: (0, 0)),
        ],
        out_specs=pl.BlockSpec((1, 1, FC_HIDDEN2), lambda b: (b, 0, 0)),
        compiler_params=pltpu.CompilerParams(
            dimension_semantics=("parallel",),
            vmem_limit_bytes=32 * 1024 * 1024),
        cost_estimate=pl.CostEstimate(flops=flops, transcendentals=0,
                                      bytes_accessed=bytes_accessed),
    )(x1, fp["b1"], fp["s1"], fp["b2"], fp["s2"],
      fp["wf1"], fp["bf1"], fp["wf2"], fp["bf2"])
    return out.reshape(n, FC_HIDDEN2)


# ----------------------------------------------------------------------------
# One-time host-side parameter folding (numpy, outside jit)
# ----------------------------------------------------------------------------
def fold_params(p):
    f = lambda a: np.asarray(a, np.float32)

    # conv1 + bn1 -> banded slabs per depth tap: B1[i, (h,w,c), (oh,ow,o)]
    inv1 = f(p["bn1_g"]) / np.sqrt(f(p["bn1_v"]) + BN_EPS)
    w1 = np.transpose(f(p["conv1_w"]) * inv1[:, None, None, None, None],
                      (2, 3, 4, 1, 0))                        # (kd, kh, kw, C, O)
    B1 = np.zeros((K1[0], IMG_X, IMG_Y, CH_IN, OH1, OW1, CH1), np.float32)
    for j in range(K1[1]):
        for r in range(K1[2]):
            for oh in range(OH1):
                for ow in range(OW1):
                    B1[:, S1[1] * oh + j, S1[2] * ow + r, :, oh, ow, :] = \
                        w1[:, j, r, :, :]
    B1 = B1.reshape(K1[0], HWC, COLS1)
    s1 = (f(p["conv1_b"]) - f(p["bn1_m"])) * inv1 + f(p["bn1_b"])
    s1 = np.tile(s1, OH1 * OW1).reshape(1, COLS1)

    # conv2 + bn2 -> banded slabs per depth tap: B2[i, (h1,w1,c1), (oh2,ow2,o2)]
    inv2 = f(p["bn2_g"]) / np.sqrt(f(p["bn2_v"]) + BN_EPS)
    w2 = np.transpose(f(p["conv2_w"]) * inv2[:, None, None, None, None],
                      (2, 3, 4, 1, 0))                        # (kd, kh, kw, C1, O2)
    B2 = np.zeros((K2[0], OH1, OW1, CH1, OH2, OW2, CH2), np.float32)
    for j in range(K2[1]):
        for r in range(K2[2]):
            for oh in range(OH2):
                for ow in range(OW2):
                    B2[:, S2[1] * oh + j, S2[2] * ow + r, :, oh, ow, :] = \
                        w2[:, j, r, :, :]
    B2 = B2.reshape(K2[0], COLS1, COLS2)
    s2 = (f(p["conv2_b"]) - f(p["bn2_m"])) * inv2 + f(p["bn2_b"])
    s2 = np.tile(s2, OH2 * OW2).reshape(1, COLS2)

    # fc1: permute columns from PyTorch's (C2, D, H, W) flatten order to the
    # kernel's (oh2, ow2, c2) lane order (output depth == 1).
    fc1_w = f(p["fc1_w"]).reshape(FC_HIDDEN1, CH2, OD2, OH2, OW2)
    fc1_w = np.transpose(fc1_w, (0, 2, 3, 4, 1)).reshape(FC_HIDDEN1, FLAT).T
    fc2_w = f(p["fc2_w"]).T

    bf16 = jnp.bfloat16
    return {
        "b1": jnp.asarray(B1, bf16), "s1": jnp.asarray(s1, jnp.float32),
        "b2": jnp.asarray(B2, bf16), "s2": jnp.asarray(s2, jnp.float32),
        "wf1": jnp.asarray(fc1_w, bf16),
        "bf1": jnp.asarray(f(p["fc1_b"]).reshape(1, FC_HIDDEN1), jnp.float32),
        "wf2": jnp.asarray(fc2_w, bf16),
        "bf2": jnp.asarray(f(p["fc2_b"]).reshape(1, FC_HIDDEN2), jnp.float32),
    }


# ----------------------------------------------------------------------------
# Pure-JAX f32 reference (matches the PyTorch module in eval mode)
# ----------------------------------------------------------------------------
def cnn3d_forward_ref(x, p, eps=BN_EPS):
    def conv(x, w, b, s):
        y = jax.lax.conv_general_dilated(
            x, w, window_strides=s, padding="VALID",
            dimension_numbers=("NCDHW", "OIDHW", "NCDHW"))
        return y + b.reshape(1, -1, 1, 1, 1)

    def bn(y, g, bt, m, v):
        sh = (1, -1, 1, 1, 1)
        return ((y - m.reshape(sh)) / jnp.sqrt(v.reshape(sh) + eps)
                * g.reshape(sh) + bt.reshape(sh))

    x = jax.nn.relu(bn(conv(x, p["conv1_w"], p["conv1_b"], S1),
                       p["bn1_g"], p["bn1_b"], p["bn1_m"], p["bn1_v"]))
    x = jax.nn.relu(bn(conv(x, p["conv2_w"], p["conv2_b"], S2),
                       p["bn2_g"], p["bn2_b"], p["bn2_m"], p["bn2_v"]))
    x = x.reshape(x.shape[0], -1)
    x = jax.nn.relu(x @ p["fc1_w"].T + p["fc1_b"])
    x = jax.nn.relu(x @ p["fc2_w"].T + p["fc2_b"])
    return x


# ----------------------------------------------------------------------------
# Deterministic parameter construction (synthetic init)
# ----------------------------------------------------------------------------
def make_params(key, flat_dim, ch1=CH1, ch2=CH2, fc1=FC_HIDDEN1, fc2=FC_HIDDEN2):
    ks = jax.random.split(key, 16)
    f32 = jnp.float32
    return {
        "conv1_w": 0.05 * jax.random.normal(ks[0], (ch1, CH_IN) + K1, f32),
        "conv1_b": 0.05 * jax.random.normal(ks[1], (ch1,), f32),
        "bn1_g": 1.0 + 0.1 * jax.random.normal(ks[2], (ch1,), f32),
        "bn1_b": 0.1 * jax.random.normal(ks[3], (ch1,), f32),
        "bn1_m": 0.1 * jax.random.normal(ks[4], (ch1,), f32),
        "bn1_v": 0.5 + jnp.abs(jax.random.normal(ks[5], (ch1,), f32)),
        "conv2_w": 0.05 * jax.random.normal(ks[6], (ch2, ch1) + K2, f32),
        "conv2_b": 0.05 * jax.random.normal(ks[7], (ch2,), f32),
        "bn2_g": 1.0 + 0.1 * jax.random.normal(ks[8], (ch2,), f32),
        "bn2_b": 0.1 * jax.random.normal(ks[9], (ch2,), f32),
        "bn2_m": 0.1 * jax.random.normal(ks[10], (ch2,), f32),
        "bn2_v": 0.5 + jnp.abs(jax.random.normal(ks[11], (ch2,), f32)),
        "fc1_w": 0.05 * jax.random.normal(ks[12], (fc1, flat_dim), f32),
        "fc1_b": 0.05 * jax.random.normal(ks[13], (fc1,), f32),
        "fc2_w": 0.05 * jax.random.normal(ks[14], (fc2, fc1), f32),
        "fc2_b": 0.05 * jax.random.normal(ks[15], (fc2,), f32),
    }


if __name__ == "__main__":
    key = jax.random.PRNGKey(0)
    k_x, k_p = jax.random.split(key)
    x = jax.random.normal(k_x, (N_BATCH, CH_IN, T_DIM, IMG_X, IMG_Y), jnp.float32)
    params = make_params(k_p, flat_dim=FLAT)

    fparams = fold_params(params)          # one-time host-side weight prep
    fwd = jax.jit(cnn3d_forward_pallas)

    out = jax.block_until_ready(fwd(x, fparams))
    assert out.shape == (N_BATCH, FC_HIDDEN2) and out.dtype == jnp.float32

    ref = jax.block_until_ready(cnn3d_forward_ref(x, params))
    np.testing.assert_allclose(np.asarray(out), np.asarray(ref),
                               rtol=2e-2, atol=2e-2)

    print("KERNEL_OK")
</pallas_src>

<mosaic_0001>
module attributes {stable_mosaic.version = 11 : i64} {
  func.func @_cnn3d_fused_kernel(%arg0: i32, %arg1: memref<2x1x6x768xf32, #tpu.memory_space<vmem>>, %arg2: memref<5x768x288xbf16, #tpu.memory_space<vmem>>, %arg3: memref<1x288xf32, #tpu.memory_space<vmem>>, %arg4: memref<3x288x64xbf16, #tpu.memory_space<vmem>>, %arg5: memref<1x64xf32, #tpu.memory_space<vmem>>, %arg6: memref<64x32xbf16, #tpu.memory_space<vmem>>, %arg7: memref<1x32xf32, #tpu.memory_space<vmem>>, %arg8: memref<32x32xbf16, #tpu.memory_space<vmem>>, %arg9: memref<1x32xf32, #tpu.memory_space<vmem>>, %arg10: memref<1x1x32xf32, #tpu.memory_space<vmem>>) attributes {dimension_semantics = [#tpu.dimension_semantics<parallel>], iteration_bounds = array<i64: 2>, scalar_prefetch = 0 : i64, scratch_operands = 0 : i64, tpu.core_type = #tpu.core_type<tc>, window_params = [{transform_indices = @transform_0, window_bounds = array<i64: 2, 1, 6, 768>}, {pipeline_mode = #tpu.pipeline_mode<synchronous>, transform_indices = @transform_1, window_bounds = array<i64: 5, 768, 288>}, {pipeline_mode = #tpu.pipeline_mode<synchronous>, transform_indices = @transform_2, window_bounds = array<i64: 1, 288>}, {pipeline_mode = #tpu.pipeline_mode<synchronous>, transform_indices = @transform_3, window_bounds = array<i64: 3, 288, 64>}, {pipeline_mode = #tpu.pipeline_mode<synchronous>, transform_indices = @transform_4, window_bounds = array<i64: 1, 64>}, {pipeline_mode = #tpu.pipeline_mode<synchronous>, transform_indices = @transform_5, window_bounds = array<i64: 64, 32>}, {pipeline_mode = #tpu.pipeline_mode<synchronous>, transform_indices = @transform_6, window_bounds = array<i64: 1, 32>}, {pipeline_mode = #tpu.pipeline_mode<synchronous>, transform_indices = @transform_7, window_bounds = array<i64: 32, 32>}, {pipeline_mode = #tpu.pipeline_mode<synchronous>, transform_indices = @transform_8, window_bounds = array<i64: 1, 32>}, {transform_indices = @transform_9, window_bounds = array<i64: 1, 1, 32>}]} {
    %c0 = arith.constant 0 : index
    %c0_0 = arith.constant 0 : index
    %c0_1 = arith.constant 0 : index
    %c0_2 = arith.constant 0 : index
    %0 = vector.load %arg1[%c0, %c0_0, %c0_1, %c0_2] : memref<2x1x6x768xf32, #tpu.memory_space<vmem>>, vector<2x1x6x768xf32>
    %1 = vector.extract_strided_slice %0 {offsets = [0, 0, 0, 0], sizes = [1, 1, 4, 768], strides = [1, 1, 1, 1]} : vector<2x1x6x768xf32> to vector<1x1x4x768xf32>
    %2 = vector.shape_cast %1 : vector<1x1x4x768xf32> to vector<4x768xf32>
    %3 = arith.truncf %2 : vector<4x768xf32> to vector<4x768xbf16>
    %c0_3 = arith.constant 0 : index
    %c0_4 = arith.constant 0 : index
    %c0_5 = arith.constant 0 : index
    %4 = vector.load %arg2[%c0_3, %c0_4, %c0_5] : memref<5x768x288xbf16, #tpu.memory_space<vmem>>, vector<1x768x288xbf16>
    %5 = vector.shape_cast %4 : vector<1x768x288xbf16> to vector<768x288xbf16>
    %cst = arith.constant dense<0.000000e+00> : vector<4x288xf32>
    %6 = tpu.matmul %3, %5, %cst {dimension_numbers = #tpu.dot_dimension_numbers<[1], [0], [0], [1], [0, 0, 1, 1], [], []>} : vector<4x768xbf16>, vector<768x288xbf16>, vector<4x288xf32> -> vector<4x288xf32>
    %7 = vector.extract_strided_slice %0 {offsets = [1, 0, 0, 0], sizes = [1, 1, 4, 768], strides = [1, 1, 1, 1]} : vector<2x1x6x768xf32> to vector<1x1x4x768xf32>
    %8 = vector.shape_cast %7 : vector<1x1x4x768xf32> to vector<4x768xf32>
    %9 = arith.truncf %8 : vector<4x768xf32> to vector<4x768xbf16>
    %c1 = arith.constant 1 : index
    %c0_6 = arith.constant 0 : index
    %c0_7 = arith.constant 0 : index
    %10 = vector.load %arg2[%c1, %c0_6, %c0_7] : memref<5x768x288xbf16, #tpu.memory_space<vmem>>, vector<1x768x288xbf16>
    %11 = vector.shape_cast %10 : vector<1x768x288xbf16> to vector<768x288xbf16>
    %cst_8 = arith.constant dense<0.000000e+00> : vector<4x288xf32>
    %12 = tpu.matmul %9, %11, %cst_8 {dimension_numbers = #tpu.dot_dimension_numbers<[1], [0], [0], [1], [0, 0, 1, 1], [], []>} : vector<4x768xbf16>, vector<768x288xbf16>, vector<4x288xf32> -> vector<4x288xf32>
    %13 = arith.addf %6, %12 : vector<4x288xf32>
    %14 = vector.extract_strided_slice %0 {offsets = [0, 0, 1, 0], sizes = [1, 1, 4, 768], strides = [1, 1, 1, 1]} : vector<2x1x6x768xf32> to vector<1x1x4x768xf32>
    %15 = vector.shape_cast %14 : vector<1x1x4x768xf32> to vector<4x768xf32>
    %16 = arith.truncf %15 : vector<4x768xf32> to vector<4x768xbf16>
    %c2 = arith.constant 2 : index
    %c0_9 = arith.constant 0 : index
    %c0_10 = arith.constant 0 : index
    %17 = vector.load %arg2[%c2, %c0_9, %c0_10] : memref<5x768x288xbf16, #tpu.memory_space<vmem>>, vector<1x768x288xbf16>
    %18 = vector.shape_cast %17 : vector<1x768x288xbf16> to vector<768x288xbf16>
    %cst_11 = arith.constant dense<0.000000e+00> : vector<4x288xf32>
    %19 = tpu.matmul %16, %18, %cst_11 {dimension_numbers = #tpu.dot_dimension_numbers<[1], [0], [0], [1], [0, 0, 1, 1], [], []>} : vector<4x768xbf16>, vector<768x288xbf16>, vector<4x288xf32> -> vector<4x288xf32>
    %20 = arith.addf %13, %19 : vector<4x288xf32>
    %21 = vector.extract_strided_slice %0 {offsets = [1, 0, 1, 0], sizes = [1, 1, 4, 768], strides = [1, 1, 1, 1]} : vector<2x1x6x768xf32> to vector<1x1x4x768xf32>
    %22 = vector.shape_cast %21 : vector<1x1x4x768xf32> to vector<4x768xf32>
    %23 = arith.truncf %22 : vector<4x768xf32> to vector<4x768xbf16>
    %c3 = arith.constant 3 : index
    %c0_12 = arith.constant 0 : index
    %c0_13 = arith.constant 0 : index
    %24 = vector.load %arg2[%c3, %c0_12, %c0_13] : memref<5x768x288xbf16, #tpu.memory_space<vmem>>, vector<1x768x288xbf16>
    %25 = vector.shape_cast %24 : vector<1x768x288xbf16> to vector<768x288xbf16>
    %cst_14 = arith.constant dense<0.000000e+00> : vector<4x288xf32>
    %26 = tpu.matmul %23, %25, %cst_14 {dimension_numbers = #tpu.dot_dimension_numbers<[1], [0], [0], [1], [0, 0, 1, 1], [], []>} : vector<4x768xbf16>, vector<768x288xbf16>, vector<4x288xf32> -> vector<4x288xf32>
    %27 = arith.addf %20, %26 : vector<4x288xf32>
    %28 = vector.extract_strided_slice %0 {offsets = [0, 0, 2, 0], sizes = [1, 1, 4, 768], strides = [1, 1, 1, 1]} : vector<2x1x6x768xf32> to vector<1x1x4x768xf32>
    %29 = vector.shape_cast %28 : vector<1x1x4x768xf32> to vector<4x768xf32>
    %30 = arith.truncf %29 : vector<4x768xf32> to vector<4x768xbf16>
    %c4 = arith.constant 4 : index
    %c0_15 = arith.constant 0 : index
    %c0_16 = arith.constant 0 : index
    %31 = vector.load %arg2[%c4, %c0_15, %c0_16] : memref<5x768x288xbf16, #tpu.memory_space<vmem>>, vector<1x768x288xbf16>
    %32 = vector.shape_cast %31 : vector<1x768x288xbf16> to vector<768x288xbf16>
    %cst_17 = arith.constant dense<0.000000e+00> : vector<4x288xf32>
    %33 = tpu.matmul %30, %32, %cst_17 {dimension_numbers = #tpu.dot_dimension_numbers<[1], [0], [0], [1], [0, 0, 1, 1], [], []>} : vector<4x768xbf16>, vector<768x288xbf16>, vector<4x288xf32> -> vector<4x288xf32>
    %34 = arith.addf %27, %33 : vector<4x288xf32>
    %c0_18 = arith.constant 0 : index
    %c0_19 = arith.constant 0 : index
    %35 = vector.load %arg3[%c0_18, %c0_19] : memref<1x288xf32, #tpu.memory_space<vmem>>, vector<1x288xf32>
    %36 = vector.broadcast %35 : vector<1x288xf32> to vector<4x288xf32>
    %37 = arith.addf %34, %36 : vector<4x288xf32>
    %cst_20 = arith.constant 0.000000e+00 : f32
    %38 = vector.broadcast %cst_20 : f32 to vector<4x288xf32>
    %39 = arith.maximumf %37, %38 : vector<4x288xf32>
    %40 = vector.extract_strided_slice %39 {offsets = [0, 0], sizes = [1, 288], strides = [1, 1]} : vector<4x288xf32> to vector<1x288xf32>
    %41 = arith.truncf %40 : vector<1x288xf32> to vector<1x288xbf16>
    %c0_21 = arith.constant 0 : index
    %c0_22 = arith.constant 0 : index
    %c0_23 = arith.constant 0 : index
    %42 = vector.load %arg4[%c0_21, %c0_22, %c0_23] : memref<3x288x64xbf16, #tpu.memory_space<vmem>>, vector<1x288x64xbf16>
    %43 = vector.shape_cast %42 : vector<1x288x64xbf16> to vector<288x64xbf16>
    %cst_24 = arith.constant dense<0.000000e+00> : vector<1x64xf32>
    %44 = tpu.matmul %41, %43, %cst_24 {dimension_numbers = #tpu.dot_dimension_numbers<[1], [0], [0], [1], [0, 0, 1, 1], [], []>} : vector<1x288xbf16>, vector<288x64xbf16>, vector<1x64xf32> -> vector<1x64xf32>
    %45 = vector.extract_strided_slice %39 {offsets = [1, 0], sizes = [1, 288], strides = [1, 1]} : vector<4x288xf32> to vector<1x288xf32>
    %46 = arith.truncf %45 : vector<1x288xf32> to vector<1x288xbf16>
    %c1_25 = arith.constant 1 : index
    %c0_26 = arith.constant 0 : index
    %c0_27 = arith.constant 0 : index
    %47 = vector.load %arg4[%c1_25, %c0_26, %c0_27] : memref<3x288x64xbf16, #tpu.memory_space<vmem>>, vector<1x288x64xbf16>
    %48 = vector.shape_cast %47 : vector<1x288x64xbf16> to vector<288x64xbf16>
    %cst_28 = arith.constant dense<0.000000e+00> : vector<1x64xf32>
    %49 = tpu.matmul %46, %48, %cst_28 {dimension_numbers = #tpu.dot_dimension_numbers<[1], [0], [0], [1], [0, 0, 1, 1], [], []>} : vector<1x288xbf16>, vector<288x64xbf16>, vector<1x64xf32> -> vector<1x64xf32>
    %50 = arith.addf %44, %49 : vector<1x64xf32>
    %51 = vector.extract_strided_slice %39 {offsets = [2, 0], sizes = [1, 288], strides = [1, 1]} : vector<4x288xf32> to vector<1x288xf32>
    %52 = arith.truncf %51 : vector<1x288xf32> to vector<1x288xbf16>
    %c2_29 = arith.constant 2 : index
    %c0_30 = arith.constant 0 : index
    %c0_31 = arith.constant 0 : index
    %53 = vector.load %arg4[%c2_29, %c0_30, %c0_31] : memref<3x288x64xbf16, #tpu.memory_space<vmem>>, vector<1x288x64xbf16>
    %54 = vector.shape_cast %53 : vector<1x288x64xbf16> to vector<288x64xbf16>
    %cst_32 = arith.constant dense<0.000000e+00> : vector<1x64xf32>
    %55 = tpu.matmul %52, %54, %cst_32 {dimension_numbers = #tpu.dot_dimension_numbers<[1], [0], [0], [1], [0, 0, 1, 1], [], []>} : vector<1x288xbf16>, vector<288x64xbf16>, vector<1x64xf32> -> vector<1x64xf32>
    %56 = arith.addf %50, %55 : vector<1x64xf32>
    %c0_33 = arith.constant 0 : index
    %c0_34 = arith.constant 0 : index
    %57 = vector.load %arg5[%c0_33, %c0_34] : memref<1x64xf32, #tpu.memory_space<vmem>>, vector<1x64xf32>
    %58 = arith.addf %56, %57 : vector<1x64xf32>
    %cst_35 = arith.constant 0.000000e+00 : f32
    %59 = vector.broadcast %cst_35 : f32 to vector<1x64xf32>
    %60 = arith.maximumf %58, %59 : vector<1x64xf32>
    %61 = arith.truncf %60 : vector<1x64xf32> to vector<1x64xbf16>
    %c0_36 = arith.constant 0 : index
    %c0_37 = arith.constant 0 : index
    %62 = vector.load %arg6[%c0_36, %c0_37] : memref<64x32xbf16, #tpu.memory_space<vmem>>, vector<64x32xbf16>
    %cst_38 = arith.constant dense<0.000000e+00> : vector<1x32xf32>
    %63 = tpu.matmul %61, %62, %cst_38 {dimension_numbers = #tpu.dot_dimension_numbers<[1], [0], [0], [1], [0, 0, 1, 1], [], []>} : vector<1x64xbf16>, vector<64x32xbf16>, vector<1x32xf32> -> vector<1x32xf32>
    %c0_39 = arith.constant 0 : index
    %c0_40 = arith.constant 0 : index
    %64 = vector.load %arg7[%c0_39, %c0_40] : memref<1x32xf32, #tpu.memory_space<vmem>>, vector<1x32xf32>
    %65 = arith.addf %63, %64 : vector<1x32xf32>
    %cst_41 = arith.constant 0.000000e+00 : f32
    %66 = vector.broadcast %cst_41 : f32 to vector<1x32xf32>
    %67 = arith.maximumf %65, %66 : vector<1x32xf32>
    %68 = arith.truncf %67 : vector<1x32xf32> to vector<1x32xbf16>
    %c0_42 = arith.constant 0 : index
    %c0_43 = arith.constant 0 : index
    %69 = vector.load %arg8[%c0_42, %c0_43] : memref<32x32xbf16, #tpu.memory_space<vmem>>, vector<32x32xbf16>
    %cst_44 = arith.constant dense<0.000000e+00> : vector<1x32xf32>
    %70 = tpu.matmul %68, %69, %cst_44 {dimension_numbers = #tpu.dot_dimension_numbers<[1], [0], [0], [1], [0, 0, 1, 1], [], []>} : vector<1x32xbf16>, vector<32x32xbf16>, vector<1x32xf32> -> vector<1x32xf32>
    %c0_45 = arith.constant 0 : index
    %c0_46 = arith.constant 0 : index
    %71 = vector.load %arg9[%c0_45, %c0_46] : memref<1x32xf32, #tpu.memory_space<vmem>>, vector<1x32xf32>
    %72 = arith.addf %70, %71 : vector<1x32xf32>
    %cst_47 = arith.constant 0.000000e+00 : f32
    %73 = vector.broadcast %cst_47 : f32 to vector<1x32xf32>
    %74 = arith.maximumf %72, %73 : vector<1x32xf32>
    %c0_48 = arith.constant 0 : index
    %c0_49 = arith.constant 0 : index
    %c0_50 = arith.constant 0 : index
    %75 = vector.load %arg10[%c0_48, %c0_49, %c0_50] : memref<1x1x32xf32, #tpu.memory_space<vmem>>, vector<1x1x32xf32>
    %76 = vector.shape_cast %75 : vector<1x1x32xf32> to vector<1x32xf32>
    %77 = vector.shape_cast %74 : vector<1x32xf32> to vector<1x1x32xf32>
    tpu.vector_store %arg10[%c0_48, %c0_49, %c0_50], %77 {strides = array<i32>} : memref<1x1x32xf32, #tpu.memory_space<vmem>>, vector<1x1x32xf32>,
    return
  }
  func.func @transform_0(%arg0: i32) -> (i32, i32, i32, i32) {
    %c0_i32 = arith.constant 0 : i32
    %c0_i32_0 = arith.constant 0 : i32
    %c0_i32_1 = arith.constant 0 : i32
    %c0_i32_2 = arith.constant 0 : i32
    return %c0_i32, %arg0, %c0_i32_0, %c0_i32_1 : i32, i32, i32, i32
  }
  func.func @transform_1(%arg0: i32) -> (i32, i32, i32) {
    %c0_i32 = arith.constant 0 : i32
    %c0_i32_0 = arith.constant 0 : i32
    %c0_i32_1 = arith.constant 0 : i32
    %c0_i32_2 = arith.constant 0 : i32
    return %c0_i32, %c0_i32_0, %c0_i32_1 : i32, i32, i32
  }
  func.func @transform_2(%arg0: i32) -> (i32, i32) {
    %c0_i32 = arith.constant 0 : i32
    %c0_i32_0 = arith.constant 0 : i32
    %c0_i32_1 = arith.constant 0 : i32
    return %c0_i32, %c0_i32_0 : i32, i32
  }
  func.func @transform_3(%arg0: i32) -> (i32, i32, i32) {
    %c0_i32 = arith.constant 0 : i32
    %c0_i32_0 = arith.constant 0 : i32
    %c0_i32_1 = arith.constant 0 : i32
    %c0_i32_2 = arith.constant 0 : i32
    return %c0_i32, %c0_i32_0, %c0_i32_1 : i32, i32, i32
  }
  func.func @transform_4(%arg0: i32) -> (i32, i32) {
    %c0_i32 = arith.constant 0 : i32
    %c0_i32_0 = arith.constant 0 : i32
    %c0_i32_1 = arith.constant 0 : i32
    return %c0_i32, %c0_i32_0 : i32, i32
  }
  func.func @transform_5(%arg0: i32) -> (i32, i32) {
    %c0_i32 = arith.constant 0 : i32
    %c0_i32_0 = arith.constant 0 : i32
    %c0_i32_1 = arith.constant 0 : i32
    return %c0_i32, %c0_i32_0 : i32, i32
  }
  func.func @transform_6(%arg0: i32) -> (i32, i32) {
    %c0_i32 = arith.constant 0 : i32
    %c0_i32_0 = arith.constant 0 : i32
    %c0_i32_1 = arith.constant 0 : i32
    return %c0_i32, %c0_i32_0 : i32, i32
  }
  func.func @transform_7(%arg0: i32) -> (i32, i32) {
    %c0_i32 = arith.constant 0 : i32
    %c0_i32_0 = arith.constant 0 : i32
    %c0_i32_1 = arith.constant 0 : i32
    return %c0_i32, %c0_i32_0 : i32, i32
  }
  func.func @transform_8(%arg0: i32) -> (i32, i32) {
    %c0_i32 = arith.constant 0 : i32
    %c0_i32_0 = arith.constant 0 : i32
    %c0_i32_1 = arith.constant 0 : i32
    return %c0_i32, %c0_i32_0 : i32, i32
  }
  func.func @transform_9(%arg0: i32) -> (i32, i32, i32) {
    %c0_i32 = arith.constant 0 : i32
    %c0_i32_0 = arith.constant 0 : i32
    %c0_i32_1 = arith.constant 0 : i32
    return %arg0, %c0_i32, %c0_i32_0 : i32, i32, i32
  }
}

</mosaic_0001>

<bundles_post_ra>
// kernel: cnn3d_forward_pallas.1
= control target key start
LH: loop header
LB: loop body
LE: loop exit
PB: predicated region body
PF: predicated region fallthrough
CT: control target
= control target key end

     0   :  { %s17054_s0 = inlined_call_operand.vmem [shape: f32[2,2,6,768], index: 0, kind: input, shape index: {}]   ;;  %s17055_s1 = inlined_call_operand.vmem [shape: bf16[5,768,288], index: 1, kind: input, shape index: {}]   ;;  %s17056_s2 = inlined_call_operand.vmem [shape: f32[1,288], index: 2, kind: input, shape index: {}]   ;;  %s17057_s3 = inlined_call_operand.vmem [shape: bf16[3,288,64], index: 3, kind: input, shape index: {}]   ;;  %s17058_s4 = inlined_call_operand.vmem [shape: f32[1,64], index: 4, kind: input, shape index: {}]   ;;  %s17059_s5 = inlined_call_operand.vmem [shape: bf16[64,32], index: 5, kind: input, shape index: {}]   ;;  %s17060_s6 = inlined_call_operand.vmem [shape: f32[1,32], index: 6, kind: input, shape index: {}]   ;;  %s17061_s7 = inlined_call_operand.vmem [shape: bf16[32,32], index: 7, kind: input, shape index: {}]   ;;  %s17062_s8 = inlined_call_operand.vmem [shape: f32[1,32], index: 8, kind: input, shape index: {}]   ;;  %s17063_s9 = inlined_call_operand.hbm [shape: f32[2,1,32], index: 9, kind: output, shape index: {}]  }
   0x1   :  { %17065 = sst [smem:[#allocation6_spill]] %s17054_s0 }
   0x2   :  { %14 = vsyncpa [#allocation4], 0 }
   0x3   :  { %16 = vsyncpa [#allocation4 + $0x1], 0  ;;  %s12165_s30 = smov 0   ;;  %s12167_s10 = smov 0  }
   0x4   :  { %s12169_s11 = smov 0   ;;  %s12171_s12 = smov 0  }
   0x5 LB: > { %s17064_s13 = sadd.s32 4294967295, %s12113_s12   ;;  %s7257_s14 = sadd.s32 4294967294, %s12113_s12   ;;  %s12113_s12 = sphi %s12171_s12, %s17073_s12   ;;  %s12109_s11 = sphi %s12169_s11, %s17072_s11   ;;  %s12105_s10 = sphi %s12167_s10, %s17071_s10   ;;  %s12101_s30 = sphi %s12165_s30, %s17070_s30  }
   0x6   : > { %s12188_s15 = sadd.s32 1, %s12113_s12   ;;  %s29_s16 = sadd.s32 1, %s12109_s11 }
   0x7   : > { %s26_s17 = ssub.s32 %s12113_s12, %s12188_s15  ;;  %p36_p0 = scmp.ne.s32.totalorder %s12109_s11, %s12105_s10 }
   0x8   : > { %p27_p1 = scmp.eq.s32.totalorder %s26_s17, 0  ;;  %p37_p2 = scmp.eq.s32.totalorder %s12113_s12, 0 }
   0x9   : > { %p234_p3 = scmp.eq.s32.totalorder %s17064_s13, 1  ;;  %p239_p4 = scmp.ne.s32.totalorder %s12105_s10, %s12101_s30 }
   0xa   : > { %s12201_s18 = scalar_select %p27_p1, %s12109_s11, %s29_s16  }
   0xb   : > { %p38_p5 = por %p37_p2, %p36_p0  ;;  %p12203_p6 = por %p234_p3, %p36_p0 }
   0xc   : > { %p240_p7 = scmp.eq.s32.totalorder %s7257_s14, 1  ;;  %p7259_p9 = scmp.ge.s32.totalorder %s12113_s12, 2 }
   0xe   : > { %p12207_p8 = por %p240_p7, %p239_p4  ;;  %280 = sbr.rel (%p7259_p9) target bundleno = 40 (0x28), region = 48 }
  0x13   : > { %283 = sbr.rel (!%p38_p5) target bundleno = 40 (0x28), region = 52  ;;  %s285_s21 = sand.u32 (%p38_p5), 1, %s12109_s11  }
  0x14   : > { %s12010_s22 = smul.u32 (%p38_p5), 48, %s12113_s12  ;;  %s17068_s0 = sld [smem:[#allocation6_spill]] (%p38_p5) }
  0x15   : > { %s12009_s23 = smul.u32 (%p38_p5), 96, %s285_s21 }
  0x17   : > { %s287_s27 = scalar_lea.vmem (%p38_p5), [#allocation2], %s12009_s23 }
  0x1a   : > { %s290_s26 = scalar_lea.vmem %s17068_s0, %s12010_s22 }
  0x1b   : > { %v303_v0 = vld [vmem:[%s290_s26] sm:$0xff]  ;;  %v305_v1 = vld [vmem:[%s290_s26 + $0x8] sm:$0xff]  ;;  %v307_v2 = vld [vmem:[%s290_s26 + $0x10] sm:$0xff] }
  0x1c   : > { %304 = vst [vmem:[%s287_s27] sm:$0xff] %v303_v0  ;;  %v309_v3 = vld [vmem:[%s290_s26 + $0x18] sm:$0xff]  ;;  %v311_v4 = vld [vmem:[%s290_s26 + $0x20] sm:$0xff]  ;;  %v313_v5 = vld [vmem:[%s290_s26 + $0x28] sm:$0xff] }
  0x1d   : > { %306 = vst [vmem:[%s287_s27 + $0x8] sm:$0xff] %v305_v1  ;;  %v315_v6 = vld [vmem:[%s290_s26 + $0x60] sm:$0xff]  ;;  %v317_v7 = vld [vmem:[%s290_s26 + $0x68] sm:$0xff]  ;;  %v319_v8 = vld [vmem:[%s290_s26 + $0x70] sm:$0xff] }
  0x1e   : > { %308 = vst [vmem:[%s287_s27 + $0x10] sm:$0xff] %v307_v2  ;;  %v321_v9 = vld [vmem:[%s290_s26 + $0x78] sm:$0xff]  ;;  %v323_v10 = vld [vmem:[%s290_s26 + $0x80] sm:$0xff]  ;;  %v325_v11 = vld [vmem:[%s290_s26 + $0x88] sm:$0xff] }
  0x1f   : > { %310 = vst [vmem:[%s287_s27 + $0x18] sm:$0xff] %v309_v3 }
  0x20   : > { %312 = vst [vmem:[%s287_s27 + $0x20] sm:$0xff] %v311_v4 }
  0x21   : > { %314 = vst [vmem:[%s287_s27 + $0x28] sm:$0xff] %v313_v5 }
  0x22   : > { %316 = vst [vmem:[%s287_s27 + $0x30] sm:$0xff] %v315_v6 }
  0x23   : > { %318 = vst [vmem:[%s287_s27 + $0x38] sm:$0xff] %v317_v7 }
  0x24   : > { %320 = vst [vmem:[%s287_s27 + $0x40] sm:$0xff] %v319_v8 }
  0x25   : > { %322 = vst [vmem:[%s287_s27 + $0x48] sm:$0xff] %v321_v9 }
  0x26   : > { %324 = vst [vmem:[%s287_s27 + $0x50] sm:$0xff] %v323_v10 }
  0x27   : > { %326 = vst [vmem:[%s287_s27 + $0x58] sm:$0xff] %v325_v11 }
  0x28 PF: > { %p7261_p10 = scmp.ge.s32.totalorder %s12113_s12, 1  ;;  %p331_p11 = scmp.lt.s32.totalorder %s12113_s12, 3 }
  0x2a   : > { %p332_p12 = pnand %p7261_p10, %p331_p11 }
  0x2b   : > { %s12474_s28 = sand.u32 (!%p332_p12), 1, %s12105_s10   ;;  %s17069_s13 = sadd.s32 (!%p332_p12), 4294967295, %s12113_s12  }
  0x2c   : > { %335 = sbr.rel (%p332_p12) target bundleno = 1357 (0x54d), region = 75  ;;  %s7192_s17 = scalar_lea.hbm (!%p332_p12), %s17063_s9, %s17069_s13 }
  0x2d   : > { %s12011_s21 = smul.u32 (!%p332_p12), 96, %s12474_s28  ;;  %s371_s23 = scalar_lea.vmem (!%p332_p12), [#allocation3], %s12474_s28 }
  0x2e   : > { %s7196_s25 = sshll.u32 (!%p332_p12), %s7192_s17, 4  ;;  %s7184_s26 = scalar_lea.sflag (!%p332_p12), [#allocation4], %s12474_s28  ;;  %s7197_s25 = int_to_ptr.hbm [resolvable:$true] %s7196_s25 }
  0x2f   : > { %s12501_s24 = scalar_lea.vmem (!%p332_p12), [#allocation2], %s12011_s21  ;;  %s12065_s27 = sshra.s32 (!%p332_p12), %s7197_s25, 4  ;;  %s12066_s27 = int_to_ptr.hbm [resolvable:$true] %s12065_s27 }
  0x30   : > { %s12067_s29 = scalar_lea.hbm (!%p332_p12), %s12066_s27, 1  ;;  %s12071_s14 = scalar_lea.hbm (!%p332_p12), %s17063_s9, 2 }
  0x31   : > { %v7540_v12 = vld [vmem:[%s17055_s1 + $0x528] sm:$0xf]  ;;  %v11395_v13 = vld [vmem:[%s17055_s1 + $0x530] sm:$0xf0]  ;;  %v7528_v23 = vld [vmem:[%s17055_s1 + $0x510] sm:$0xf]  ;;  %p12068_p13 = scmp.ne.s32.totalorder %s12066_s27, %s12067_s29  ;;  %p12072_p2 = scmp.lt.s32.totalorder %s12066_s27, %s17063_s9 }
  0x32   : > { %v7636_v14 = vld [vmem:[%s17055_s1 + $0x5e8] sm:$0xf]  ;;  %v7541_v15 = vor.u32 %v11395_v13, %v7540_v12  ;;  %v11419_v16 = vld [vmem:[%s17055_s1 + $0x5f0] sm:$0xf0]  ;;  %v11392_v25 = vld [vmem:[%s17055_s1 + $0x518] sm:$0xf0]  ;;  %p12073_p3 = scmp.lt.s32.totalorder %s12071_s14, %s12067_s29 }
  0x33   : > { %v7732_v17 = vld [vmem:[%s17055_s1 + $0x6a8] sm:$0xf]  ;;  %v11443_v18 = vld [vmem:[%s17055_s1 + $0x6b0] sm:$0xf0]  ;;  %v7637_v19 = vor.u32 %v11419_v16, %v7636_v14  ;;  %v7624_v26 = vld [vmem:[%s17055_s1 + $0x5d0] sm:$0xf]  ;;  %v7529_v28 = vor.u32 %v11392_v25, %v7528_v23  ;;  %p12069_p0 = pnand %p12068_p13, %p12203_p6 }
  0x34   : > { %v7733_v20 = vor.u32 %v11443_v18, %v7732_v17  ;;  %v7828_v21 = vld [vmem:[%s17055_s1 + $0x768] sm:$0xf]  ;;  %v11467_v22 = vld [vmem:[%s17055_s1 + $0x770] sm:$0xf0]  ;;  %1550 = vmatpush.bf16.msra.mxu0 %v7541_v15  ;;  %v11416_v27 = vld [vmem:[%s17055_s1 + $0x5d8] sm:$0xf0]  ;;  %p12074_p4 = por %p12073_p3, %p12072_p2 }
  0x35   : > { %v7829_v24 = vor.u32 %v11467_v22, %v7828_v21  ;;  %1563 = vmatpush.bf16.msra.mxu1 %v7637_v19  ;;  %v7625_v29 = vor.u32 %v11416_v27, %v7624_v26  ;;  %v7720_v30 = vld [vmem:[%s17055_s1 + $0x690] sm:$0xf]  ;;  %v11440_v31 = vld [vmem:[%s17055_s1 + $0x698] sm:$0xf0]  ;;  %v7516_v35 = vld [vmem:[%s17055_s1 + $0x4f8] sm:$0xf]  ;;  %p12070_p1 = pneg %p12069_p0 }
  0x36   : > { %1576 = vmatpush.bf16.msra.mxu2 %v7733_v20  ;;  %v7816_v32 = vld [vmem:[%s17055_s1 + $0x750] sm:$0xf]  ;;  %v7721_v33 = vor.u32 %v11440_v31, %v7720_v30  ;;  %v11464_v34 = vld [vmem:[%s17055_s1 + $0x758] sm:$0xf0]  ;;  %v11389_v36 = vld [vmem:[%s17055_s1 + $0x500] sm:$0xf0] }
  0x37   : > { %1589 = vmatpush.bf16.msra.mxu3 %v7829_v24  ;;  %v7817_v37 = vor.u32 %v11464_v34, %v7816_v32  ;;  %v7612_v38 = vld [vmem:[%s17055_s1 + $0x5b8] sm:$0xf]  ;;  %v11413_v39 = vld [vmem:[%s17055_s1 + $0x5c0] sm:$0xf0]  ;;  %v7517_v41 = vor.u32 %v11389_v36, %v7516_v35  ;;  %v7504_v47 = vld [vmem:[%s17055_s1 + $0x4e0] sm:$0xf]  ;;  %p12075_p5 = pnand %p12074_p4, %p12070_p1 }
  0x38   : > { %v7708_v40 = vld [vmem:[%s17055_s1 + $0x678] sm:$0xf]  ;;  %1551 = vmatpush.bf16.msra.mxu0 %v7529_v28  ;;  %v11437_v42 = vld [vmem:[%s17055_s1 + $0x680] sm:$0xf0]  ;;  %v7613_v45 = vor.u32 %v11413_v39, %v7612_v38  ;;  %v11386_v48 = vld [vmem:[%s17055_s1 + $0x4e8] sm:$0xf0] }
  0x39   : > { %v7804_v43 = vld [vmem:[%s17055_s1 + $0x738] sm:$0xf]  ;;  %v11461_v44 = vld [vmem:[%s17055_s1 + $0x740] sm:$0xf0]  ;;  %1564 = vmatpush.bf16.msra.mxu1 %v7625_v29  ;;  %v7709_v46 = vor.u32 %v11437_v42, %v7708_v40  ;;  %v7600_v49 = vld [vmem:[%s17055_s1 + $0x5a0] sm:$0xf]  ;;  %v7505_v56 = vor.u32 %v11386_v48, %v7504_v47 }
  0x3a   : > { %1577 = vmatpush.bf16.msra.mxu2 %v7721_v33  ;;  %v7805_v50 = vor.u32 %v11461_v44, %v7804_v43  ;;  %v11410_v51 = vld [vmem:[%s17055_s1 + $0x5a8] sm:$0xf0]  ;;  %v7696_v52 = vld [vmem:[%s17055_s1 + $0x660] sm:$0xf]  ;;  %v7492_v59 = vld [vmem:[%s17055_s1 + $0x4c8] sm:$0xf] }
  0x3b   : > { %1590 = vmatpush.bf16.msra.mxu3 %v7817_v37  ;;  %v11434_v53 = vld [vmem:[%s17055_s1 + $0x668] sm:$0xf0]  ;;  %v7792_v54 = vld [vmem:[%s17055_s1 + $0x720] sm:$0xf]  ;;  %v7601_v57 = vor.u32 %v11410_v51, %v7600_v49  ;;  %v11383_v60 = vld [vmem:[%s17055_s1 + $0x4d0] sm:$0xf0] }
  0x3c   : > { %v11458_v55 = vld [vmem:[%s17055_s1 + $0x728] sm:$0xf0]  ;;  %1552 = vmatpush.bf16.msra.mxu0 %v7517_v41  ;;  %v7697_v58 = vor.u32 %v11434_v53, %v7696_v52  ;;  %v7588_v61 = vld [vmem:[%s17055_s1 + $0x588] sm:$0xf]  ;;  %v11407_v63 = vld [vmem:[%s17055_s1 + $0x590] sm:$0xf0]  ;;  %v7493_v4 = vor.u32 %v11383_v60, %v7492_v59 }
  0x3d   : > { %1565 = vmatpush.bf16.msra.mxu1 %v7613_v45  ;;  %v7793_v62 = vor.u32 %v11458_v55, %v7792_v54  ;;  %v7684_v0 = vld [vmem:[%s17055_s1 + $0x648] sm:$0xf]  ;;  %v11431_v1 = vld [vmem:[%s17055_s1 + $0x650] sm:$0xf0]  ;;  %v7589_v5 = vor.u32 %v11407_v63, %v7588_v61  ;;  %v7480_v7 = vld [vmem:[%s17055_s1 + $0x4b0] sm:$0xf] }
  0x3e   : > { %1578 = vmatpush.bf16.msra.mxu2 %v7709_v46  ;;  %v7780_v2 = vld [vmem:[%s17055_s1 + $0x708] sm:$0xf]  ;;  %v11455_v3 = vld [vmem:[%s17055_s1 + $0x710] sm:$0xf0]  ;;  %v7685_v6 = vor.u32 %v11431_v1, %v7684_v0  ;;  %v11380_v8 = vld [vmem:[%s17055_s1 + $0x4b8] sm:$0xf0] }
  0x3f   : > { %1591 = vmatpush.bf16.msra.mxu3 %v7805_v50  ;;  %v7576_v9 = vld [vmem:[%s17055_s1 + $0x570] sm:$0xf]  ;;  %v7781_v10 = vor.u32 %v11455_v3, %v7780_v2  ;;  %v11404_v11 = vld [vmem:[%s17055_s1 + $0x578] sm:$0xf0]  ;;  %v7481_v16 = vor.u32 %v11380_v8, %v7480_v7  ;;  %v7468_v19 = vld [vmem:[%s17055_s1 + $0x498] sm:$0xf] }
  0x40   : > { %1553 = vmatpush.bf16.msra.mxu0 %v7505_v56  ;;  %v7672_v12 = vld [vmem:[%s17055_s1 + $0x630] sm:$0xf]  ;;  %v11428_v13 = vld [vmem:[%s17055_s1 + $0x638] sm:$0xf0]  ;;  %v7577_v17 = vor.u32 %v11404_v11, %v7576_v9  ;;  %v11377_v20 = vld [vmem:[%s17055_s1 + $0x4a0] sm:$0xf0] }
  0x41   : > { %1566 = vmatpush.bf16.msra.mxu1 %v7601_v57  ;;  %v7768_v14 = vld [vmem:[%s17055_s1 + $0x6f0] sm:$0xf]  ;;  %v11452_v15 = vld [vmem:[%s17055_s1 + $0x6f8] sm:$0xf0]  ;;  %v7673_v18 = vor.u32 %v11428_v13, %v7672_v12  ;;  %v7564_v21 = vld [vmem:[%s17055_s1 + $0x558] sm:$0xf]  ;;  %v7469_v28 = vor.u32 %v11377_v20, %v7468_v19 }
  0x42   : > { %1579 = vmatpush.bf16.msra.mxu2 %v7697_v58  ;;  %v7769_v22 = vor.u32 %v11452_v15, %v7768_v14  ;;  %v11401_v23 = vld [vmem:[%s17055_s1 + $0x560] sm:$0xf0]  ;;  %v7660_v24 = vld [vmem:[%s17055_s1 + $0x618] sm:$0xf]  ;;  %v7456_v29 = vld [vmem:[%s17055_s1 + $0x480] sm:$0xf] }
  0x43   : > { %1592 = vmatpush.bf16.msra.mxu3 %v7793_v62  ;;  %v11425_v25 = vld [vmem:[%s17055_s1 + $0x620] sm:$0xf0]  ;;  %v7756_v26 = vld [vmem:[%s17055_s1 + $0x6d8] sm:$0xf]  ;;  %v11374_v30 = vld [vmem:[%s17055_s1 + $0x488] sm:$0xf0]  ;;  %v7565_v31 = vor.u32 %v11401_v23, %v7564_v21 }
  0x44   : > { %1554 = vmatpush.bf16.msra.mxu0 %v7493_v4  ;;  %v11449_v27 = vld [vmem:[%s17055_s1 + $0x6e0] sm:$0xf0]  ;;  %v7661_v32 = vor.u32 %v11425_v25, %v7660_v24  ;;  %v7552_v33 = vld [vmem:[%s17055_s1 + $0x540] sm:$0xf]  ;;  %v11398_v34 = vld [vmem:[%s17055_s1 + $0x548] sm:$0xf0]  ;;  %v7457_v43 = vor.u32 %v11374_v30, %v7456_v29 }
  0x45   : > { %1567 = vmatpush.bf16.msra.mxu1 %v7589_v5  ;;  %v7648_v35 = vld [vmem:[%s17055_s1 + $0x600] sm:$0xf]  ;;  %v7757_v36 = vor.u32 %v11449_v27, %v7756_v26  ;;  %v11422_v37 = vld [vmem:[%s17055_s1 + $0x608] sm:$0xf0]  ;;  %v7924_v38 = vld [vmem:[%s17055_s1 + $0x828] sm:$0xf]  ;;  %v7553_v47 = vor.u32 %v11398_v34, %v7552_v33 }
  0x46   : > { %1580 = vmatpush.bf16.msra.mxu2 %v7685_v6  ;;  %v11491_v39 = vld [vmem:[%s17055_s1 + $0x830] sm:$0xf0]  ;;  %v8020_v40 = vld [vmem:[%s17055_s1 + $0x8e8] sm:$0xf]  ;;  %v11394_v42 = vld [vmem:[%s17055_s1 + $0x52c] sm:$0xf]  ;;  %v7649_v48 = vor.u32 %v11422_v37, %v7648_v35 }
  0x47   : > { %1593 = vmatpush.bf16.msra.mxu3 %v7781_v10  ;;  %v11515_v41 = vld [vmem:[%s17055_s1 + $0x8f0] sm:$0xf0]  ;;  %v7542_v44 = vld [vmem:[%s17055_s1 + $0x534] sm:$0xf0]  ;;  %v7744_v45 = vld [vmem:[%s17055_s1 + $0x6c0] sm:$0xf]  ;;  %v7925_v51 = vor.u32 %v11491_v39, %v7924_v38 }
  0x48   : > { %1555 = vmatpush.bf16.msra.mxu0 %v7481_v16  ;;  %v11446_v46 = vld [vmem:[%s17055_s1 + $0x6c8] sm:$0xf0]  ;;  %v7638_v50 = vld [vmem:[%s17055_s1 + $0x5f4] sm:$0xf0]  ;;  %v8021_v52 = vor.u32 %v11515_v41, %v8020_v40  ;;  %v7912_v53 = vld [vmem:[%s17055_s1 + $0x810] sm:$0xf]  ;;  %v7545_v54 = vor.u32 %v11394_v42, %v7542_v44 }
  0x49   : > { %1568 = vmatpush.bf16.msra.mxu1 %v7577_v17  ;;  %v11418_v49 = vld [vmem:[%s17055_s1 + $0x5ec] sm:$0xf]  ;;  %v7745_v55 = vor.u32 %v11446_v46, %v7744_v45  ;;  %v11488_v56 = vld [vmem:[%s17055_s1 + $0x818] sm:$0xf0]  ;;  %v8008_v57 = vld [vmem:[%s17055_s1 + $0x8d0] sm:$0xf] }
  0x4a   : > { %1581 = vmatpush.bf16.msra.mxu2 %v7673_v18  ;;  %v11512_v58 = vld [vmem:[%s17055_s1 + $0x8d8] sm:$0xf0]  ;;  %v7641_v59 = vor.u32 %v11418_v49, %v7638_v50  ;;  %v11391_v60 = vld [vmem:[%s17055_s1 + $0x514] sm:$0xf]  ;;  %v7530_v61 = vld [vmem:[%s17055_s1 + $0x51c] sm:$0xf0]  ;;  %v7913_v0 = vor.u32 %v11488_v56, %v7912_v53 }
  0x4b   : > { %1594 = vmatpush.bf16.msra.mxu3 %v7769_v22  ;;  %v11415_v62 = vld [vmem:[%s17055_s1 + $0x5d4] sm:$0xf]  ;;  %v7626_v63 = vld [vmem:[%s17055_s1 + $0x5dc] sm:$0xf0]  ;;  %v8009_v1 = vor.u32 %v11512_v58, %v8008_v57  ;;  %v7900_v2 = vld [vmem:[%s17055_s1 + $0x7f8] sm:$0xf]  ;;  %v7533_v4 = vor.u32 %v11391_v60, %v7530_v61 }
  0x4c   : > { %1556 = vmatpush.bf16.msra.mxu0 %v7469_v28  ;;  %v11485_v3 = vld [vmem:[%s17055_s1 + $0x800] sm:$0xf0]  ;;  %v7996_v5 = vld [vmem:[%s17055_s1 + $0x8b8] sm:$0xf]  ;;  %v7629_v7 = vor.u32 %v11415_v62, %v7626_v63  ;;  %v11388_v8 = vld [vmem:[%s17055_s1 + $0x4fc] sm:$0xf] }
  0x4d   : > { %1569 = vmatpush.bf16.msra.mxu1 %v7565_v31  ;;  %v11509_v6 = vld [vmem:[%s17055_s1 + $0x8c0] sm:$0xf0]  ;;  %v7518_v9 = vld [vmem:[%s17055_s1 + $0x504] sm:$0xf0]  ;;  %v11412_v10 = vld [vmem:[%s17055_s1 + $0x5bc] sm:$0xf]  ;;  %v7901_v13 = vor.u32 %v11485_v3, %v7900_v2 }
  0x4e   : > { %1582 = vmatpush.bf16.msra.mxu2 %v7661_v32  ;;  %v7614_v11 = vld [vmem:[%s17055_s1 + $0x5c4] sm:$0xf0]  ;;  %v7888_v12 = vld [vmem:[%s17055_s1 + $0x7e0] sm:$0xf]  ;;  %v7997_v14 = vor.u32 %v11509_v6, %v7996_v5  ;;  %v11482_v15 = vld [vmem:[%s17055_s1 + $0x7e8] sm:$0xf0]  ;;  %v7521_v17 = vor.u32 %v11388_v8, %v7518_v9 }
  0x4f   : > { %1595 = vmatpush.bf16.msra.mxu3 %v7757_v36  ;;  %v7984_v16 = vld [vmem:[%s17055_s1 + $0x8a0] sm:$0xf]  ;;  %v11506_v18 = vld [vmem:[%s17055_s1 + $0x8a8] sm:$0xf0]  ;;  %v379_v19 = vld [vmem:[%s12501_s24 + $0x30] sm:$0x3f]  ;;  %v7617_v21 = vor.u32 %v11412_v10, %v7614_v11  ;;  %v7889_v28 = vor.u32 %v11482_v15, %v7888_v12 }
  0x50   : > { %1557 = vmatpush.bf16.msra.mxu0 %v7457_v43  ;;  %v380_v20 = vld [vmem:[%s12501_s24 + $0x38] sm:$0x3f]  ;;  %v11385_v22 = vld [vmem:[%s17055_s1 + $0x4e4] sm:$0xf]  ;;  %v7506_v23 = vld [vmem:[%s17055_s1 + $0x4ec] sm:$0xf0]  ;;  %v12511_v24 = vpack.c.bf16 %v379_v19, %v379_v19  ;;  %v7985_v29 = vor.u32 %v11506_v18, %v7984_v16 }
  0x51   : > { %1570 = vmatpush.bf16.msra.mxu1 %v7553_v47  ;;  %v12513_v25 = vpack.c.bf16 %v380_v20, %v380_v20  ;;  %v11409_v26 = vld [vmem:[%s17055_s1 + $0x5a4] sm:$0xf]  ;;  %v7602_v27 = vld [vmem:[%s17055_s1 + $0x5ac] sm:$0xf0]  ;;  %v7876_v30 = vld [vmem:[%s17055_s1 + $0x7c8] sm:$0xf]  ;;  %v7509_v33 = vor.u32 %v11385_v22, %v7506_v23 }
  0x52   : > { %1583 = vmatpush.bf16.msra.mxu2 %v7649_v48  ;;  %v11479_v31 = vld [vmem:[%s17055_s1 + $0x7d0] sm:$0xf0]  ;;  %v381_v32 = vld [vmem:[%s12501_s24 + $0x40] sm:$0x3f]  ;;  %v7972_v34 = vld [vmem:[%s17055_s1 + $0x888] sm:$0xf]  ;;  %v7605_v38 = vor.u32 %v11409_v26, %v7602_v27 }
  0x53   : > { %1596 = vmatpush.bf16.msra.mxu3 %v7745_v55  ;;  %v11503_v35 = vld [vmem:[%s17055_s1 + $0x890] sm:$0xf0]  ;;  %1558 = vmatmul.bf16.vlgmr.msra.gmra.mxu0 %v12511_v24  ;;  %v12535_v36 = vpack.c.bf16 %v381_v32, %v381_v32  ;;  %v382_v37 = vld [vmem:[%s12501_s24 + $0x48] sm:$0x3f]  ;;  %v7494_v40 = vld [vmem:[%s17055_s1 + $0x4d4] sm:$0xf0]  ;;  %v7877_v44 = vor.u32 %v11479_v31, %v7876_v30 }
  0x54   : > { %1602 = vmatpush.bf16.msrb.mxu0 %v7925_v51  ;;  %v11382_v39 = vld [vmem:[%s17055_s1 + $0x4cc] sm:$0xf]  ;;  %1571 = vmatmul.bf16.vlgmr.msra.gmra.mxu1 %v12513_v25  ;;  %v12545_v41 = vpack.c.bf16 %v382_v37, %v382_v37  ;;  %v7590_v43 = vld [vmem:[%s17055_s1 + $0x594] sm:$0xf0]  ;;  %v7973_v45 = vor.u32 %v11503_v35, %v7972_v34  ;;  %v7864_v46 = vld [vmem:[%s17055_s1 + $0x7b0] sm:$0xf] }
  0x55   : > { %1615 = vmatpush.bf16.msrb.mxu1 %v8021_v52  ;;  %v11406_v42 = vld [vmem:[%s17055_s1 + $0x58c] sm:$0xf]  ;;  %1584 = vmatmul.bf16.vlgmr.msra.gmra.mxu2 %v12535_v36  ;;  %v7497_v47 = vor.u32 %v11382_v39, %v7494_v40  ;;  %v11476_v48 = vld [vmem:[%s17055_s1 + $0x7b8] sm:$0xf0]  ;;  %v7960_v49 = vld [vmem:[%s17055_s1 + $0x870] sm:$0xf] }
  0x56   : > { %1628 = vmatpush.bf16.msrb.mxu2 %v7545_v54  ;;  %v11500_v50 = vld [vmem:[%s17055_s1 + $0x878] sm:$0xf0]  ;;  %1597 = vmatmul.bf16.vlgmr.msra.gmra.mxu3 %v12545_v41  ;;  %v7593_v51 = vor.u32 %v11406_v42, %v7590_v43  ;;  %v11379_v52 = vld [vmem:[%s17055_s1 + $0x4b4] sm:$0xf]  ;;  %v7482_v53 = vld [vmem:[%s17055_s1 + $0x4bc] sm:$0xf0]  ;;  %v7865_v56 = vor.u32 %v11476_v48, %v7864_v46 }
  0x57   : > { %1641 = vmatpush.bf16.msrb.mxu3 %v7641_v59  ;;  %v11403_v54 = vld [vmem:[%s17055_s1 + $0x574] sm:$0xf]  ;;  %v7578_v55 = vld [vmem:[%s17055_s1 + $0x57c] sm:$0xf0]  ;;  %v7961_v57 = vor.u32 %v11500_v50, %v7960_v49  ;;  %v7852_v58 = vld [vmem:[%s17055_s1 + $0x798] sm:$0xf]  ;;  %v7485_v59 = vor.u32 %v11379_v52, %v7482_v53 }
  0x58   : > { %1603 = vmatpush.bf16.msrb.mxu0 %v7913_v0  ;;  %v11473_v60 = vld [vmem:[%s17055_s1 + $0x7a0] sm:$0xf0]  ;;  %v7948_v61 = vld [vmem:[%s17055_s1 + $0x858] sm:$0xf]  ;;  %v7581_v63 = vor.u32 %v11403_v54, %v7578_v55  ;;  %v11376_v0 = vld [vmem:[%s17055_s1 + $0x49c] sm:$0xf] }
  0x59   : > { %1616 = vmatpush.bf16.msrb.mxu1 %v8009_v1  ;;  %v11497_v62 = vld [vmem:[%s17055_s1 + $0x860] sm:$0xf0]  ;;  %v7470_v1 = vld [vmem:[%s17055_s1 + $0x4a4] sm:$0xf0]  ;;  %v11400_v2 = vld [vmem:[%s17055_s1 + $0x55c] sm:$0xf] }
  0x5a   : > { %1629 = vmatpush.bf16.msrb.mxu2 %v7533_v4  ;;  %v7566_v3 = vld [vmem:[%s17055_s1 + $0x564] sm:$0xf0]  ;;  %v7853_v4 = vor.u32 %v11473_v60, %v7852_v58  ;;  %v7949_v5 = vor.u32 %v11497_v62, %v7948_v61  ;;  %v7840_v6 = vld [vmem:[%s17055_s1 + $0x780] sm:$0xf]  ;;  %v7473_v9 = vor.u32 %v11376_v0, %v7470_v1  ;;  %v11494_v10 = vld [vmem:[%s17055_s1 + $0x848] sm:$0xf0] }
  0x5b   : > { %1642 = vmatpush.bf16.msrb.mxu3 %v7629_v7  ;;  %v11470_v7 = vld [vmem:[%s17055_s1 + $0x788] sm:$0xf0]  ;;  %v7936_v8 = vld [vmem:[%s17055_s1 + $0x840] sm:$0xf]  ;;  %v11373_v11 = vld [vmem:[%s17055_s1 + $0x484] sm:$0xf] }
  0x5c   : > { %1604 = vmatpush.bf16.msrb.mxu0 %v7901_v13  ;;  %v7458_v12 = vld [vmem:[%s17055_s1 + $0x48c] sm:$0xf0]  ;;  %v7569_v13 = vor.u32 %v11400_v2, %v7566_v3  ;;  %v7734_v15 = vld [vmem:[%s17055_s1 + $0x6b4] sm:$0xf0]  ;;  %v11466_v16 = vld [vmem:[%s17055_s1 + $0x76c] sm:$0xf]  ;;  %v7841_v20 = vor.u32 %v11470_v7, %v7840_v6 }
  0x5d   : > { %1617 = vmatpush.bf16.msrb.mxu1 %v7997_v14  ;;  %v11442_v14 = vld [vmem:[%s17055_s1 + $0x6ac] sm:$0xf]  ;;  %v7926_v19 = vld [vmem:[%s17055_s1 + $0x834] sm:$0xf0]  ;;  %v11397_v22 = vld [vmem:[%s17055_s1 + $0x544] sm:$0xf]  ;;  %v7461_v27 = vor.u32 %v11373_v11, %v7458_v12 }
  0x5e   : > { %1630 = vmatpush.bf16.msrb.mxu2 %v7521_v17  ;;  %v7830_v17 = vld [vmem:[%s17055_s1 + $0x774] sm:$0xf0]  ;;  %v11490_v18 = vld [vmem:[%s17055_s1 + $0x82c] sm:$0xf]  ;;  %v7554_v23 = vld [vmem:[%s17055_s1 + $0x54c] sm:$0xf0] }
  0x5f   : > { %1643 = vmatpush.bf16.msrb.mxu3 %v7617_v21  ;;  %v7937_v21 = vor.u32 %v11494_v10, %v7936_v8  ;;  %v383_v26 = vld [vmem:[%s12501_s24 + $0x50] sm:$0x3f]  ;;  %v8022_v30 = vld [vmem:[%s17055_s1 + $0x8f4] sm:$0xf0]  ;;  %v7833_v32 = vor.u32 %v11466_v16, %v7830_v17  ;;  %v7722_v35 = vld [vmem:[%s17055_s1 + $0x69c] sm:$0xf0] }
  0x60   : > { %1605 = vmatpush.bf16.msrb.mxu0 %v7889_v28  ;;  %v7737_v28 = vor.u32 %v11442_v14, %v7734_v15  ;;  %v384_v31 = vld [vmem:[%s12501_s24 + $0x58] sm:$0x3f]  ;;  %v11439_v34 = vld [vmem:[%s17055_s1 + $0x694] sm:$0xf]  ;;  %v7818_v39 = vld [vmem:[%s17055_s1 + $0x75c] sm:$0xf0]  ;;  %v12671_v43 = vpack.c.bf16 %v383_v26, %v383_v26 }
  0x61   : > { %1618 = vmatpush.bf16.msrb.mxu1 %v7985_v29  ;;  %v11514_v29 = vld [vmem:[%s17055_s1 + $0x8ec] sm:$0xf]  ;;  %v11463_v37 = vld [vmem:[%s17055_s1 + $0x754] sm:$0xf]  ;;  %v7914_v42 = vld [vmem:[%s17055_s1 + $0x81c] sm:$0xf0]  ;;  %v7725_v46 = vor.u32 %v11439_v34, %v7722_v35 }
  0x62   : > { %1631 = vmatpush.bf16.msrb.mxu2 %v7509_v33  ;;  %v7929_v33 = vor.u32 %v11490_v18, %v7926_v19  ;;  %v11487_v40 = vld [vmem:[%s17055_s1 + $0x814] sm:$0xf]  ;;  %v8010_v48 = vld [vmem:[%s17055_s1 + $0x8dc] sm:$0xf0]  ;;  %v7821_v49 = vor.u32 %v11463_v37, %v7818_v39  ;;  %v7710_v52 = vld [vmem:[%s17055_s1 + $0x684] sm:$0xf0] }
  0x63   : > { %1644 = vmatpush.bf16.msrb.mxu3 %v7605_v38  ;;  %v7557_v38 = vor.u32 %v11397_v22, %v7554_v23  ;;  %v7917_v50 = vor.u32 %v11487_v40, %v7914_v42  ;;  %v11460_v53 = vld [vmem:[%s17055_s1 + $0x73c] sm:$0xf]  ;;  %v7806_v54 = vld [vmem:[%s17055_s1 + $0x744] sm:$0xf0]  ;;  %v7698_v0 = vld [vmem:[%s17055_s1 + $0x66c] sm:$0xf0] }
  0x64   : > { %1606 = vmatpush.bf16.msrb.mxu0 %v7877_v44  ;;  %v8025_v44 = vor.u32 %v11514_v29, %v8022_v30  ;;  %v11484_v55 = vld [vmem:[%s17055_s1 + $0x7fc] sm:$0xf]  ;;  %v7998_v60 = vld [vmem:[%s17055_s1 + $0x8c4] sm:$0xf0]  ;;  %v7809_v61 = vor.u32 %v11460_v53, %v7806_v54  ;;  %v11457_v1 = vld [vmem:[%s17055_s1 + $0x724] sm:$0xf] }
  0x65   : > { %1619 = vmatpush.bf16.msrb.mxu1 %v7973_v45  ;;  %v12673_v45 = vpack.c.bf16 %v384_v31, %v384_v31  ;;  %v7794_v2 = vld [vmem:[%s17055_s1 + $0x72c] sm:$0xf0]  ;;  %v11481_v3 = vld [vmem:[%s17055_s1 + $0x7e4] sm:$0xf]  ;;  %v11430_v11 = vld [vmem:[%s17055_s1 + $0x64c] sm:$0xf] }
  0x66   : > { %1632 = vmatpush.bf16.msrb.mxu2 %v7497_v47  ;;  %v11511_v47 = vld [vmem:[%s17055_s1 + $0x8d4] sm:$0xf]  ;;  %v11505_v7 = vld [vmem:[%s17055_s1 + $0x8a4] sm:$0xf]  ;;  %v7986_v8 = vld [vmem:[%s17055_s1 + $0x8ac] sm:$0xf0] }
  0x67   : > { %1645 = vmatpush.bf16.msrb.mxu3 %v7593_v51  ;;  %v11436_v51 = vld [vmem:[%s17055_s1 + $0x67c] sm:$0xf]  ;;  %v7686_v12 = vld [vmem:[%s17055_s1 + $0x654] sm:$0xf0]  ;;  %v11478_v15 = vld [vmem:[%s17055_s1 + $0x7cc] sm:$0xf]  ;;  %v7989_v17 = vor.u32 %v11505_v7, %v7986_v8 }
  0x68   : > { %1607 = vmatpush.bf16.msrb.mxu0 %v7865_v56  ;;  %v7902_v56 = vld [vmem:[%s17055_s1 + $0x804] sm:$0xf0]  ;;  %v7713_v58 = vor.u32 %v11436_v51, %v7710_v52  ;;  %v7782_v14 = vld [vmem:[%s17055_s1 + $0x714] sm:$0xf0]  ;;  %v7689_v18 = vor.u32 %v11430_v11, %v7686_v12  ;;  %v11502_v19 = vld [vmem:[%s17055_s1 + $0x88c] sm:$0xf] }
  0x69   : > { %1620 = vmatpush.bf16.msrb.mxu1 %v7961_v57  ;;  %v8013_v57 = vor.u32 %v11511_v47, %v8010_v48  ;;  %v7905_v62 = vor.u32 %v11484_v55, %v7902_v56  ;;  %v7878_v16 = vld [vmem:[%s17055_s1 + $0x7d4] sm:$0xf0]  ;;  %v11427_v23 = vld [vmem:[%s17055_s1 + $0x634] sm:$0xf]  ;;  %v7674_v26 = vld [vmem:[%s17055_s1 + $0x63c] sm:$0xf0] }
  0x6a   : > { %1633 = vmatpush.bf16.msrb.mxu2 %v7485_v59  ;;  %v11508_v59 = vld [vmem:[%s17055_s1 + $0x8bc] sm:$0xf]  ;;  %v7881_v22 = vor.u32 %v11478_v15, %v7878_v16  ;;  %v11475_v29 = vld [vmem:[%s17055_s1 + $0x7b4] sm:$0xf]  ;;  %v7866_v30 = vld [vmem:[%s17055_s1 + $0x7bc] sm:$0xf0] }
  0x6b   : > { %1646 = vmatpush.bf16.msrb.mxu3 %v7581_v63  ;;  %v11433_v63 = vld [vmem:[%s17055_s1 + $0x664] sm:$0xf]  ;;  %v7962_v34 = vld [vmem:[%s17055_s1 + $0x87c] sm:$0xf0]  ;;  %v7869_v37 = vor.u32 %v11475_v29, %v7866_v30  ;;  %v7662_v39 = vld [vmem:[%s17055_s1 + $0x624] sm:$0xf0] }
  0x6c   : > { %1608 = vmatpush.bf16.msrb.mxu0 %v7853_v4  ;;  %v7890_v4 = vld [vmem:[%s17055_s1 + $0x7ec] sm:$0xf0]  ;;  %v7701_v6 = vor.u32 %v11433_v63, %v7698_v0  ;;  %v11448_v40 = vld [vmem:[%s17055_s1 + $0x6dc] sm:$0xf]  ;;  %v7758_v42 = vld [vmem:[%s17055_s1 + $0x6e4] sm:$0xf0] }
  0x6d   : > { %1621 = vmatpush.bf16.msrb.mxu1 %v7949_v5  ;;  %v8001_v5 = vor.u32 %v11508_v59, %v7998_v60  ;;  %v7893_v10 = vor.u32 %v11481_v3, %v7890_v4  ;;  %v11496_v48 = vld [vmem:[%s17055_s1 + $0x85c] sm:$0xf]  ;;  %v11421_v51 = vld [vmem:[%s17055_s1 + $0x604] sm:$0xf]  ;;  %v7650_v52 = vld [vmem:[%s17055_s1 + $0x60c] sm:$0xf0]  ;;  %v7761_v53 = vor.u32 %v11448_v40, %v7758_v42 }
  0x6e   : > { %1634 = vmatpush.bf16.msrb.mxu2 %v7473_v9  ;;  %v7797_v9 = vor.u32 %v11457_v1, %v7794_v2  ;;  %v11445_v55 = vld [vmem:[%s17055_s1 + $0x6c4] sm:$0xf]  ;;  %v7746_v56 = vld [vmem:[%s17055_s1 + $0x6cc] sm:$0xf0]  ;;  %v11396_v60 = vld [vmem:[%s17055_s1 + $0x538] sm:$0xf0]  ;;  %v7653_v1 = vor.u32 %v11421_v51, %v7650_v52 }
  0x6f   : > { %1647 = vmatpush.bf16.msrb.mxu3 %v7569_v13  ;;  %v11454_v13 = vld [vmem:[%s17055_s1 + $0x70c] sm:$0xf]  ;;  %v7548_v59 = vld [vmem:[%s17055_s1 + $0x530] sm:$0xf]  ;;  %v11420_v63 = vld [vmem:[%s17055_s1 + $0x5f8] sm:$0xf0] }
  0x70   : > { %1609 = vmatpush.bf16.msrb.mxu0 %v7841_v20  ;;  %v7974_v20 = vld [vmem:[%s17055_s1 + $0x894] sm:$0xf0]  ;;  %v7740_v0 = vld [vmem:[%s17055_s1 + $0x6b0] sm:$0xf]  ;;  %v11444_v2 = vld [vmem:[%s17055_s1 + $0x6b8] sm:$0xf0] }
  0x71   : > { %1622 = vmatpush.bf16.msrb.mxu1 %v7937_v21  ;;  %v7785_v21 = vor.u32 %v11454_v13, %v7782_v14  ;;  %v7977_v31 = vor.u32 %v11502_v19, %v7974_v20  ;;  %v11493_v3 = vld [vmem:[%s17055_s1 + $0x844] sm:$0xf]  ;;  %v7938_v4 = vld [vmem:[%s17055_s1 + $0x84c] sm:$0xf0]  ;;  %v11468_v8 = vld [vmem:[%s17055_s1 + $0x778] sm:$0xf0]  ;;  %v7741_v12 = vor.u32 %v11444_v2, %v7740_v0 }
  0x72   : > { %1635 = vmatpush.bf16.msrb.mxu2 %v7461_v27  ;;  %v11451_v27 = vld [vmem:[%s17055_s1 + $0x6f4] sm:$0xf]  ;;  %v7836_v7 = vld [vmem:[%s17055_s1 + $0x770] sm:$0xf]  ;;  %v7536_v11 = vld [vmem:[%s17055_s1 + $0x518] sm:$0xf]  ;;  %v7941_v13 = vor.u32 %v11493_v3, %v7938_v4 }
  0x73   : > { %1648 = vmatpush.bf16.msrb.mxu3 %v7557_v38  ;;  %1610 = vmatmul.bf16.vlgmr.msrb.gmra.mxu0 %v12671_v43  ;;  %v11424_v38 = vld [vmem:[%s17055_s1 + $0x61c] sm:$0xf]  ;;  %v11393_v14 = vld [vmem:[%s17055_s1 + $0x520] sm:$0xf0]  ;;  %v7632_v15 = vld [vmem:[%s17055_s1 + $0x5d8] sm:$0xf] }
  0x74   : > { %1654 = vmatpush.bf16.msra.mxu0 %v7737_v28  ;;  %1623 = vmatmul.bf16.vlgmr.msrb.gmra.mxu1 %v12673_v45  ;;  %v7770_v28 = vld [vmem:[%s17055_s1 + $0x6fc] sm:$0xf0]  ;;  %v11417_v16 = vld [vmem:[%s17055_s1 + $0x5e0] sm:$0xf0]  ;;  %v7824_v20 = vld [vmem:[%s17055_s1 + $0x758] sm:$0xf] }
  0x75   : > { %1667 = vmatpush.bf16.msra.mxu1 %v7833_v32  ;;  %1636 = vmatmul.bf16.vlgmr.msrb.gmra.mxu2 %v12511_v24  ;;  %v7677_v32 = vor.u32 %v11427_v23, %v7674_v26  ;;  %v7773_v35 = vor.u32 %v11451_v27, %v7770_v28  ;;  %v11441_v19 = vld [vmem:[%s17055_s1 + $0x6a0] sm:$0xf0]  ;;  %v7633_v23 = vor.u32 %v11417_v16, %v7632_v15  ;;  %v7524_v26 = vld [vmem:[%s17055_s1 + $0x500] sm:$0xf]  ;;  %v11390_v28 = vld [vmem:[%s17055_s1 + $0x508] sm:$0xf0] }
  0x76   : > { %1680 = vmatpush.bf16.msra.mxu2 %v7929_v33  ;;  %1649 = vmatmul.bf16.vlgmr.msrb.gmra.mxu3 %v12513_v25  ;;  %v11499_v33 = vld [vmem:[%s17055_s1 + $0x874] sm:$0xf]  ;;  %v7620_v29 = vld [vmem:[%s17055_s1 + $0x5c0] sm:$0xf]  ;;  %v11414_v30 = vld [vmem:[%s17055_s1 + $0x5c8] sm:$0xf0] }
  0x77   : > { %1693 = vmatpush.bf16.msra.mxu3 %v8025_v44  ;;  %v11472_v44 = vld [vmem:[%s17055_s1 + $0x79c] sm:$0xf]  ;;  %v7965_v47 = vor.u32 %v11499_v33, %v7962_v34  ;;  %v11438_v33 = vld [vmem:[%s17055_s1 + $0x688] sm:$0xf0]  ;;  %v7812_v34 = vld [vmem:[%s17055_s1 + $0x740] sm:$0xf] }
  0x78   : > { %1655 = vmatpush.bf16.msra.mxu0 %v7725_v46  ;;  %v7854_v46 = vld [vmem:[%s17055_s1 + $0x7a4] sm:$0xf0]  ;;  %v11387_v42 = vld [vmem:[%s17055_s1 + $0x4f0] sm:$0xf0]  ;;  %v7488_v2 = vld [vmem:[%s17055_s1 + $0x4b8] sm:$0xf] }
  0x79   : > { %1668 = vmatpush.bf16.msra.mxu1 %v7821_v49  ;;  %v7665_v49 = vor.u32 %v11424_v38, %v7662_v39  ;;  %v7857_v54 = vor.u32 %v11472_v44, %v7854_v46  ;;  %v7621_v38 = vor.u32 %v11414_v30, %v7620_v29  ;;  %v7512_v39 = vld [vmem:[%s17055_s1 + $0x4e8] sm:$0xf]  ;;  %v11411_v46 = vld [vmem:[%s17055_s1 + $0x5b0] sm:$0xf0]  ;;  %v11381_v4 = vld [vmem:[%s17055_s1 + $0x4c0] sm:$0xf0] }
  0x7a   : > { %1681 = vmatpush.bf16.msra.mxu2 %v7917_v50  ;;  %v7950_v50 = vld [vmem:[%s17055_s1 + $0x864] sm:$0xf0]  ;;  %v11459_v51 = vld [vmem:[%s17055_s1 + $0x730] sm:$0xf0]  ;;  %v7513_v52 = vor.u32 %v11387_v42, %v7512_v39  ;;  %v11378_v16 = vld [vmem:[%s17055_s1 + $0x4a8] sm:$0xf0] }
  0x7b   : > { %1694 = vmatpush.bf16.msra.mxu3 %v8013_v57  ;;  %v11469_v57 = vld [vmem:[%s17055_s1 + $0x784] sm:$0xf]  ;;  %v7608_v44 = vld [vmem:[%s17055_s1 + $0x5a8] sm:$0xf]  ;;  %v11375_v29 = vld [vmem:[%s17055_s1 + $0x490] sm:$0xf0] }
  0x7c   : > { %1656 = vmatpush.bf16.msra.mxu0 %v7713_v58  ;;  %v7842_v58 = vld [vmem:[%s17055_s1 + $0x78c] sm:$0xf0]  ;;  %v7560_v30 = vld [vmem:[%s17055_s1 + $0x548] sm:$0xf]  ;;  %vm6703_vm0 = vcmask 261120   ;;  %vm7128_vm1 = vcmask 523264  }
  0x7d   : > { %1669 = vmatpush.bf16.msra.mxu1 %v7809_v61  ;;  %v7953_v61 = vor.u32 %v11496_v48, %v7950_v50  ;;  %v7704_v48 = vld [vmem:[%s17055_s1 + $0x668] sm:$0xf]  ;;  %v8028_v39 = vld [vmem:[%s17055_s1 + $0x8f0] sm:$0xf]  ;;  %vm7181_vm2 = vcmask 253952  }
  0x7e   : > { %1682 = vmatpush.bf16.msra.mxu2 %v7905_v62  ;;  %v7644_v62 = vld [vmem:[%s17055_s1 + $0x5f0] sm:$0xf]  ;;  %v7800_v50 = vld [vmem:[%s17055_s1 + $0x728] sm:$0xf] }
  0x7f   : > { %1695 = vmatpush.bf16.msra.mxu3 %v8001_v5  ;;  %v7749_v5 = vor.u32 %v11445_v55, %v7746_v56  ;;  %v11384_v56 = vld [vmem:[%s17055_s1 + $0x4d8] sm:$0xf0]  ;;  %v8116_v42 = vld [vmem:[%s17055_s1 + $0xa8] sm:$0xf] }
  0x80   : > { %1657 = vmatpush.bf16.msra.mxu0 %v7701_v6  ;;  %v7845_v6 = vor.u32 %v11469_v57, %v7842_v58  ;;  %v7596_v57 = vld [vmem:[%s17055_s1 + $0x590] sm:$0xf]  ;;  %v11408_v58 = vld [vmem:[%s17055_s1 + $0x598] sm:$0xf0] }
  0x81   : > { %1670 = vmatpush.bf16.msra.mxu1 %v7797_v9  ;;  %v7549_v9 = vor.u32 %v11396_v60, %v7548_v59  ;;  %v7801_v59 = vor.u32 %v11459_v51, %v7800_v50  ;;  %v7692_v60 = vld [vmem:[%s17055_s1 + $0x650] sm:$0xf] }
  0x82   : > { %1683 = vmatpush.bf16.msra.mxu2 %v7893_v10  ;;  %v7645_v10 = vor.u32 %v11420_v63, %v7644_v62  ;;  %v7788_v62 = vld [vmem:[%s17055_s1 + $0x710] sm:$0xf]  ;;  %v11456_v63 = vld [vmem:[%s17055_s1 + $0x718] sm:$0xf0] }
  0x83   : > { %1696 = vmatpush.bf16.msra.mxu3 %v7989_v17  ;;  %v7837_v17 = vor.u32 %v11468_v8, %v7836_v7  ;;  %v7789_v7 = vor.u32 %v11456_v63, %v7788_v62  ;;  %v7680_v8 = vld [vmem:[%s17055_s1 + $0x638] sm:$0xf]  ;;  %v11248_v62 = vld [vmem:[%s17055_s1 + $0x98] sm:$0xf0] }
  0x84   : > { %1658 = vmatpush.bf16.msra.mxu0 %v7689_v18  ;;  %v7728_v18 = vld [vmem:[%s17055_s1 + $0x698] sm:$0xf] }
  0x85   : > { %1671 = vmatpush.bf16.msra.mxu1 %v7785_v21  ;;  %v11465_v21 = vld [vmem:[%s17055_s1 + $0x760] sm:$0xf0]  ;;  %v7729_v27 = vor.u32 %v11441_v19, %v7728_v18  ;;  %v11402_v18 = vld [vmem:[%s17055_s1 + $0x568] sm:$0xf0] }
  0x86   : > { %1684 = vmatpush.bf16.msra.mxu2 %v7881_v22  ;;  %v7537_v22 = vor.u32 %v11393_v14, %v7536_v11  ;;  %v11453_v11 = vld [vmem:[%s17055_s1 + $0x700] sm:$0xf0]  ;;  %v7476_v14 = vld [vmem:[%s17055_s1 + $0x4a0] sm:$0xf] }
  0x87   : > { %1697 = vmatpush.bf16.msra.mxu3 %v7977_v31  ;;  %v7825_v31 = vor.u32 %v11465_v21, %v7824_v20  ;;  %v7668_v20 = vld [vmem:[%s17055_s1 + $0x620] sm:$0xf]  ;;  %v11426_v21 = vld [vmem:[%s17055_s1 + $0x628] sm:$0xf0] }
  0x88   : > { %1659 = vmatpush.bf16.msra.mxu0 %v7677_v32  ;;  %v7716_v32 = vld [vmem:[%s17055_s1 + $0x680] sm:$0xf] }
  0x89   : > { %1672 = vmatpush.bf16.msra.mxu1 %v7773_v35  ;;  %v11462_v35 = vld [vmem:[%s17055_s1 + $0x748] sm:$0xf0]  ;;  %v7717_v40 = vor.u32 %v11438_v33, %v7716_v32  ;;  %v11399_v32 = vld [vmem:[%s17055_s1 + $0x550] sm:$0xf0]  ;;  %v7656_v33 = vld [vmem:[%s17055_s1 + $0x608] sm:$0xf] }
  0x8a   : > { %1685 = vmatpush.bf16.msra.mxu2 %v7869_v37  ;;  %v7525_v37 = vor.u32 %v11390_v28, %v7524_v26  ;;  %v7477_v26 = vor.u32 %v11378_v16, %v7476_v14  ;;  %v7464_v28 = vld [vmem:[%s17055_s1 + $0x488] sm:$0xf]  ;;  %v11269_v14 = vld [vmem:[%s17055_s1 + $0x140] sm:$0xf0] }
  0x8b   : > { %1698 = vmatpush.bf16.msra.mxu3 %v7965_v47  ;;  %v7813_v47 = vor.u32 %v11462_v35, %v7812_v34  ;;  %v11423_v34 = vld [vmem:[%s17055_s1 + $0x610] sm:$0xf0] }
  0x8c   : > { %1660 = vmatpush.bf16.msra.mxu0 %v7665_v49  ;;  %v11435_v49 = vld [vmem:[%s17055_s1 + $0x670] sm:$0xf0]  ;;  %v7657_v50 = vor.u32 %v11423_v34, %v7656_v33  ;;  %v7980_v33 = vld [vmem:[%s17055_s1 + $0x890] sm:$0xf]  ;;  %v11504_v34 = vld [vmem:[%s17055_s1 + $0x898] sm:$0xf0] }
  0x8d   : > { %1673 = vmatpush.bf16.msra.mxu1 %v7761_v53  ;;  %v7609_v53 = vor.u32 %v11411_v46, %v7608_v44  ;;  %v7705_v55 = vor.u32 %v11435_v49, %v7704_v48  ;;  %v11251_v44 = vld [vmem:[%s17055_s1 + $0xb0] sm:$0xf0]  ;;  %v7465_v46 = vor.u32 %v11375_v29, %v7464_v28  ;;  %v7752_v48 = vld [vmem:[%s17055_s1 + $0x6c8] sm:$0xf]  ;;  %v11266_v28 = vld [vmem:[%s17055_s1 + $0x128] sm:$0xf0] }
  0x8e   : > { %1686 = vmatpush.bf16.msra.mxu2 %v7857_v54  ;;  %v7500_v54 = vld [vmem:[%s17055_s1 + $0x4d0] sm:$0xf]  ;;  %v11447_v49 = vld [vmem:[%s17055_s1 + $0x6d0] sm:$0xf0] }
  0x8f   : > { %1699 = vmatpush.bf16.msra.mxu3 %v7953_v61  ;;  %v11432_v61 = vld [vmem:[%s17055_s1 + $0x658] sm:$0xf0]  ;;  %v7501_v0 = vor.u32 %v11384_v56, %v7500_v54  ;;  %v7920_v56 = vld [vmem:[%s17055_s1 + $0x818] sm:$0xf] }
  0x90   : > { %1661 = vmatpush.bf16.msra.mxu0 %v7653_v1  ;;  %v7597_v1 = vor.u32 %v11408_v58, %v7596_v57  ;;  %v7693_v3 = vor.u32 %v11432_v61, %v7692_v60  ;;  %v11489_v57 = vld [vmem:[%s17055_s1 + $0x820] sm:$0xf0]  ;;  %v8016_v58 = vld [vmem:[%s17055_s1 + $0x8d8] sm:$0xf]  ;;  %v8104_v61 = vld [vmem:[%s17055_s1 + $0x90] sm:$0xf] }
  0x91   : > { %1674 = vmatpush.bf16.msra.mxu1 %v7749_v5  ;;  %v7584_v5 = vld [vmem:[%s17055_s1 + $0x578] sm:$0xf]  ;;  %v11513_v60 = vld [vmem:[%s17055_s1 + $0x8e0] sm:$0xf0] }
  0x92   : > { %1687 = vmatpush.bf16.msra.mxu2 %v7845_v6  ;;  %v11405_v6 = vld [vmem:[%s17055_s1 + $0x580] sm:$0xf0] }
  0x93   : > { %1700 = vmatpush.bf16.msra.mxu3 %v7941_v13  ;;  %1662 = vmatmul.bf16.vlgmr.msra.gmra.mxu0 %v12535_v36  ;;  %v7585_v13 = vor.u32 %v11405_v6, %v7584_v5  ;;  %v7908_v5 = vld [vmem:[%s17055_s1 + $0x800] sm:$0xf]  ;;  %v11486_v6 = vld [vmem:[%s17055_s1 + $0x808] sm:$0xf0] }
  0x94   : > { %1706 = vmatpush.bf16.msrb.mxu0 %v7549_v9  ;;  %1675 = vmatmul.bf16.vlgmr.msra.gmra.mxu1 %v12545_v41  ;;  %v11429_v9 = vld [vmem:[%s17055_s1 + $0x640] sm:$0xf0] }
  0x95   : > { %1719 = vmatpush.bf16.msrb.mxu1 %v7645_v10  ;;  %1688 = vmatmul.bf16.vlgmr.msra.gmra.mxu2 %v12671_v43  ;;  %v7776_v10 = vld [vmem:[%s17055_s1 + $0x6f8] sm:$0xf]  ;;  %v7681_v15 = vor.u32 %v11429_v9, %v7680_v8  ;;  %v11510_v8 = vld [vmem:[%s17055_s1 + $0x8c8] sm:$0xf0] }
  0x96   : > { %1732 = vmatpush.bf16.msrb.mxu2 %v7741_v12  ;;  %1701 = vmatmul.bf16.vlgmr.msra.gmra.mxu3 %v12673_v45  ;;  %v7489_v12 = vor.u32 %v11381_v4, %v7488_v2  ;;  %v7777_v19 = vor.u32 %v11453_v11, %v7776_v10  ;;  %v11272_v2 = vld [vmem:[%s17055_s1 + $0x158] sm:$0xf0]  ;;  %v8105_v4 = vor.u32 %v11248_v62, %v8104_v61  ;;  %v8092_v9 = vld [vmem:[%s17055_s1 + $0x78] sm:$0xf]  ;;  %v11245_v10 = vld [vmem:[%s17055_s1 + $0x80] sm:$0xf0] }
  0x97   : > { %1745 = vmatpush.bf16.msrb.mxu3 %v7837_v17  ;;  %v7572_v17 = vld [vmem:[%s17055_s1 + $0x560] sm:$0xf]  ;;  %v8093_v16 = vor.u32 %v11245_v10, %v8092_v9  ;;  %v11498_v62 = vld [vmem:[%s17055_s1 + $0x868] sm:$0xf0]  ;;  %v7944_v9 = vld [vmem:[%s17055_s1 + $0x848] sm:$0xf] }
  0x98   : > { %1707 = vmatpush.bf16.msrb.mxu0 %v7537_v22  ;;  %v7764_v22 = vld [vmem:[%s17055_s1 + $0x6e0] sm:$0xf]  ;;  %v11495_v10 = vld [vmem:[%s17055_s1 + $0x850] sm:$0xf0] }
  0x99   : > { %1720 = vmatpush.bf16.msrb.mxu1 %v7633_v23  ;;  %v11450_v23 = vld [vmem:[%s17055_s1 + $0x6e8] sm:$0xf0]  ;;  %v7956_v61 = vld [vmem:[%s17055_s1 + $0x860] sm:$0xf] }
  0x9a   : > { %1733 = vmatpush.bf16.msrb.mxu2 %v7729_v27  ;;  %v7573_v27 = vor.u32 %v11402_v18, %v7572_v17  ;;  %v7765_v35 = vor.u32 %v11450_v23, %v7764_v22  ;;  %v7896_v17 = vld [vmem:[%s17055_s1 + $0x7e8] sm:$0xf]  ;;  %v11483_v18 = vld [vmem:[%s17055_s1 + $0x7f0] sm:$0xf0]  ;;  %v11242_v22 = vld [vmem:[%s17055_s1 + $0x68] sm:$0xf0] }
  0x9b   : > { %1746 = vmatpush.bf16.msrb.mxu3 %v7825_v31  ;;  %v7669_v31 = vor.u32 %v11426_v21, %v7668_v20  ;;  %v11507_v20 = vld [vmem:[%s17055_s1 + $0x8b0] sm:$0xf0]  ;;  %v8080_v21 = vld [vmem:[%s17055_s1 + $0x60] sm:$0xf] }
  0x9c   : > { %1708 = vmatpush.bf16.msrb.mxu0 %v7525_v37  ;;  %v7932_v37 = vld [vmem:[%s17055_s1 + $0x830] sm:$0xf] }
  0x9d   : > { %1721 = vmatpush.bf16.msrb.mxu1 %v7621_v38  ;;  %v11492_v38 = vld [vmem:[%s17055_s1 + $0x838] sm:$0xf0] }
  0x9e   : > { %1734 = vmatpush.bf16.msrb.mxu2 %v7717_v40  ;;  %v11516_v40 = vld [vmem:[%s17055_s1 + $0x8f8] sm:$0xf0]  ;;  %v7933_v51 = vor.u32 %v11492_v38, %v7932_v37  ;;  %v11239_v37 = vld [vmem:[%s17055_s1 + $0x50] sm:$0xf0] }
  0x9f   : > { %1747 = vmatpush.bf16.msrb.mxu3 %v7813_v47  ;;  %v7561_v47 = vor.u32 %v11399_v32, %v7560_v30  ;;  %v8029_v54 = vor.u32 %v11516_v40, %v8028_v39  ;;  %v8081_v30 = vor.u32 %v11242_v22, %v8080_v21  ;;  %v11480_v32 = vld [vmem:[%s17055_s1 + $0x7d8] sm:$0xf0]  ;;  %v8164_v40 = vld [vmem:[%s17055_s1 + $0x108] sm:$0xf]  ;;  %v8128_v21 = vld [vmem:[%s17055_s1 + $0xc0] sm:$0xf] }
  0xa0   : > { %1709 = vmatpush.bf16.msrb.mxu0 %v7513_v52  ;;  %v8212_v52 = vld [vmem:[%s17055_s1 + $0x168] sm:$0xf]  ;;  %v11254_v22 = vld [vmem:[%s17055_s1 + $0xc8] sm:$0xf0] }
  0xa1   : > { %1722 = vmatpush.bf16.msrb.mxu1 %v7609_v53  ;;  %v11275_v53 = vld [vmem:[%s17055_s1 + $0x170] sm:$0xf0] }
  0xa2   : > { %1735 = vmatpush.bf16.msrb.mxu2 %v7705_v55  ;;  %v8117_v55 = vor.u32 %v11251_v44, %v8116_v42  ;;  %v8213_v63 = vor.u32 %v11275_v53, %v8212_v52  ;;  %v11263_v42 = vld [vmem:[%s17055_s1 + $0x110] sm:$0xf0]  ;;  %v7981_v44 = vor.u32 %v11504_v34, %v7980_v33  ;;  %v11236_v52 = vld [vmem:[%s17055_s1 + $0x38] sm:$0xf0]  ;;  %v8129_v34 = vor.u32 %v11254_v22, %v8128_v21 }
  0xa3   : > { %1748 = vmatpush.bf16.msrb.mxu3 %v7801_v59  ;;  %v7753_v59 = vor.u32 %v11447_v49, %v7752_v48  ;;  %v11477_v48 = vld [vmem:[%s17055_s1 + $0x7c0] sm:$0xf0]  ;;  %v7968_v49 = vld [vmem:[%s17055_s1 + $0x878] sm:$0xf]  ;;  %v8165_v53 = vor.u32 %v11263_v42, %v8164_v40  ;;  %v11320_v42 = vld [vmem:[%s17055_s1 + $0x2d8] sm:$0xf0] }
  0xa4   : > { %1710 = vmatpush.bf16.msrb.mxu0 %v7501_v0  ;;  %v7921_v0 = vor.u32 %v11489_v57, %v7920_v56  ;;  %v11260_v56 = vld [vmem:[%s17055_s1 + $0xf8] sm:$0xf0]  ;;  %v11359_v21 = vld [vmem:[%s17055_s1 + $0x410] sm:$0xf0] }
  0xa5   : > { %1723 = vmatpush.bf16.msrb.mxu1 %v7597_v1  ;;  %v8200_v1 = vld [vmem:[%s17055_s1 + $0x150] sm:$0xf] }
  0xa6   : > { %1736 = vmatpush.bf16.msrb.mxu2 %v7693_v3  ;;  %v8017_v3 = vor.u32 %v11513_v60, %v8016_v58  ;;  %v8201_v11 = vor.u32 %v11272_v2, %v8200_v1  ;;  %v11474_v60 = vld [vmem:[%s17055_s1 + $0x7a8] sm:$0xf0]  ;;  %v8140_v2 = vld [vmem:[%s17055_s1 + $0xd8] sm:$0xf] }
  0xa7   : > { %1749 = vmatpush.bf16.msrb.mxu3 %v7789_v7  ;;  %v8004_v7 = vld [vmem:[%s17055_s1 + $0x8c0] sm:$0xf] }
  0xa8   : > { %1711 = vmatpush.bf16.msrb.mxu0 %v7489_v12  ;;  %v7909_v12 = vor.u32 %v11486_v6, %v7908_v5  ;;  %v7848_v5 = vld [vmem:[%s17055_s1 + $0x788] sm:$0xf]  ;;  %v11471_v6 = vld [vmem:[%s17055_s1 + $0x790] sm:$0xf0] }
  0xa9   : > { %1724 = vmatpush.bf16.msrb.mxu1 %v7585_v13  ;;  %v8188_v13 = vld [vmem:[%s17055_s1 + $0x138] sm:$0xf] }
  0xaa   : > { %1737 = vmatpush.bf16.msrb.mxu2 %v7681_v15  ;;  %v8005_v15 = vor.u32 %v11510_v8, %v8004_v7  ;;  %v8189_v23 = vor.u32 %v11269_v14, %v8188_v13  ;;  %v7957_v7 = vor.u32 %v11498_v62, %v7956_v61  ;;  %v8308_v13 = vld [vmem:[%s17055_s1 + $0x228] sm:$0xf]  ;;  %v11299_v14 = vld [vmem:[%s17055_s1 + $0x230] sm:$0xf0]  ;;  %v11365_v61 = vld [vmem:[%s17055_s1 + $0x440] sm:$0xf0] }
  0xab   : > { %1750 = vmatpush.bf16.msrb.mxu3 %v7777_v19  ;;  %v7992_v19 = vld [vmem:[%s17055_s1 + $0x8a8] sm:$0xf] }
  0xac   : > { %1712 = vmatpush.bf16.msrb.mxu0 %v7477_v26  ;;  %v7897_v26 = vor.u32 %v11483_v18, %v7896_v17  ;;  %v7993_v29 = vor.u32 %v11507_v20, %v7992_v19  ;;  %v11323_v17 = vld [vmem:[%s17055_s1 + $0x2f0] sm:$0xf0]  ;;  %v8500_v18 = vld [vmem:[%s17055_s1 + $0x3a8] sm:$0xf]  ;;  %v7849_v19 = vor.u32 %v11471_v6, %v7848_v5  ;;  %v11314_v5 = vld [vmem:[%s17055_s1 + $0x2a8] sm:$0xf0] }
  0xad   : > { %1725 = vmatpush.bf16.msrb.mxu1 %v7573_v27  ;;  %v8176_v27 = vld [vmem:[%s17055_s1 + $0x120] sm:$0xf]  ;;  %v11347_v20 = vld [vmem:[%s17055_s1 + $0x3b0] sm:$0xf0] }
  0xae   : > { %1738 = vmatpush.bf16.msrb.mxu2 %v7669_v31  ;;  %v7884_v31 = vld [vmem:[%s17055_s1 + $0x7d0] sm:$0xf]  ;;  %v8177_v38 = vor.u32 %v11266_v28, %v8176_v27  ;;  %v373_v27 = vld [vmem:[%s12501_s24] sm:$0x3f]  ;;  %v8596_v28 = vld [vmem:[%s17055_s1 + $0x468] sm:$0xf]  ;;  %v8501_v33 = vor.u32 %v11347_v20, %v8500_v18 }
  0xaf   : > { %1751 = vmatpush.bf16.msrb.mxu3 %v7765_v35  ;;  %v8068_v35 = vld [vmem:[%s17055_s1 + $0x48] sm:$0xf]  ;;  %v7885_v39 = vor.u32 %v11480_v32, %v7884_v31  ;;  %v8464_v6 = vld [vmem:[%s17055_s1 + $0x360] sm:$0xf] }
  0xb0   : > { %1713 = vmatpush.bf16.msrb.mxu0 %v7465_v46  ;;  %v8069_v46 = vor.u32 %v11239_v37, %v8068_v35  ;;  %v374_v32 = vld [vmem:[%s12501_s24 + $0x8] sm:$0x3f]  ;;  %v8296_v35 = vld [vmem:[%s17055_s1 + $0x210] sm:$0xf]  ;;  %v11296_v37 = vld [vmem:[%s17055_s1 + $0x218] sm:$0xf0] }
  0xb1   : > { %1726 = vmatpush.bf16.msrb.mxu1 %v7561_v47  ;;  %v7872_v47 = vld [vmem:[%s17055_s1 + $0x7b8] sm:$0xf]  ;;  %v8452_v18 = vld [vmem:[%s17055_s1 + $0x348] sm:$0xf] }
  0xb2   : > { %1739 = vmatpush.bf16.msrb.mxu2 %v7657_v50  ;;  %v11501_v50 = vld [vmem:[%s17055_s1 + $0x880] sm:$0xf0]  ;;  %v8548_v20 = vld [vmem:[%s17055_s1 + $0x408] sm:$0xf] }
  0xb3   : > { %1752 = vmatpush.bf16.msrb.mxu3 %v7753_v59  ;;  %1714 = vmatmul.bf16.vlgmr.msrb.gmra.mxu0 %v12511_v24  ;;  %v7969_v57 = vor.u32 %v11501_v50, %v7968_v49  ;;  %v7860_v59 = vld [vmem:[%s17055_s1 + $0x7a0] sm:$0xf]  ;;  %v13273_v49 = vpack.c.bf16 %v374_v32, %v374_v32  ;;  %v8297_v50 = vor.u32 %v11296_v37, %v8296_v35  ;;  %v8440_v32 = vld [vmem:[%s17055_s1 + $0x330] sm:$0xf]  ;;  %v11356_v35 = vld [vmem:[%s17055_s1 + $0x3f8] sm:$0xf0] }
  0xb4   : > { %1758 = vmatpush.bf16.msra.mxu0 %v7933_v51  ;;  %1727 = vmatmul.bf16.vlgmr.msrb.gmra.mxu1 %v12513_v25  ;;  %v8056_v51 = vld [vmem:[%s17055_s1 + $0x30] sm:$0xf] }
  0xb5   : > { %1771 = vmatpush.bf16.msra.mxu1 %v8029_v54  ;;  %1740 = vmatmul.bf16.vlgmr.msrb.gmra.mxu2 %v12535_v36  ;;  %v7873_v54 = vor.u32 %v11477_v48, %v7872_v47  ;;  %v8057_v58 = vor.u32 %v11236_v52, %v8056_v51  ;;  %v8584_v47 = vld [vmem:[%s17055_s1 + $0x450] sm:$0xf]  ;;  %v11368_v48 = vld [vmem:[%s17055_s1 + $0x458] sm:$0xf0] }
  0xb6   : > { %2552 = vmatpush.bf16.msra.mxu2 %v8117_v55  ;;  %1753 = vmatmul.bf16.vlgmr.msrb.gmra.mxu3 %v12545_v41  ;;  %v8152_v55 = vld [vmem:[%s17055_s1 + $0xf0] sm:$0xf] }
  0xb7   : > { %2565 = vmatpush.bf16.msra.mxu3 %v8213_v63  ;;  %v8044_v63 = vld [vmem:[%s17055_s1 + $0x18] sm:$0xf]  ;;  %v8153_v1 = vor.u32 %v11260_v56, %v8152_v55  ;;  %v8585_v56 = vor.u32 %v11368_v48, %v8584_v47 }
  0xb8   : > { %1759 = vmatpush.bf16.msra.mxu0 %v7921_v0  ;;  %v11233_v0 = vld [vmem:[%s17055_s1 + $0x20] sm:$0xf0]  ;;  %v8380_v55 = vld [vmem:[%s17055_s1 + $0x2b8] sm:$0xf] }
  0xb9   : > { %1772 = vmatpush.bf16.msra.mxu1 %v8017_v3  ;;  %v7861_v3 = vor.u32 %v11474_v60, %v7860_v59  ;;  %v8045_v8 = vor.u32 %v11233_v0, %v8044_v63  ;;  %v11341_v59 = vld [vmem:[%s17055_s1 + $0x380] sm:$0xf0]  ;;  %v8572_v60 = vld [vmem:[%s17055_s1 + $0x438] sm:$0xf] }
  0xba   : > { %2553 = vmatpush.bf16.msra.mxu2 %v8105_v4  ;;  %v11257_v4 = vld [vmem:[%s17055_s1 + $0xe0] sm:$0xf0]  ;;  %v8332_v47 = vld [vmem:[%s17055_s1 + $0x258] sm:$0xf] }
  0xbb   : > { %2566 = vmatpush.bf16.msra.mxu3 %v8201_v11  ;;  %v8032_v11 = vld [vmem:[%s17055_s1] sm:$0xf] }
  0xbc   : > { %1760 = vmatpush.bf16.msra.mxu0 %v7909_v12  ;;  %v11230_v12 = vld [vmem:[%s17055_s1 + $0x8] sm:$0xf0] }
  0xbd   : > { %1773 = vmatpush.bf16.msra.mxu1 %v8005_v15  ;;  %v8141_v15 = vor.u32 %v11257_v4, %v8140_v2  ;;  %v11290_v2 = vld [vmem:[%s17055_s1 + $0x1e8] sm:$0xf0]  ;;  %v8573_v4 = vor.u32 %v11365_v61, %v8572_v60 }
  0xbe   : > { %2554 = vmatpush.bf16.msra.mxu2 %v8093_v16  ;;  %v8404_v16 = vld [vmem:[%s17055_s1 + $0x2e8] sm:$0xf] }
  0xbf   : > { %2567 = vmatpush.bf16.msra.mxu3 %v8189_v23  ;;  %v7945_v23 = vor.u32 %v11495_v10, %v7944_v9  ;;  %v8405_v31 = vor.u32 %v11323_v17, %v8404_v16  ;;  %v11362_v9 = vld [vmem:[%s17055_s1 + $0x428] sm:$0xf0]  ;;  %v11311_v17 = vld [vmem:[%s17055_s1 + $0x290] sm:$0xf0] }
  0xc0   : > { %1761 = vmatpush.bf16.msra.mxu0 %v7897_v26  ;;  %v8033_v26 = vor.u32 %v11230_v12, %v8032_v11 }
  0xc1   : > { %1774 = vmatpush.bf16.msra.mxu1 %v7993_v29  ;;  %v11371_v29 = vld [vmem:[%s17055_s1 + $0x470] sm:$0xf0] }
  0xc2   : > { %2555 = vmatpush.bf16.msra.mxu2 %v8081_v30  ;;  %v8309_v30 = vor.u32 %v11299_v14, %v8308_v13  ;;  %v8597_v40 = vor.u32 %v11371_v29, %v8596_v28  ;;  %v8260_v13 = vld [vmem:[%s17055_s1 + $0x1c8] sm:$0xf]  ;;  %v11287_v14 = vld [vmem:[%s17055_s1 + $0x1d0] sm:$0xf0]  ;;  %v11284_v28 = vld [vmem:[%s17055_s1 + $0x1b8] sm:$0xf0] }
  0xc3   : > { %2568 = vmatpush.bf16.msra.mxu3 %v8177_v38  ;;  %v8392_v38 = vld [vmem:[%s17055_s1 + $0x2d0] sm:$0xf]  ;;  %v8261_v22 = vor.u32 %v11287_v14, %v8260_v13 }
  0xc4   : > { %1762 = vmatpush.bf16.msra.mxu0 %v7885_v39  ;;  %v13256_v39 = vpack.c.bf16 %v373_v27, %v373_v27  ;;  %v8393_v51 = vor.u32 %v11320_v42, %v8392_v38  ;;  %v8248_v27 = vld [vmem:[%s17055_s1 + $0x1b0] sm:$0xf] }
  0xc5   : > { %1775 = vmatpush.bf16.msra.mxu1 %v7981_v44  ;;  %v8488_v44 = vld [vmem:[%s17055_s1 + $0x390] sm:$0xf]  ;;  %v8249_v37 = vor.u32 %v11284_v28, %v8248_v27  ;;  %v378_v27 = vld [vmem:[%s12501_s24 + $0x28] sm:$0x3f] }
  0xc6   : > { %2556 = vmatpush.bf16.msra.mxu2 %v8069_v46  ;;  %v11344_v46 = vld [vmem:[%s17055_s1 + $0x398] sm:$0xf0]  ;;  %v8344_v29 = vld [vmem:[%s17055_s1 + $0x270] sm:$0xf] }
  0xc7   : > { %2569 = vmatpush.bf16.msra.mxu3 %v8165_v53  ;;  %v8489_v52 = vor.u32 %v11344_v46, %v8488_v44  ;;  %v8284_v53 = vld [vmem:[%s17055_s1 + $0x1f8] sm:$0xf]  ;;  %v11281_v46 = vld [vmem:[%s17055_s1 + $0x1a0] sm:$0xf0] }
  0xc8   : > { %1763 = vmatpush.bf16.msra.mxu0 %v7873_v54  ;;  %v11293_v54 = vld [vmem:[%s17055_s1 + $0x200] sm:$0xf0]  ;;  %v8236_v44 = vld [vmem:[%s17055_s1 + $0x198] sm:$0xf] }
  0xc9   : > { %1776 = vmatpush.bf16.msra.mxu1 %v7969_v57  ;;  %v11317_v57 = vld [vmem:[%s17055_s1 + $0x2c0] sm:$0xf0]  ;;  %v8285_v62 = vor.u32 %v11293_v54, %v8284_v53 }
  0xca   : > { %2557 = vmatpush.bf16.msra.mxu2 %v8057_v58  ;;  %v8476_v58 = vld [vmem:[%s17055_s1 + $0x378] sm:$0xf]  ;;  %v8381_v63 = vor.u32 %v11317_v57, %v8380_v55  ;;  %v11329_v53 = vld [vmem:[%s17055_s1 + $0x320] sm:$0xf0]  ;;  %v8237_v57 = vor.u32 %v11281_v46, %v8236_v44 }
  0xcb   : > { %2570 = vmatpush.bf16.msra.mxu3 %v8153_v1  ;;  %v8477_v0 = vor.u32 %v11341_v59, %v8476_v58  ;;  %v8272_v1 = vld [vmem:[%s17055_s1 + $0x1e0] sm:$0xf]  ;;  %v8524_v55 = vld [vmem:[%s17055_s1 + $0x3d8] sm:$0xf]  ;;  %v11278_v59 = vld [vmem:[%s17055_s1 + $0x188] sm:$0xf0] }
  0xcc   : > { %1764 = vmatpush.bf16.msra.mxu0 %v7861_v3  ;;  %v8368_v3 = vld [vmem:[%s17055_s1 + $0x2a0] sm:$0xf]  ;;  %v8273_v10 = vor.u32 %v11290_v2, %v8272_v1  ;;  %v11326_v2 = vld [vmem:[%s17055_s1 + $0x308] sm:$0xf0] }
  0xcd   : > { %1777 = vmatpush.bf16.msra.mxu1 %v7957_v7  ;;  %v11338_v7 = vld [vmem:[%s17055_s1 + $0x368] sm:$0xf0]  ;;  %v8369_v11 = vor.u32 %v11314_v5, %v8368_v3  ;;  %v8224_v58 = vld [vmem:[%s17055_s1 + $0x180] sm:$0xf] }
  0xce   : > { %2558 = vmatpush.bf16.msra.mxu2 %v8045_v8  ;;  %v8560_v8 = vld [vmem:[%s17055_s1 + $0x420] sm:$0xf]  ;;  %v8465_v12 = vor.u32 %v11338_v7, %v8464_v6  ;;  %v11250_v3 = vld [vmem:[%s17055_s1 + $0xac] sm:$0xf]  ;;  %v8214_v6 = vld [vmem:[%s17055_s1 + $0x174] sm:$0xf0] }
  0xcf   : > { %2571 = vmatpush.bf16.msra.mxu3 %v8141_v15  ;;  %v8356_v15 = vld [vmem:[%s17055_s1 + $0x288] sm:$0xf]  ;;  %v8561_v16 = vor.u32 %v11362_v9, %v8560_v8  ;;  %v11274_v5 = vld [vmem:[%s17055_s1 + $0x16c] sm:$0xf]  ;;  %v8225_v8 = vor.u32 %v11278_v59, %v8224_v58  ;;  %v8310_v9 = vld [vmem:[%s17055_s1 + $0x234] sm:$0xf0] }
  0xd0   : > { %1765 = vmatpush.bf16.msra.mxu0 %v7849_v19  ;;  %v11335_v19 = vld [vmem:[%s17055_s1 + $0x350] sm:$0xf0]  ;;  %v1559_v38 = vpop.f32.mrf.mxu0  ;;  %v11298_v7 = vld [vmem:[%s17055_s1 + $0x22c] sm:$0xf]  ;;  %v11292_v58 = vld [vmem:[%s17055_s1 + $0x1fc] sm:$0xf] }
  0xd1   : > { %1778 = vmatpush.bf16.msra.mxu1 %v7945_v23  ;;  %v8357_v23 = vor.u32 %v11311_v17, %v8356_v15  ;;  %v1572_v48 = vpop.f32.mrf.mxu1  ;;  %v377_v17 = vld [vmem:[%s12501_s24 + $0x20] sm:$0x3f]  ;;  %v8286_v59 = vld [vmem:[%s17055_s1 + $0x204] sm:$0xf0] }
  0xd2   : > { %2559 = vmatpush.bf16.msra.mxu2 %v8033_v26  ;;  %v8453_v26 = vor.u32 %v11335_v19, %v8452_v18  ;;  %v1573_v54 = vadd.f32 %v1572_v48, %v1559_v38  ;;  %v11322_v18 = vld [vmem:[%s17055_s1 + $0x2ec] sm:$0xf]  ;;  %v8202_v38 = vld [vmem:[%s17055_s1 + $0x15c] sm:$0xf0] }
  0xd3   : > { %2572 = vmatpush.bf16.msra.mxu3 %v8129_v34  ;;  %1766 = vmatmul.bf16.vlgmr.msra.gmra.mxu0 %v12671_v43  ;;  %v8536_v34 = vld [vmem:[%s17055_s1 + $0x3f0] sm:$0xf] }
  0xd4   : > { %2578 = vmatpush.bf16.msrb.mxu0 %v8309_v30  ;;  %1779 = vmatmul.bf16.vlgmr.msra.gmra.mxu1 %v12673_v45  ;;  %v8549_v30 = vor.u32 %v11359_v21, %v8548_v20 }
  0xd5   : > { %2591 = vmatpush.bf16.msrb.mxu1 %v8405_v31  ;;  %2560 = vmatmul.bf16.vlgmr.msra.gmra.mxu2 %v13256_v39  ;;  %v11308_v31 = vld [vmem:[%s17055_s1 + $0x278] sm:$0xf0] }
  0xd6   : > { %2604 = vmatpush.bf16.msrb.mxu2 %v8501_v33  ;;  %2573 = vmatmul.bf16.vlgmr.msra.gmra.mxu3 %v13273_v49  ;;  %v11332_v33 = vld [vmem:[%s17055_s1 + $0x338] sm:$0xf0] }
  0xd7   : > { %2617 = vmatpush.bf16.msrb.mxu3 %v8597_v40  ;;  %v8345_v40 = vor.u32 %v11308_v31, %v8344_v29  ;;  %v8441_v42 = vor.u32 %v11332_v33, %v8440_v32  ;;  %v8313_v29 = vor.u32 %v11298_v7, %v8310_v9  ;;  %v11247_v31 = vld [vmem:[%s17055_s1 + $0x94] sm:$0xf]  ;;  %v8106_v32 = vld [vmem:[%s17055_s1 + $0x9c] sm:$0xf0]  ;;  %v8178_v7 = vld [vmem:[%s17055_s1 + $0x12c] sm:$0xf0] }
  0xd8   : > { %2579 = vmatpush.bf16.msrb.mxu0 %v8297_v50  ;;  %v8537_v50 = vor.u32 %v11356_v35, %v8536_v34  ;;  %v1585_v13 = vpop.f32.mrf.mxu2  ;;  %v11271_v33 = vld [vmem:[%s17055_s1 + $0x154] sm:$0xf]  ;;  %v8109_v48 = vor.u32 %v11247_v31, %v8106_v32  ;;  %v8274_v9 = vld [vmem:[%s17055_s1 + $0x1ec] sm:$0xf0]  ;;  %v8358_v31 = vld [vmem:[%s17055_s1 + $0x294] sm:$0xf0] }
  0xd9   : > { %2592 = vmatpush.bf16.msrb.mxu1 %v8393_v51  ;;  %v11305_v51 = vld [vmem:[%s17055_s1 + $0x260] sm:$0xf0]  ;;  %v1574_v19 = vpop.f32.mrf.mxu1  ;;  %v1586_v20 = vadd.f32 %v1585_v13, %v1573_v54  ;;  %v1598_v28 = vpop.f32.mrf.mxu3  ;;  %v11244_v54 = vld [vmem:[%s17055_s1 + $0x7c] sm:$0xf]  ;;  %v8370_v13 = vld [vmem:[%s17055_s1 + $0x2ac] sm:$0xf0] }
  0xda   : > { %2605 = vmatpush.bf16.msrb.mxu2 %v8489_v52  ;;  %v8428_v52 = vld [vmem:[%s17055_s1 + $0x318] sm:$0xf]  ;;  %v8333_v60 = vor.u32 %v11305_v51, %v8332_v47  ;;  %v13475_v47 = vpack.c.bf16 %v378_v27, %v378_v27  ;;  %v8394_v51 = vld [vmem:[%s17055_s1 + $0x2dc] sm:$0xf0] }
  0xdb   : > { %2618 = vmatpush.bf16.msrb.mxu3 %v8585_v56  ;;  %v11353_v56 = vld [vmem:[%s17055_s1 + $0x3e0] sm:$0xf0]  ;;  %v8429_v61 = vor.u32 %v11329_v53, %v8428_v52  ;;  %v1599_v34 = vadd.f32 %v1598_v28, %v1586_v20  ;;  %v8205_v52 = vor.u32 %v11271_v33, %v8202_v38  ;;  %v8070_v19 = vld [vmem:[%s17055_s1 + $0x54] sm:$0xf0]  ;;  %v11262_v20 = vld [vmem:[%s17055_s1 + $0x10c] sm:$0xf] }
  0xdc   : > { %2580 = vmatpush.bf16.msrb.mxu0 %v8285_v62  ;;  %v8320_v62 = vld [vmem:[%s17055_s1 + $0x240] sm:$0xf]  ;;  %v8525_v1 = vor.u32 %v11353_v56, %v8524_v55  ;;  %v8094_v55 = vld [vmem:[%s17055_s1 + $0x84] sm:$0xf0]  ;;  %v11268_v56 = vld [vmem:[%s17055_s1 + $0x13c] sm:$0xf] }
  0xdd   : > { %2593 = vmatpush.bf16.msrb.mxu1 %v8381_v63  ;;  %v11302_v63 = vld [vmem:[%s17055_s1 + $0x248] sm:$0xf0]  ;;  %v8058_v38 = vld [vmem:[%s17055_s1 + $0x3c] sm:$0xf0] }
  0xde   : > { %2606 = vmatpush.bf16.msrb.mxu2 %v8477_v0  ;;  %v8416_v0 = vld [vmem:[%s17055_s1 + $0x300] sm:$0xf]  ;;  %v8321_v14 = vor.u32 %v11302_v63, %v8320_v62  ;;  %v8097_v62 = vor.u32 %v11244_v54, %v8094_v55  ;;  %v11316_v63 = vld [vmem:[%s17055_s1 + $0x2bc] sm:$0xf] }
  0xdf   : > { %2619 = vmatpush.bf16.msrb.mxu3 %v8573_v4  ;;  %v8118_v4 = vld [vmem:[%s17055_s1 + $0xb4] sm:$0xf0]  ;;  %v8417_v15 = vor.u32 %v11326_v2, %v8416_v0  ;;  %v8382_v0 = vld [vmem:[%s17055_s1 + $0x2c4] sm:$0xf0] }
  0xe0   : > { %2581 = vmatpush.bf16.msrb.mxu0 %v8273_v10  ;;  %v8512_v10 = vld [vmem:[%s17055_s1 + $0x3c0] sm:$0xf]  ;;  %v8121_v21 = vor.u32 %v11250_v3, %v8118_v4  ;;  %v8289_v3 = vor.u32 %v11292_v58, %v8286_v59  ;;  %v11241_v4 = vld [vmem:[%s17055_s1 + $0x64] sm:$0xf]  ;;  %v8046_v58 = vld [vmem:[%s17055_s1 + $0x24] sm:$0xf0] }
  0xe1   : > { %2594 = vmatpush.bf16.msrb.mxu1 %v8369_v11  ;;  %v11350_v11 = vld [vmem:[%s17055_s1 + $0x3c8] sm:$0xf0]  ;;  %v11256_v59 = vld [vmem:[%s17055_s1 + $0xdc] sm:$0xf] }
  0xe2   : > { %2607 = vmatpush.bf16.msrb.mxu2 %v8465_v12  ;;  %v1561_v12 = vpop.f32.mrf.mxu0 }
  0xe3   : > { %2620 = vmatpush.bf16.msrb.mxu3 %v8561_v16  ;;  %v375_v16 = vld [vmem:[%s12501_s24 + $0x10] sm:$0x3f]  ;;  %v11313_v12 = vld [vmem:[%s17055_s1 + $0x2a4] sm:$0xf] }
  0xe4   : > { %2582 = vmatpush.bf16.msrb.mxu0 %v8261_v22  ;;  %v8217_v22 = vor.u32 %v11274_v5, %v8214_v6  ;;  %v13460_v35 = vpack.c.bf16 %v375_v16, %v375_v16  ;;  %v8082_v5 = vld [vmem:[%s17055_s1 + $0x6c] sm:$0xf0]  ;;  %v11265_v6 = vld [vmem:[%s17055_s1 + $0x124] sm:$0xf]  ;;  %v8373_v27 = vor.u32 %v11313_v12, %v8370_v13  ;;  %v11346_v13 = vld [vmem:[%s17055_s1 + $0x3ac] sm:$0xf] }
  0xe5   : > { %2595 = vmatpush.bf16.msrb.mxu1 %v8357_v23  ;;  %v8406_v23 = vld [vmem:[%s17055_s1 + $0x2f4] sm:$0xf0]  ;;  %v8226_v12 = vld [vmem:[%s17055_s1 + $0x18c] sm:$0xf0] }
  0xe6   : > { %2608 = vmatpush.bf16.msrb.mxu2 %v8453_v26  ;;  %v376_v26 = vld [vmem:[%s12501_s24 + $0x18] sm:$0x3f]  ;;  %v8409_v44 = vor.u32 %v11322_v18, %v8406_v23  ;;  %v11238_v18 = vld [vmem:[%s17055_s1 + $0x4c] sm:$0xf]  ;;  %s7194_s24 = sshll.u32 %s371_s23, 4  ;;  %s7195_s24 = int_to_ptr.vmem [resolvable:$true] %s7194_s24 }
  0xe7   : > { %2621 = vmatpush.bf16.msrb.mxu3 %v8549_v30  ;;  %v8513_v30 = vor.u32 %v11350_v11, %v8512_v10  ;;  %v13473_v46 = vpack.c.bf16 %v376_v26, %v376_v26  ;;  %v8385_v10 = vor.u32 %v11316_v63, %v8382_v0  ;;  %v8085_v11 = vor.u32 %v11241_v4, %v8082_v5  ;;  %v11286_v23 = vld [vmem:[%s17055_s1 + $0x1cc] sm:$0xf]  ;;  %v8262_v26 = vld [vmem:[%s17055_s1 + $0x1d4] sm:$0xf0]  ;;  %v8238_v63 = vld [vmem:[%s17055_s1 + $0x1a4] sm:$0xf0] }
  0xe8   : > { %2583 = vmatpush.bf16.msrb.mxu0 %v8249_v37  ;;  %v13462_v37 = vpack.c.bf16 %v377_v17, %v377_v17  ;;  %v8265_v33 = vor.u32 %v11286_v23, %v8262_v26  ;;  %v11229_v4 = vld [vmem:[%s17055_s1 + $0x4] sm:$0xf]  ;;  %v8034_v5 = vld [vmem:[%s17055_s1 + $0xc] sm:$0xf0] }
  0xe9   : > { %2596 = vmatpush.bf16.msrb.mxu1 %v8345_v40  ;;  %v11295_v40 = vld [vmem:[%s17055_s1 + $0x214] sm:$0xf]  ;;  %v8322_v23 = vld [vmem:[%s17055_s1 + $0x24c] sm:$0xf0] }
  0xea   : > { %2609 = vmatpush.bf16.msrb.mxu2 %v8441_v42  ;;  %v8298_v42 = vld [vmem:[%s17055_s1 + $0x21c] sm:$0xf0] }
  0xeb   : > { %2622 = vmatpush.bf16.msrb.mxu3 %v8537_v50  ;;  %v11319_v50 = vld [vmem:[%s17055_s1 + $0x2d4] sm:$0xf]  ;;  %v8301_v53 = vor.u32 %v11295_v40, %v8298_v42  ;;  %v8154_v42 = vld [vmem:[%s17055_s1 + $0xfc] sm:$0xf0] }
  0xec   : > { %2584 = vmatpush.bf16.msrb.mxu0 %v8237_v57  ;;  %v8190_v57 = vld [vmem:[%s17055_s1 + $0x144] sm:$0xf0]  ;;  %v11259_v40 = vld [vmem:[%s17055_s1 + $0xf4] sm:$0xf] }
  0xed   : > { %2597 = vmatpush.bf16.msrb.mxu1 %v8333_v60  ;;  %v1587_v60 = vpop.f32.mrf.mxu2  ;;  %v8193_v2 = vor.u32 %v11268_v56, %v8190_v57  ;;  %v8157_v55 = vor.u32 %v11259_v40, %v8154_v42  ;;  %v11232_v57 = vld [vmem:[%s17055_s1 + $0x1c] sm:$0xf]  ;;  %v11343_v40 = vld [vmem:[%s17055_s1 + $0x394] sm:$0xf]  ;;  %v8490_v42 = vld [vmem:[%s17055_s1 + $0x39c] sm:$0xf0] }
  0xee   : > { %2610 = vmatpush.bf16.msrb.mxu2 %v8429_v61  ;;  %v8397_v61 = vor.u32 %v11319_v50, %v8394_v51 }
  0xef   : > { %2623 = vmatpush.bf16.msrb.mxu3 %v8525_v1  ;;  %v1600_v1 = vpop.f32.mrf.mxu3 }
  0xf0   : > { %2585 = vmatpush.bf16.msrb.mxu0 %v8225_v8  ;;  %v11289_v8 = vld [vmem:[%s17055_s1 + $0x1e4] sm:$0xf]  ;;  %v11304_v1 = vld [vmem:[%s17055_s1 + $0x25c] sm:$0xf] }
  0xf1   : > { %2598 = vmatpush.bf16.msrb.mxu1 %v8321_v14  ;;  %v1611_v14 = vpop.f32.mrf.mxu0  ;;  %v8277_v16 = vor.u32 %v11289_v8, %v8274_v9  ;;  %v11253_v8 = vld [vmem:[%s17055_s1 + $0xc4] sm:$0xf]  ;;  %v8130_v9 = vld [vmem:[%s17055_s1 + $0xcc] sm:$0xf0] }
  0xf2   : > { %2611 = vmatpush.bf16.msrb.mxu2 %v8417_v15  ;;  %v8181_v15 = vor.u32 %v11265_v6, %v8178_v7  ;;  %v1612_v17 = vadd.f32 %v1611_v14, %v1599_v34  ;;  %v11235_v34 = vld [vmem:[%s17055_s1 + $0x34] sm:$0xf]  ;;  %v8502_v14 = vld [vmem:[%s17055_s1 + $0x3b4] sm:$0xf0] }
  0xf3   : > { %2624 = vmatpush.bf16.msrb.mxu3 %v8513_v30  ;;  %2586 = vmatmul.bf16.vlgmr.msrb.gmra.mxu0 %v13460_v35  ;;  %v11310_v30 = vld [vmem:[%s17055_s1 + $0x28c] sm:$0xf]  ;;  %v8061_v51 = vor.u32 %v11235_v34, %v8058_v38 }
  0xf4   : > { %2630 = vmatpush.bf16.msra.mxu0 %v8121_v21  ;;  %2599 = vmatmul.bf16.vlgmr.msrb.gmra.mxu1 %v13473_v46  ;;  %v1624_v21 = vpop.f32.mrf.mxu1  ;;  %v8361_v50 = vor.u32 %v11310_v30, %v8358_v31  ;;  %v8505_v30 = vor.u32 %v11346_v13, %v8502_v14  ;;  %v11243_v13 = vld [vmem:[%s17055_s1 + $0x70] sm:$0xf0] }
  0xf5   : > { %2643 = vmatpush.bf16.msra.mxu1 %v8217_v22  ;;  %2612 = vmatmul.bf16.vlgmr.msrb.gmra.mxu2 %v13462_v37  ;;  %v8166_v22 = vld [vmem:[%s17055_s1 + $0x114] sm:$0xf0]  ;;  %v13553_v28 = vadd.f32 %v1624_v21, %v1612_v17  ;;  %v11252_v21 = vld [vmem:[%s17055_s1 + $0xb8] sm:$0xf0] }
  0xf6   : > { %2656 = vmatpush.bf16.msra.mxu2 %v8313_v29  ;;  %2625 = vmatmul.bf16.vlgmr.msrb.gmra.mxu3 %v13475_v47  ;;  %v8073_v29 = vor.u32 %v11238_v18, %v8070_v19  ;;  %v8169_v32 = vor.u32 %v11262_v20, %v8166_v22  ;;  %v8598_v17 = vld [vmem:[%s17055_s1 + $0x474] sm:$0xf0]  ;;  %v8124_v18 = vld [vmem:[%s17055_s1 + $0xb0] sm:$0xf]  ;;  %v8037_v20 = vor.u32 %v11229_v4, %v8034_v5  ;;  %v11301_v22 = vld [vmem:[%s17055_s1 + $0x244] sm:$0xf] }
  0xf7   : > { %2669 = vmatpush.bf16.msra.mxu3 %v8409_v44  ;;  %v11283_v44 = vld [vmem:[%s17055_s1 + $0x1b4] sm:$0xf]  ;;  %v8125_v34 = vor.u32 %v11252_v21, %v8124_v18  ;;  %v8325_v38 = vor.u32 %v11301_v22, %v8322_v23  ;;  %v8196_v4 = vld [vmem:[%s17055_s1 + $0x140] sm:$0xf]  ;;  %v11270_v5 = vld [vmem:[%s17055_s1 + $0x148] sm:$0xf0] }
  0xf8   : > { %2631 = vmatpush.bf16.msra.mxu0 %v8109_v48  ;;  %v8250_v48 = vld [vmem:[%s17055_s1 + $0x1bc] sm:$0xf0]  ;;  %v8197_v14 = vor.u32 %v11270_v5, %v8196_v4  ;;  %v11334_v21 = vld [vmem:[%s17055_s1 + $0x34c] sm:$0xf]  ;;  %v8454_v22 = vld [vmem:[%s17055_s1 + $0x354] sm:$0xf0] }
  0xf9   : > { %2644 = vmatpush.bf16.msra.mxu1 %v8205_v52  ;;  %v11307_v52 = vld [vmem:[%s17055_s1 + $0x274] sm:$0xf]  ;;  %v1613_v54 = vpop.f32.mrf.mxu0  ;;  %v8253_v56 = vor.u32 %v11283_v44, %v8250_v48  ;;  %v1650_v19 = vpop.f32.mrf.mxu3  ;;  %v8586_v48 = vld [vmem:[%s17055_s1 + $0x45c] sm:$0xf0]  ;;  %v11358_v23 = vld [vmem:[%s17055_s1 + $0x40c] sm:$0xf] }
  0xfa   : > { %2657 = vmatpush.bf16.msra.mxu2 %v8301_v53  ;;  %v8346_v53 = vld [vmem:[%s17055_s1 + $0x27c] sm:$0xf0]  ;;  %v11367_v44 = vld [vmem:[%s17055_s1 + $0x454] sm:$0xf]  ;;  %v8493_v54 = vor.u32 %v11343_v40, %v8490_v42  ;;  %v11264_v40 = vld [vmem:[%s17055_s1 + $0x118] sm:$0xf0] }
  0xfb   : > { %2670 = vmatpush.bf16.msra.mxu3 %v8397_v61  ;;  %v8142_v61 = vld [vmem:[%s17055_s1 + $0xe4] sm:$0xf0]  ;;  %v8349_v0 = vor.u32 %v11307_v52, %v8346_v53 }
  0xfc   : > { %2632 = vmatpush.bf16.msra.mxu0 %v8097_v62  ;;  %v1626_v60 = vpop.f32.mrf.mxu1  ;;  %v11280_v62 = vld [vmem:[%s17055_s1 + $0x19c] sm:$0xf]  ;;  %v8145_v6 = vor.u32 %v11256_v59, %v8142_v61  ;;  %v8526_v5 = vld [vmem:[%s17055_s1 + $0x3e4] sm:$0xf0] }
  0xfd   : > { %2645 = vmatpush.bf16.msra.mxu1 %v8193_v2  ;;  %v8049_v2 = vor.u32 %v11232_v57, %v8046_v58  ;;  %v8241_v7 = vor.u32 %v11280_v62, %v8238_v63  ;;  %v8589_v57 = vor.u32 %v11367_v44, %v8586_v48  ;;  %v11340_v59 = vld [vmem:[%s17055_s1 + $0x37c] sm:$0xf]  ;;  %v8478_v60 = vld [vmem:[%s17055_s1 + $0x384] sm:$0xf0]  ;;  %v11331_v48 = vld [vmem:[%s17055_s1 + $0x334] sm:$0xf] }
  0xfe   : > { %2658 = vmatpush.bf16.msra.mxu2 %v8289_v3  ;;  %v8334_v3 = vld [vmem:[%s17055_s1 + $0x264] sm:$0xf0]  ;;  %v11364_v61 = vld [vmem:[%s17055_s1 + $0x43c] sm:$0xf] }
  0xff   : > { %2671 = vmatpush.bf16.msra.mxu3 %v8385_v10  ;;  %v11277_v10 = vld [vmem:[%s17055_s1 + $0x184] sm:$0xf]  ;;  %v8574_v63 = vld [vmem:[%s17055_s1 + $0x444] sm:$0xf0] }
 0x100   : > { %2633 = vmatpush.bf16.msra.mxu0 %v8085_v11  ;;  %v1637_v11 = vpop.f32.mrf.mxu2 }
 0x101   : > { %2646 = vmatpush.bf16.msra.mxu1 %v8181_v15  ;;  %v8337_v15 = vor.u32 %v11304_v1, %v8334_v3  ;;  %v13651_v26 = vadd.f32 %v1650_v19, %v1637_v11  ;;  %v1652_v62 = vpop.f32.mrf.mxu3  ;;  %v11246_v1 = vld [vmem:[%s17055_s1 + $0x88] sm:$0xf0]  ;;  %v8481_v3 = vor.u32 %v11340_v59, %v8478_v60  ;;  %v8562_v11 = vld [vmem:[%s17055_s1 + $0x42c] sm:$0xf0]  ;;  %v11261_v59 = vld [vmem:[%s17055_s1 + $0x100] sm:$0xf0] }
 0x102   : > { %2659 = vmatpush.bf16.msra.mxu2 %v8277_v16  ;;  %v11370_v16 = vld [vmem:[%s17055_s1 + $0x46c] sm:$0xf] }
 0x103   : > { %2672 = vmatpush.bf16.msra.mxu3 %v8373_v27  ;;  %v8133_v27 = vor.u32 %v11253_v8, %v8130_v9  ;;  %v8601_v31 = vor.u32 %v11370_v16, %v8598_v17  ;;  %v11337_v8 = vld [vmem:[%s17055_s1 + $0x364] sm:$0xf]  ;;  %v8466_v9 = vld [vmem:[%s17055_s1 + $0x36c] sm:$0xf0]  ;;  %v8184_v16 = vld [vmem:[%s17055_s1 + $0x128] sm:$0xf] }
 0x104   : > { %2634 = vmatpush.bf16.msra.mxu0 %v8073_v29  ;;  %v8229_v29 = vor.u32 %v11277_v10, %v8226_v12  ;;  %v11361_v10 = vld [vmem:[%s17055_s1 + $0x424] sm:$0xf]  ;;  %v8088_v12 = vld [vmem:[%s17055_s1 + $0x68] sm:$0xf]  ;;  %v11267_v17 = vld [vmem:[%s17055_s1 + $0x130] sm:$0xf0] }
 0x105   : > { %2647 = vmatpush.bf16.msra.mxu1 %v8169_v32  ;;  %v8220_v32 = vld [vmem:[%s17055_s1 + $0x170] sm:$0xf]  ;;  %v8565_v19 = vor.u32 %v11361_v10, %v8562_v11  ;;  %v8148_v10 = vld [vmem:[%s17055_s1 + $0xe0] sm:$0xf] }
 0x106   : > { %2660 = vmatpush.bf16.msra.mxu2 %v8265_v33  ;;  %v11276_v33 = vld [vmem:[%s17055_s1 + $0x178] sm:$0xf0] }
 0x107   : > { %2673 = vmatpush.bf16.msra.mxu3 %v8361_v50  ;;  %v8112_v50 = vld [vmem:[%s17055_s1 + $0x98] sm:$0xf]  ;;  %v8221_v52 = vor.u32 %v11276_v33, %v8220_v32  ;;  %v11240_v32 = vld [vmem:[%s17055_s1 + $0x58] sm:$0xf0]  ;;  %v8185_v33 = vor.u32 %v11267_v17, %v8184_v16  ;;  %v11349_v17 = vld [vmem:[%s17055_s1 + $0x3c4] sm:$0xf] }
 0x108   : > { %2635 = vmatpush.bf16.msra.mxu0 %v8061_v51  ;;  %v11249_v51 = vld [vmem:[%s17055_s1 + $0xa0] sm:$0xf0]  ;;  %v1639_v53 = vpop.f32.mrf.mxu2 }
 0x109   : > { %2648 = vmatpush.bf16.msra.mxu1 %v8157_v55  ;;  %v8208_v55 = vld [vmem:[%s17055_s1 + $0x158] sm:$0xf]  ;;  %v8113_v58 = vor.u32 %v11249_v51, %v8112_v50  ;;  %v8442_v50 = vld [vmem:[%s17055_s1 + $0x33c] sm:$0xf0]  ;;  %v11355_v51 = vld [vmem:[%s17055_s1 + $0x3f4] sm:$0xf] }
 0x10a   : > { %2661 = vmatpush.bf16.msra.mxu2 %v8253_v56  ;;  %v11273_v56 = vld [vmem:[%s17055_s1 + $0x160] sm:$0xf0]  ;;  %v8064_v53 = vld [vmem:[%s17055_s1 + $0x38] sm:$0xf] }
 0x10b   : > { %2674 = vmatpush.bf16.msra.mxu3 %v8349_v0  ;;  %v8100_v0 = vld [vmem:[%s17055_s1 + $0x80] sm:$0xf] }
 0x10c   : > { %2636 = vmatpush.bf16.msra.mxu0 %v8049_v2  ;;  %v8209_v2 = vor.u32 %v11273_v56, %v8208_v55 }
 0x10d   : > { %2649 = vmatpush.bf16.msra.mxu1 %v8145_v6  ;;  %v8577_v6 = vor.u32 %v11364_v61, %v8574_v63 }
 0x10e   : > { %2662 = vmatpush.bf16.msra.mxu2 %v8241_v7  ;;  %v8101_v7 = vor.u32 %v11246_v1, %v8100_v0  ;;  %v11328_v0 = vld [vmem:[%s17055_s1 + $0x31c] sm:$0xf]  ;;  %v8430_v1 = vld [vmem:[%s17055_s1 + $0x324] sm:$0xf0] }
 0x10f   : > { %2675 = vmatpush.bf16.msra.mxu3 %v8337_v15  ;;  %v8469_v15 = vor.u32 %v11337_v8, %v8466_v9  ;;  %v8433_v11 = vor.u32 %v11328_v0, %v8430_v1 }
 0x110   : > { %2637 = vmatpush.bf16.msra.mxu0 %v8037_v20  ;;  %v1663_v18 = vpop.f32.mrf.mxu0  ;;  %v8089_v20 = vor.u32 %v11243_v13, %v8088_v12  ;;  %v11258_v12 = vld [vmem:[%s17055_s1 + $0xe8] sm:$0xf0]  ;;  %v11325_v13 = vld [vmem:[%s17055_s1 + $0x304] sm:$0xf] }
 0x111   : > { %2650 = vmatpush.bf16.msra.mxu1 %v8133_v27  ;;  %v1664_v27 = vadd.f32 %v1663_v18, %v13651_v26  ;;  %v8172_v26 = vld [vmem:[%s17055_s1 + $0x110] sm:$0xf] }
 0x112   : > { %2663 = vmatpush.bf16.msra.mxu2 %v8229_v29  ;;  %v1676_v29 = vpop.f32.mrf.mxu1  ;;  %v8173_v55 = vor.u32 %v11264_v40, %v8172_v26  ;;  %v8514_v18 = vld [vmem:[%s17055_s1 + $0x3cc] sm:$0xf0] }
 0x113   : > { %2676 = vmatpush.bf16.msra.mxu3 %v8325_v38  ;;  %2638 = vmatmul.bf16.vlgmr.msra.gmra.mxu0 %v13256_v39  ;;  %v8457_v38 = vor.u32 %v11334_v21, %v8454_v22  ;;  %v8316_v21 = vld [vmem:[%s17055_s1 + $0x230] sm:$0xf]  ;;  %v11300_v22 = vld [vmem:[%s17055_s1 + $0x238] sm:$0xf0]  ;;  %v8517_v26 = vor.u32 %v11349_v17, %v8514_v18  ;;  %v8376_v17 = vld [vmem:[%s17055_s1 + $0x2a8] sm:$0xf] }
 0x114   : > { %2682 = vmatpush.bf16.msrb.mxu0 %v8505_v30  ;;  %2651 = vmatmul.bf16.vlgmr.msra.gmra.mxu1 %v13273_v49  ;;  %v8550_v30 = vld [vmem:[%s17055_s1 + $0x414] sm:$0xf0]  ;;  %v11315_v18 = vld [vmem:[%s17055_s1 + $0x2b0] sm:$0xf0] }
 0x115   : > { %2695 = vmatpush.bf16.msrb.mxu1 %v8601_v31  ;;  %2664 = vmatmul.bf16.vlgmr.msra.gmra.mxu2 %v13460_v35  ;;  %v8076_v31 = vld [vmem:[%s17055_s1 + $0x50] sm:$0xf]  ;;  %v8553_v42 = vor.u32 %v11358_v23, %v8550_v30  ;;  %v8149_v23 = vor.u32 %v11258_v12, %v8148_v10  ;;  %v11366_v12 = vld [vmem:[%s17055_s1 + $0x448] sm:$0xf0] }
 0x116   : > { %2708 = vmatpush.bf16.msrb.mxu2 %v8125_v34  ;;  %2677 = vmatmul.bf16.vlgmr.msra.gmra.mxu3 %v13473_v46  ;;  %v1677_v34 = vadd.f32 %v1676_v29, %v1664_v27  ;;  %v8077_v44 = vor.u32 %v11240_v32, %v8076_v31  ;;  %v8412_v27 = vld [vmem:[%s17055_s1 + $0x2f0] sm:$0xf]  ;;  %v11324_v29 = vld [vmem:[%s17055_s1 + $0x2f8] sm:$0xf0] }
 0x117   : > { %2721 = vmatpush.bf16.msrb.mxu3 %v8221_v52  ;;  %v8538_v52 = vld [vmem:[%s17055_s1 + $0x3fc] sm:$0xf0]  ;;  %v8508_v30 = vld [vmem:[%s17055_s1 + $0x3b0] sm:$0xf] }
 0x118   : > { %2683 = vmatpush.bf16.msrb.mxu0 %v8493_v54  ;;  %v11237_v54 = vld [vmem:[%s17055_s1 + $0x40] sm:$0xf0]  ;;  %v1689_v56 = vpop.f32.mrf.mxu2  ;;  %v1665_v60 = vpop.f32.mrf.mxu0  ;;  %v8541_v62 = vor.u32 %v11355_v51, %v8538_v52  ;;  %v11372_v51 = vld [vmem:[%s17055_s1 + $0x478] sm:$0xf0] }
 0x119   : > { %2696 = vmatpush.bf16.msrb.mxu1 %v8589_v57  ;;  %v8445_v57 = vor.u32 %v11331_v48, %v8442_v50  ;;  %v1690_v61 = vadd.f32 %v1689_v56, %v1677_v34  ;;  %v8065_v63 = vor.u32 %v11237_v54, %v8064_v53  ;;  %v1702_v4 = vpop.f32.mrf.mxu3  ;;  %v8136_v34 = vld [vmem:[%s17055_s1 + $0xc8] sm:$0xf]  ;;  %v8413_v48 = vor.u32 %v11324_v29, %v8412_v27  ;;  %v8604_v50 = vld [vmem:[%s17055_s1 + $0x470] sm:$0xf]  ;;  %v8304_v54 = vld [vmem:[%s17055_s1 + $0x218] sm:$0xf] }
 0x11a   : > { %2709 = vmatpush.bf16.msrb.mxu2 %v8113_v58  ;;  %v8160_v58 = vld [vmem:[%s17055_s1 + $0xf8] sm:$0xf]  ;;  %v8605_v60 = vor.u32 %v11372_v51, %v8604_v50  ;;  %v8568_v27 = vld [vmem:[%s17055_s1 + $0x428] sm:$0xf]  ;;  %v11363_v29 = vld [vmem:[%s17055_s1 + $0x430] sm:$0xf0] }
 0x11b   : > { %2722 = vmatpush.bf16.msrb.mxu3 %v8209_v2  ;;  %v11352_v2 = vld [vmem:[%s17055_s1 + $0x3dc] sm:$0xf]  ;;  %v13802_v8 = vadd.f32 %v1702_v4, %v1690_v61  ;;  %v8161_v9 = vor.u32 %v11261_v59, %v8160_v58  ;;  %v8400_v56 = vld [vmem:[%s17055_s1 + $0x2d8] sm:$0xf]  ;;  %v11345_v59 = vld [vmem:[%s17055_s1 + $0x3a0] sm:$0xf0] }
 0x11c   : > { %2684 = vmatpush.bf16.msrb.mxu0 %v8481_v3  ;;  %v1678_v3 = vpop.f32.mrf.mxu1  ;;  %v8496_v58 = vld [vmem:[%s17055_s1 + $0x398] sm:$0xf]  ;;  %v8388_v4 = vld [vmem:[%s17055_s1 + $0x2c0] sm:$0xf]  ;;  %v8556_v51 = vld [vmem:[%s17055_s1 + $0x410] sm:$0xf] }
 0x11d   : > { %2697 = vmatpush.bf16.msrb.mxu1 %v8577_v6  ;;  %v8052_v6 = vld [vmem:[%s17055_s1 + $0x20] sm:$0xf]  ;;  %v8497_v1 = vor.u32 %v11345_v59, %v8496_v58  ;;  %v11294_v3 = vld [vmem:[%s17055_s1 + $0x208] sm:$0xf0]  ;;  %v11309_v58 = vld [vmem:[%s17055_s1 + $0x280] sm:$0xf0] }
 0x11e   : > { %2710 = vmatpush.bf16.msrb.mxu2 %v8101_v7  ;;  %v11234_v7 = vld [vmem:[%s17055_s1 + $0x28] sm:$0xf0]  ;;  %v8448_v59 = vld [vmem:[%s17055_s1 + $0x338] sm:$0xf] }
 0x11f   : > { %2723 = vmatpush.bf16.msrb.mxu3 %v8197_v14  ;;  %v8418_v14 = vld [vmem:[%s17055_s1 + $0x30c] sm:$0xf0]  ;;  %v8053_v16 = vor.u32 %v11234_v7, %v8052_v6  ;;  %v8484_v6 = vld [vmem:[%s17055_s1 + $0x380] sm:$0xf]  ;;  %v11342_v7 = vld [vmem:[%s17055_s1 + $0x388] sm:$0xf0] }
 0x120   : > { %2685 = vmatpush.bf16.msrb.mxu0 %v8469_v15  ;;  %v8529_v15 = vor.u32 %v11352_v2, %v8526_v5  ;;  %v1691_v31 = vpop.f32.mrf.mxu2  ;;  %v8421_v32 = vor.u32 %v11325_v13, %v8418_v14  ;;  %v8292_v2 = vld [vmem:[%s17055_s1 + $0x200] sm:$0xf]  ;;  %v11318_v5 = vld [vmem:[%s17055_s1 + $0x2c8] sm:$0xf0]  ;;  %v8485_v14 = vor.u32 %v11342_v7, %v8484_v6 }
 0x121   : > { %2698 = vmatpush.bf16.msrb.mxu1 %v8565_v19  ;;  %v8040_v19 = vld [vmem:[%s17055_s1 + $0x8] sm:$0xf]  ;;  %v8293_v10 = vor.u32 %v11294_v3, %v8292_v2  ;;  %v8389_v13 = vor.u32 %v11318_v5, %v8388_v4  ;;  %v8544_v2 = vld [vmem:[%s17055_s1 + $0x3f8] sm:$0xf]  ;;  %v11357_v3 = vld [vmem:[%s17055_s1 + $0x400] sm:$0xf0] }
 0x122   : > { %2711 = vmatpush.bf16.msrb.mxu2 %v8089_v20  ;;  %v11231_v20 = vld [vmem:[%s17055_s1 + $0x10] sm:$0xf0]  ;;  %v8244_v6 = vld [vmem:[%s17055_s1 + $0x1a0] sm:$0xf]  ;;  %v11282_v7 = vld [vmem:[%s17055_s1 + $0x1a8] sm:$0xf0] }
 0x123   : > { %2724 = vmatpush.bf16.msrb.mxu3 %v8185_v33  ;;  %v11348_v33 = vld [vmem:[%s17055_s1 + $0x3b8] sm:$0xf0]  ;;  %v8041_v40 = vor.u32 %v11231_v20, %v8040_v19  ;;  %v8472_v19 = vld [vmem:[%s17055_s1 + $0x368] sm:$0xf]  ;;  %v11339_v20 = vld [vmem:[%s17055_s1 + $0x370] sm:$0xf0] }
 0x124   : > { %2686 = vmatpush.bf16.msrb.mxu0 %v8457_v38  ;;  %v11255_v38 = vld [vmem:[%s17055_s1 + $0xd0] sm:$0xf0]  ;;  %v8509_v52 = vor.u32 %v11348_v33, %v8508_v30  ;;  %v8377_v30 = vor.u32 %v11315_v18, %v8376_v17  ;;  %v8473_v31 = vor.u32 %v11339_v20, %v8472_v19  ;;  %v11288_v33 = vld [vmem:[%s17055_s1 + $0x1d8] sm:$0xf0]  ;;  %v8532_v17 = vld [vmem:[%s17055_s1 + $0x3e0] sm:$0xf]  ;;  %v8245_v18 = vor.u32 %v11282_v7, %v8244_v6 }
 0x125   : > { %2699 = vmatpush.bf16.msrb.mxu1 %v8553_v42  ;;  %v1704_v42 = vpop.f32.mrf.mxu3  ;;  %v8137_v53 = vor.u32 %v11255_v38, %v8136_v34  ;;  %v8364_v34 = vld [vmem:[%s17055_s1 + $0x290] sm:$0xf]  ;;  %v11354_v19 = vld [vmem:[%s17055_s1 + $0x3e8] sm:$0xf0]  ;;  %v8232_v20 = vld [vmem:[%s17055_s1 + $0x188] sm:$0xf] }
 0x126   : > { %2712 = vmatpush.bf16.msrb.mxu2 %v8077_v44  ;;  %v8317_v44 = vor.u32 %v11300_v22, %v8316_v21  ;;  %v11336_v42 = vld [vmem:[%s17055_s1 + $0x358] sm:$0xf0] }
 0x127   : > { %2725 = vmatpush.bf16.msrb.mxu3 %v8173_v55  ;;  %v11297_v55 = vld [vmem:[%s17055_s1 + $0x220] sm:$0xf0]  ;;  %v11608_v6 = vld [vmem:[%s17055_s1 + $0xbd8] sm:$0xf0] }
 0x128   : > { %2687 = vmatpush.bf16.msrb.mxu0 %v8445_v57  ;;  %v11321_v57 = vld [vmem:[%s17055_s1 + $0x2e0] sm:$0xf0]  ;;  %v8305_v61 = vor.u32 %v11297_v55, %v8304_v54  ;;  %v8256_v55 = vld [vmem:[%s17055_s1 + $0x1b8] sm:$0xf] }
 0x129   : > { %2700 = vmatpush.bf16.msrb.mxu1 %v8541_v62  ;;  %v8592_v62 = vld [vmem:[%s17055_s1 + $0x458] sm:$0xf]  ;;  %v8401_v0 = vor.u32 %v11321_v57, %v8400_v56  ;;  %v11285_v56 = vld [vmem:[%s17055_s1 + $0x1c0] sm:$0xf0] }
 0x12a   : > { %2713 = vmatpush.bf16.msrb.mxu2 %v8065_v63  ;;  %v11369_v63 = vld [vmem:[%s17055_s1 + $0x460] sm:$0xf0]  ;;  %v8352_v57 = vld [vmem:[%s17055_s1 + $0x278] sm:$0xf] }
 0x12b   : > { %2726 = vmatpush.bf16.msrb.mxu3 %v8161_v9  ;;  %v8593_v9 = vor.u32 %v11369_v63, %v8592_v62  ;;  %v8353_v4 = vor.u32 %v11309_v58, %v8352_v57  ;;  %v9172_v57 = vld [vmem:[%s17055_s1 + $0xbe8] sm:$0xf]  ;;  %v11611_v58 = vld [vmem:[%s17055_s1 + $0xbf0] sm:$0xf0] }
 0x12c   : > { %2688 = vmatpush.bf16.msrb.mxu0 %v8433_v11  ;;  %v8580_v11 = vld [vmem:[%s17055_s1 + $0x440] sm:$0xf] }
 0x12d   : > { %2701 = vmatpush.bf16.msrb.mxu1 %v8529_v15  ;;  %v8280_v15 = vld [vmem:[%s17055_s1 + $0x1e8] sm:$0xf]  ;;  %v8581_v21 = vor.u32 %v11366_v12, %v8580_v11  ;;  %v11306_v12 = vld [vmem:[%s17055_s1 + $0x268] sm:$0xf0] }
 0x12e   : > { %2714 = vmatpush.bf16.msrb.mxu2 %v8053_v16  ;;  %v11291_v16 = vld [vmem:[%s17055_s1 + $0x1f0] sm:$0xf0] }
 0x12f   : > { %2727 = vmatpush.bf16.msrb.mxu3 %v8149_v23  ;;  %v8281_v23 = vor.u32 %v11291_v16, %v8280_v15  ;;  %v8545_v16 = vor.u32 %v11357_v3, %v8544_v2  ;;  %v11584_v2 = vld [vmem:[%s17055_s1 + $0xb18] sm:$0xf0]  ;;  %v9173_v3 = vor.u32 %v11611_v58, %v9172_v57 }
 0x130   : > { %2689 = vmatpush.bf16.msrb.mxu0 %v8421_v32  ;;  %v1715_v22 = vpop.f32.mrf.mxu0  ;;  %v8268_v32 = vld [vmem:[%s17055_s1 + $0x1d0] sm:$0xf] }
 0x131   : > { %2702 = vmatpush.bf16.msrb.mxu1 %v8517_v26  ;;  %v1728_v38 = vpop.f32.mrf.mxu1  ;;  %v11312_v26 = vld [vmem:[%s17055_s1 + $0x298] sm:$0xf0]  ;;  %v8269_v50 = vor.u32 %v11288_v33, %v8268_v32  ;;  %v8884_v32 = vld [vmem:[%s17055_s1 + $0x9a8] sm:$0xf]  ;;  %v11539_v33 = vld [vmem:[%s17055_s1 + $0x9b0] sm:$0xf0] }
 0x132   : > { %2715 = vmatpush.bf16.msrb.mxu2 %v8041_v40  ;;  %v8460_v40 = vld [vmem:[%s17055_s1 + $0x350] sm:$0xf] }
 0x133   : > { %2728 = vmatpush.bf16.msrb.mxu3 %v8137_v53  ;;  %2690 = vmatmul.bf16.vlgmr.msrb.gmra.mxu0 %v13462_v37  ;;  %v8365_v53 = vor.u32 %v11312_v26, %v8364_v34  ;;  %v8461_v54 = vor.u32 %v11336_v42, %v8460_v40  ;;  %v8980_v26 = vld [vmem:[%s17055_s1 + $0xa68] sm:$0xf]  ;;  %v11563_v40 = vld [vmem:[%s17055_s1 + $0xa70] sm:$0xf0] }
 0x134   : > { %2734 = vmatpush.bf16.msra.mxu0 %v8317_v44  ;;  %2703 = vmatmul.bf16.vlgmr.msrb.gmra.mxu1 %v13475_v47  ;;  %v1729_v44 = vadd.f32 %v1728_v38, %v1715_v22  ;;  %v8533_v38 = vor.u32 %v11354_v19, %v8532_v17  ;;  %v9076_v42 = vld [vmem:[%s17055_s1 + $0xb28] sm:$0xf]  ;;  %v9148_v19 = vld [vmem:[%s17055_s1 + $0xbb8] sm:$0xf] }
 0x135   : > { %2747 = vmatpush.bf16.msra.mxu1 %v8413_v48  ;;  %2716 = vmatmul.bf16.vlgmr.msrb.gmra.mxu2 %v13256_v39  ;;  %v8569_v48 = vor.u32 %v11363_v29, %v8568_v27  ;;  %v8328_v27 = vld [vmem:[%s17055_s1 + $0x248] sm:$0xf]  ;;  %v11303_v29 = vld [vmem:[%s17055_s1 + $0x250] sm:$0xf0] }
 0x136   : > { %2760 = vmatpush.bf16.msra.mxu2 %v8509_v52  ;;  %2729 = vmatmul.bf16.vlgmr.msrb.gmra.mxu3 %v13273_v49  ;;  %v11360_v52 = vld [vmem:[%s17055_s1 + $0x418] sm:$0xf0] }
 0x137   : > { %2773 = vmatpush.bf16.msra.mxu3 %v8605_v60  ;;  %v11333_v60 = vld [vmem:[%s17055_s1 + $0x340] sm:$0xf0]  ;;  %v8557_v62 = vor.u32 %v11360_v52, %v8556_v51  ;;  %v11351_v51 = vld [vmem:[%s17055_s1 + $0x3d0] sm:$0xf0]  ;;  %v8329_v52 = vor.u32 %v11303_v29, %v8328_v27  ;;  %v11530_v27 = vld [vmem:[%s17055_s1 + $0x968] sm:$0xf0] }
 0x138   : > { %2735 = vmatpush.bf16.msra.mxu0 %v8305_v61  ;;  %v1741_v61 = vpop.f32.mrf.mxu2  ;;  %v8449_v5 = vor.u32 %v11333_v60, %v8448_v59  ;;  %v8944_v29 = vld [vmem:[%s17055_s1 + $0xa20] sm:$0xf] }
 0x139   : > { %2748 = vmatpush.bf16.msra.mxu1 %v8401_v0  ;;  %v1742_v63 = vadd.f32 %v1741_v61, %v1729_v44  ;;  %v1717_v0 = vpop.f32.mrf.mxu0  ;;  %v1730_v11 = vpop.f32.mrf.mxu1  ;;  %v8872_v61 = vld [vmem:[%s17055_s1 + $0x990] sm:$0xf] }
 0x13a   : > { %2761 = vmatpush.bf16.msra.mxu2 %v8497_v1  ;;  %v8257_v1 = vor.u32 %v11285_v56, %v8256_v55  ;;  %v8885_v55 = vor.u32 %v11539_v33, %v8884_v32  ;;  %v8981_v56 = vor.u32 %v11563_v40, %v8980_v26  ;;  %v11560_v0 = vld [vmem:[%s17055_s1 + $0xa58] sm:$0xf0]  ;;  %v11533_v11 = vld [vmem:[%s17055_s1 + $0x980] sm:$0xf0]  ;;  %v11578_v32 = vld [vmem:[%s17055_s1 + $0xae8] sm:$0xf0] }
 0x13b   : > { %2774 = vmatpush.bf16.msra.mxu3 %v8593_v9  ;;  %v8340_v9 = vld [vmem:[%s17055_s1 + $0x260] sm:$0xf]  ;;  %v11602_v26 = vld [vmem:[%s17055_s1 + $0xba8] sm:$0xf0] }
 0x13c   : > { %2736 = vmatpush.bf16.msra.mxu0 %v8293_v10  ;;  %v1754_v10 = vpop.f32.mrf.mxu3  ;;  %v8341_v22 = vor.u32 %v11306_v12, %v8340_v9  ;;  %v8956_v12 = vld [vmem:[%s17055_s1 + $0xa38] sm:$0xf] }
 0x13d   : > { %2749 = vmatpush.bf16.msra.mxu1 %v8389_v13  ;;  %v8436_v13 = vld [vmem:[%s17055_s1 + $0x320] sm:$0xf]  ;;  %v14000_v15 = vadd.f32 %v1754_v10, %v1742_v63  ;;  %v8968_v63 = vld [vmem:[%s17055_s1 + $0xa50] sm:$0xf]  ;;  %v8860_v10 = vld [vmem:[%s17055_s1 + $0x978] sm:$0xf] }
 0x13e   : > { %2762 = vmatpush.bf16.msra.mxu2 %v8485_v14  ;;  %v11330_v14 = vld [vmem:[%s17055_s1 + $0x328] sm:$0xf0]  ;;  %v8969_v7 = vor.u32 %v11560_v0, %v8968_v63  ;;  %v8824_v0 = vld [vmem:[%s17055_s1 + $0x930] sm:$0xf] }
 0x13f   : > { %2775 = vmatpush.bf16.msra.mxu3 %v8581_v21  ;;  %v11279_v21 = vld [vmem:[%s17055_s1 + $0x190] sm:$0xf0] }
 0x140   : > { %2737 = vmatpush.bf16.msra.mxu0 %v8281_v23  ;;  %v8437_v23 = vor.u32 %v11330_v14, %v8436_v13  ;;  %v1743_v34 = vpop.f32.mrf.mxu2  ;;  %v8233_v44 = vor.u32 %v11279_v21, %v8232_v20  ;;  %v11557_v13 = vld [vmem:[%s17055_s1 + $0xa40] sm:$0xf0]  ;;  %v9052_v14 = vld [vmem:[%s17055_s1 + $0xaf8] sm:$0xf] }
 0x141   : > { %2750 = vmatpush.bf16.msra.mxu1 %v8377_v30  ;;  %v8424_v30 = vld [vmem:[%s17055_s1 + $0x308] sm:$0xf]  ;;  %v11605_v20 = vld [vmem:[%s17055_s1 + $0xbc0] sm:$0xf0]  ;;  %v8957_v21 = vor.u32 %v11557_v13, %v8956_v12  ;;  %v8812_v13 = vld [vmem:[%s17055_s1 + $0x918] sm:$0xf] }
 0x142   : > { %2763 = vmatpush.bf16.msra.mxu2 %v8473_v31  ;;  %v11327_v31 = vld [vmem:[%s17055_s1 + $0x310] sm:$0xf0]  ;;  %v9149_v33 = vor.u32 %v11605_v20, %v9148_v19 }
 0x143   : > { %2776 = vmatpush.bf16.msra.mxu3 %v8569_v48  ;;  %v11587_v48 = vld [vmem:[%s17055_s1 + $0xb30] sm:$0xf0] }
 0x144   : > { %2738 = vmatpush.bf16.msra.mxu0 %v8269_v50  ;;  %v8520_v50 = vld [vmem:[%s17055_s1 + $0x3c8] sm:$0xf]  ;;  %v9077_v59 = vor.u32 %v11587_v48, %v9076_v42 }
 0x145   : > { %2751 = vmatpush.bf16.msra.mxu1 %v8365_v53  ;;  %v8425_v53 = vor.u32 %v11327_v31, %v8424_v30  ;;  %v8521_v60 = vor.u32 %v11351_v51, %v8520_v50  ;;  %v11554_v30 = vld [vmem:[%s17055_s1 + $0xa28] sm:$0xf0]  ;;  %v9040_v31 = vld [vmem:[%s17055_s1 + $0xae0] sm:$0xf]  ;;  %v8836_v51 = vld [vmem:[%s17055_s1 + $0x948] sm:$0xf] }
 0x146   : > { %2764 = vmatpush.bf16.msra.mxu2 %v8461_v54  ;;  %v1756_v54 = vpop.f32.mrf.mxu3  ;;  %v9041_v48 = vor.u32 %v11578_v32, %v9040_v31  ;;  %v11518_v32 = vld [vmem:[%s17055_s1 + $0x908] sm:$0xf0] }
 0x147   : > { %2777 = vmatpush.bf16.msra.mxu3 %v8557_v62  ;;  %v11536_v62 = vld [vmem:[%s17055_s1 + $0x998] sm:$0xf0]  ;;  %v11551_v54 = vld [vmem:[%s17055_s1 + $0xa10] sm:$0xf0] }
 0x148   : > { %2739 = vmatpush.bf16.msra.mxu0 %v8257_v1  ;;  %v9064_v1 = vld [vmem:[%s17055_s1 + $0xb10] sm:$0xf] }
 0x149   : > { %2752 = vmatpush.bf16.msra.mxu1 %v8353_v4  ;;  %v8873_v4 = vor.u32 %v11536_v62, %v8872_v61  ;;  %v9065_v9 = vor.u32 %v11584_v2, %v9064_v1  ;;  %v11524_v1 = vld [vmem:[%s17055_s1 + $0x938] sm:$0xf0]  ;;  %v8920_v2 = vld [vmem:[%s17055_s1 + $0x9f0] sm:$0xf] }
 0x14a   : > { %2765 = vmatpush.bf16.msra.mxu2 %v8449_v5  ;;  %v9160_v5 = vld [vmem:[%s17055_s1 + $0xbd0] sm:$0xf]  ;;  %v8825_v12 = vor.u32 %v11524_v1, %v8824_v0 }
 0x14b   : > { %2778 = vmatpush.bf16.msra.mxu3 %v8545_v16  ;;  %v11581_v16 = vld [vmem:[%s17055_s1 + $0xb00] sm:$0xf0]  ;;  %v9161_v17 = vor.u32 %v11608_v6, %v9160_v5  ;;  %v9016_v5 = vld [vmem:[%s17055_s1 + $0xab0] sm:$0xf]  ;;  %v11572_v6 = vld [vmem:[%s17055_s1 + $0xab8] sm:$0xf0] }
 0x14c   : > { %2740 = vmatpush.bf16.msra.mxu0 %v8245_v18  ;;  %v8861_v18 = vor.u32 %v11533_v11, %v8860_v10  ;;  %v9112_v10 = vld [vmem:[%s17055_s1 + $0xb70] sm:$0xf]  ;;  %v9017_v20 = vor.u32 %v11572_v6, %v9016_v5  ;;  %v8982_v6 = vld [vmem:[%s17055_s1 + $0xa74] sm:$0xf0] }
 0x14d   : > { %2753 = vmatpush.bf16.msra.mxu1 %v8341_v22  ;;  %v9053_v22 = vor.u32 %v11581_v16, %v9052_v14  ;;  %v11521_v14 = vld [vmem:[%s17055_s1 + $0x920] sm:$0xf0]  ;;  %v8908_v16 = vld [vmem:[%s17055_s1 + $0x9d8] sm:$0xf] }
 0x14e   : > { %2766 = vmatpush.bf16.msra.mxu2 %v8437_v23  ;;  %v8848_v23 = vld [vmem:[%s17055_s1 + $0x960] sm:$0xf] }
 0x14f   : > { %2779 = vmatpush.bf16.msra.mxu3 %v8533_v38  ;;  %v8849_v34 = vor.u32 %v11530_v27, %v8848_v23  ;;  %v9136_v38 = vld [vmem:[%s17055_s1 + $0xba0] sm:$0xf]  ;;  %v11569_v23 = vld [vmem:[%s17055_s1 + $0xaa0] sm:$0xf0]  ;;  %v9100_v27 = vld [vmem:[%s17055_s1 + $0xb58] sm:$0xf] }
 0x150   : > { %2741 = vmatpush.bf16.msra.mxu0 %v8233_v44  ;;  %v1767_v40 = vpop.f32.mrf.mxu0  ;;  %v8945_v44 = vor.u32 %v11554_v30, %v8944_v29  ;;  %v11593_v29 = vld [vmem:[%s17055_s1 + $0xb60] sm:$0xf0]  ;;  %v8800_v30 = vld [vmem:[%s17055_s1 + $0x900] sm:$0xf] }
 0x151   : > { %2754 = vmatpush.bf16.msra.mxu1 %v8329_v52  ;;  %v1780_v42 = vpop.f32.mrf.mxu1  ;;  %v1768_v50 = vadd.f32 %v1767_v40, %v14000_v15  ;;  %v11527_v52 = vld [vmem:[%s17055_s1 + $0x950] sm:$0xf0]  ;;  %v9028_v15 = vld [vmem:[%s17055_s1 + $0xac8] sm:$0xf]  ;;  %v11566_v40 = vld [vmem:[%s17055_s1 + $0xa88] sm:$0xf0] }
 0x152   : > { %2767 = vmatpush.bf16.msra.mxu2 %v8425_v53  ;;  %v8932_v53 = vld [vmem:[%s17055_s1 + $0xa08] sm:$0xf]  ;;  %v8837_v58 = vor.u32 %v11527_v52, %v8836_v51  ;;  %v11635_v51 = vld [vmem:[%s17055_s1 + $0xcb0] sm:$0xf0] }
 0x153   : > { %2780 = vmatpush.bf16.msra.mxu3 %v8521_v60  ;;  %2742 = vmatmul.bf16.vlgmr.msra.gmra.mxu0 %v13460_v35  ;;  %v14151_v57 = vadd.f32 %v1780_v42, %v1768_v50  ;;  %v11599_v60 = vld [vmem:[%s17055_s1 + $0xb90] sm:$0xf0]  ;;  %v8933_v61 = vor.u32 %v11551_v54, %v8932_v53  ;;  %v2982_v42 = vshll.u32 %v13256_v39, 16  ;;  %v9268_v50 = vld [vmem:[%s17055_s1 + $0xca8] sm:$0xf]  ;;  %v2989_v53 = vshll.u32 %v13273_v49, 16 }
 0x154   : > { %3795 = vmatpush.bf16.msrb.mxu0 %v8885_v55  ;;  %2755 = vmatmul.bf16.vlgmr.msra.gmra.mxu1 %v13473_v46  ;;  %v11575_v55 = vld [vmem:[%s17055_s1 + $0xad0] sm:$0xf0]  ;;  %v2996_v54 = vshll.u32 %v13460_v35, 16 }
 0x155   : > { %3808 = vmatpush.bf16.msrb.mxu1 %v8981_v56  ;;  %2768 = vmatmul.bf16.vlgmr.msra.gmra.mxu2 %v13462_v37  ;;  %v9137_v56 = vor.u32 %v11602_v26, %v9136_v38  ;;  %v9029_v62 = vor.u32 %v11575_v55, %v9028_v15  ;;  %v8813_v38 = vor.u32 %v11521_v14, %v8812_v13  ;;  %v8992_v26 = vld [vmem:[%s17055_s1 + $0xa80] sm:$0xf]  ;;  %v9364_v15 = vld [vmem:[%s17055_s1 + $0xd68] sm:$0xf]  ;;  %v11659_v55 = vld [vmem:[%s17055_s1 + $0xd70] sm:$0xf0] }
 0x156   : > { %3821 = vmatpush.bf16.msrb.mxu2 %v9077_v59  ;;  %2781 = vmatmul.bf16.vlgmr.msra.gmra.mxu3 %v13475_v47  ;;  %v9124_v59 = vld [vmem:[%s17055_s1 + $0xb88] sm:$0xf]  ;;  %v8993_v1 = vor.u32 %v11566_v40, %v8992_v26  ;;  %v2984_v5 = vrot.slane %v2982_v42, 1  ;;  %v9365_v13 = vor.u32 %v11659_v55, %v9364_v15  ;;  %v9256_v14 = vld [vmem:[%s17055_s1 + $0xc90] sm:$0xf] }
 0x157   : > { %3834 = vmatpush.bf16.msrb.mxu3 %v9173_v3  ;;  %v9244_v40 = vld [vmem:[%s17055_s1 + $0xc78] sm:$0xf]  ;;  %v11556_v15 = vld [vmem:[%s17055_s1 + $0xa3c] sm:$0xf]  ;;  %v8958_v55 = vld [vmem:[%s17055_s1 + $0xa44] sm:$0xf0] }
 0x158   : > { %3796 = vmatpush.bf16.msrb.mxu0 %v8873_v4  ;;  %v2561_v63 = vpop.f32.mrf.mxu2  ;;  %v11548_v4 = vld [vmem:[%s17055_s1 + $0x9f8] sm:$0xf0] }
 0x159   : > { %3809 = vmatpush.bf16.msrb.mxu1 %v8969_v7  ;;  %v2562_v3 = vadd.f32 %v2561_v63, %v13553_v28  ;;  %v9125_v7 = vor.u32 %v11599_v60, %v9124_v59  ;;  %v11596_v28 = vld [vmem:[%s17055_s1 + $0xb78] sm:$0xf0]  ;;  %v8921_v19 = vor.u32 %v11548_v4, %v8920_v2  ;;  %v8801_v59 = vor.u32 %v11518_v32, %v8800_v30  ;;  %v8886_v60 = vld [vmem:[%s17055_s1 + $0x9b4] sm:$0xf0]  ;;  %v11590_v2 = vld [vmem:[%s17055_s1 + $0xb48] sm:$0xf0] }
 0x15a   : > { %3822 = vmatpush.bf16.msrb.mxu2 %v9065_v9  ;;  %v2574_v9 = vpop.f32.mrf.mxu3  ;;  %v9113_v31 = vor.u32 %v11596_v28, %v9112_v10  ;;  %v3003_v63 = vshll.u32 %v13473_v46, 16  ;;  %v2980_v4 = vshrl.u32 %v13256_v39, 16  ;;  %v2994_v10 = vshrl.u32 %v13460_v35, 16  ;;  %v8970_v32 = vld [vmem:[%s17055_s1 + $0xa5c] sm:$0xf0] }
 0x15b   : > { %3835 = vmatpush.bf16.msrb.mxu3 %v9161_v17  ;;  %v14184_v11 = vadd.f32 %v2574_v9, %v2562_v3  ;;  %v1769_v17 = vpop.f32.mrf.mxu0  ;;  %v11562_v3 = vld [vmem:[%s17055_s1 + $0xa6c] sm:$0xf]  ;;  %v2991_v9 = vrot.slane %v2989_v53, 1  ;;  %v2998_v28 = vrot.slane %v2996_v54, 1  ;;  %v11532_v53 = vld [vmem:[%s17055_s1 + $0x97c] sm:$0xf] }
 0x15c   : > { %3797 = vmatpush.bf16.msrb.mxu0 %v8861_v18  ;;  %v1782_v18 = vpop.f32.mrf.mxu1  ;;  %v14284_v30 = vor.u32 %v2984_v5, %v2980_v4  ;;  %v8862_v54 = vld [vmem:[%s17055_s1 + $0x984] sm:$0xf0]  ;;  %v11553_v4 = vld [vmem:[%s17055_s1 + $0xa24] sm:$0xf]  ;;  %v8946_v5 = vld [vmem:[%s17055_s1 + $0xa2c] sm:$0xf0] }
 0x15d   : > { %3810 = vmatpush.bf16.msrb.mxu1 %v8957_v21  ;;  %v11545_v21 = vld [vmem:[%s17055_s1 + $0x9e0] sm:$0xf0] }
 0x15e   : > { %3823 = vmatpush.bf16.msrb.mxu2 %v9053_v22  ;;  %v9004_v22 = vld [vmem:[%s17055_s1 + $0xa98] sm:$0xf] }
 0x15f   : > { %3836 = vmatpush.bf16.msrb.mxu3 %v9149_v33  ;;  %v8896_v33 = vld [vmem:[%s17055_s1 + $0x9c0] sm:$0xf] }
 0x160   : > { %3798 = vmatpush.bf16.msrb.mxu0 %v8849_v34  ;;  %v11542_v34 = vld [vmem:[%s17055_s1 + $0x9c8] sm:$0xf0]  ;;  %v2563_v52 = vpop.f32.mrf.mxu2 }
 0x161   : > { %3811 = vmatpush.bf16.msrb.mxu1 %v8945_v44  ;;  %v8909_v44 = vor.u32 %v11545_v21, %v8908_v16  ;;  %v8897_v0 = vor.u32 %v11542_v34, %v8896_v33  ;;  %v11632_v16 = vld [vmem:[%s17055_s1 + $0xc98] sm:$0xf0]  ;;  %v3001_v21 = vshrl.u32 %v13473_v46, 16  ;;  %v14294_v34 = vor.u32 %v2998_v28, %v2994_v10  ;;  %v9220_v28 = vld [vmem:[%s17055_s1 + $0xc48] sm:$0xf] }
 0x162   : > { %3824 = vmatpush.bf16.msrb.mxu2 %v9041_v48  ;;  %v9005_v48 = vor.u32 %v11569_v23, %v9004_v22  ;;  %v3005_v22 = vrot.slane %v3003_v63, 1  ;;  %v8985_v23 = vor.u32 %v11562_v3, %v8982_v6  ;;  %v11650_v63 = vld [vmem:[%s17055_s1 + $0xd28] sm:$0xf0] }
 0x163   : > { %3837 = vmatpush.bf16.msrb.mxu3 %v9137_v56  ;;  %v11538_v56 = vld [vmem:[%s17055_s1 + $0x9ac] sm:$0xf] }
 0x164   : > { %3799 = vmatpush.bf16.msrb.mxu0 %v8837_v58  ;;  %v9101_v58 = vor.u32 %v11593_v29, %v9100_v27  ;;  %v8889_v17 = vor.u32 %v11538_v56, %v8886_v60  ;;  %v11535_v27 = vld [vmem:[%s17055_s1 + $0x994] sm:$0xf]  ;;  %v8874_v29 = vld [vmem:[%s17055_s1 + $0x99c] sm:$0xf0]  ;;  %v8865_v60 = vor.u32 %v11532_v53, %v8862_v54 }
 0x165   : > { %3812 = vmatpush.bf16.msrb.mxu1 %v8933_v61  ;;  %v9088_v61 = vld [vmem:[%s17055_s1 + $0xb40] sm:$0xf]  ;;  %v8877_v42 = vor.u32 %v11535_v27, %v8874_v29  ;;  %v9208_v27 = vld [vmem:[%s17055_s1 + $0xc30] sm:$0xf] }
 0x166   : > { %3825 = vmatpush.bf16.msrb.mxu2 %v9029_v62  ;;  %v2576_v62 = vpop.f32.mrf.mxu3  ;;  %v9089_v18 = vor.u32 %v11590_v2, %v9088_v61  ;;  %v11626_v61 = vld [vmem:[%s17055_s1 + $0xc68] sm:$0xf0]  ;;  %v8850_v2 = vld [vmem:[%s17055_s1 + $0x96c] sm:$0xf0]  ;;  %v8922_v53 = vld [vmem:[%s17055_s1 + $0x9fc] sm:$0xf0] }
 0x167   : > { %3838 = vmatpush.bf16.msrb.mxu3 %v9125_v7  ;;  %v2987_v7 = vshrl.u32 %v13273_v49, 16  ;;  %v9328_v62 = vld [vmem:[%s17055_s1 + $0xd20] sm:$0xf] }
 0x168   : > { %3800 = vmatpush.bf16.msrb.mxu0 %v8825_v12  ;;  %v9269_v12 = vor.u32 %v11635_v51, %v9268_v50  ;;  %v11653_v50 = vld [vmem:[%s17055_s1 + $0xd40] sm:$0xf0]  ;;  %v14308_v51 = vor.u32 %v3005_v22, %v3001_v21  ;;  %v8934_v21 = vld [vmem:[%s17055_s1 + $0xa14] sm:$0xf0] }
 0x169   : > { %3813 = vmatpush.bf16.msrb.mxu1 %v8921_v19  ;;  %v9352_v19 = vld [vmem:[%s17055_s1 + $0xd50] sm:$0xf]  ;;  %v14292_v33 = vor.u32 %v2991_v9, %v2987_v7  ;;  %v9329_v9 = vor.u32 %v11650_v63, %v9328_v62  ;;  %v9292_v62 = vld [vmem:[%s17055_s1 + $0xcd8] sm:$0xf]  ;;  %v11641_v63 = vld [vmem:[%s17055_s1 + $0xce0] sm:$0xf0] }
 0x16a   : > { %3826 = vmatpush.bf16.msrb.mxu2 %v9017_v20  ;;  %v11656_v20 = vld [vmem:[%s17055_s1 + $0xd58] sm:$0xf0] }
 0x16b   : > { %3839 = vmatpush.bf16.msrb.mxu3 %v9113_v31  ;;  %v11559_v31 = vld [vmem:[%s17055_s1 + $0xa54] sm:$0xf]  ;;  %v9353_v26 = vor.u32 %v11656_v20, %v9352_v19  ;;  %v8838_v19 = vld [vmem:[%s17055_s1 + $0x954] sm:$0xf0]  ;;  %v11550_v20 = vld [vmem:[%s17055_s1 + $0xa0c] sm:$0xf] }
 0x16c   : > { %3801 = vmatpush.bf16.msrb.mxu0 %v8813_v38  ;;  %v9257_v38 = vor.u32 %v11632_v16, %v9256_v14  ;;  %v8973_v52 = vor.u32 %v11559_v31, %v8970_v32  ;;  %v9316_v14 = vld [vmem:[%s17055_s1 + $0xd08] sm:$0xf]  ;;  %v11620_v32 = vld [vmem:[%s17055_s1 + $0xc38] sm:$0xf0] }
 0x16d   : > { %3814 = vmatpush.bf16.msrb.mxu1 %v8909_v44  ;;  %v11629_v44 = vld [vmem:[%s17055_s1 + $0xc80] sm:$0xf0] }
 0x16e   : > { %3827 = vmatpush.bf16.msrb.mxu2 %v9005_v48  ;;  %v9340_v48 = vld [vmem:[%s17055_s1 + $0xd38] sm:$0xf]  ;;  %v9245_v56 = vor.u32 %v11629_v44, %v9244_v40  ;;  %v11523_v44 = vld [vmem:[%s17055_s1 + $0x934] sm:$0xf] }
 0x16f   : > { %3840 = vmatpush.bf16.msrb.mxu3 %v9101_v58  ;;  %v9341_v58 = vor.u32 %v11653_v50, %v9340_v48  ;;  %v8826_v48 = vld [vmem:[%s17055_s1 + $0x93c] sm:$0xf0] }
 0x170   : > { %3802 = vmatpush.bf16.msrb.mxu0 %v8801_v59  ;;  %v9232_v59 = vld [vmem:[%s17055_s1 + $0xc60] sm:$0xf]  ;;  %v2587_v3 = vpop.f32.mrf.mxu0 }
 0x171   : > { %3815 = vmatpush.bf16.msrb.mxu1 %v8897_v0  ;;  %v8961_v0 = vor.u32 %v11556_v15, %v8958_v55  ;;  %v2588_v6 = vadd.f32 %v2587_v3, %v14184_v11  ;;  %v9233_v7 = vor.u32 %v11626_v61, %v9232_v59  ;;  %v2600_v10 = vpop.f32.mrf.mxu1  ;;  %v11647_v11 = vld [vmem:[%s17055_s1 + $0xd10] sm:$0xf0]  ;;  %v9209_v55 = vor.u32 %v11620_v32, %v9208_v27  ;;  %v11617_v59 = vld [vmem:[%s17055_s1 + $0xc20] sm:$0xf0]  ;;  %v11544_v3 = vld [vmem:[%s17055_s1 + $0x9dc] sm:$0xf] }
 0x172   : > { %3828 = vmatpush.bf16.msrb.mxu2 %v8993_v1  ;;  %v11529_v1 = vld [vmem:[%s17055_s1 + $0x964] sm:$0xf]  ;;  %v8829_v61 = vor.u32 %v11523_v44, %v8826_v48  ;;  %v9270_v27 = vld [vmem:[%s17055_s1 + $0xcb4] sm:$0xf0]  ;;  %v3015_v44 = vshrl.u32 %v13475_v47, 16 }
 0x173   : > { %3841 = vmatpush.bf16.msrb.mxu3 %v9089_v18  ;;  %3803 = vmatmul.bf16.vlgmr.msrb.gmra.mxu0 %v14284_v30  ;;  %v2601_v16 = vadd.f32 %v2600_v10, %v2588_v6  ;;  %v11526_v18 = vld [vmem:[%s17055_s1 + $0x94c] sm:$0xf]  ;;  %v9293_v10 = vor.u32 %v11641_v63, %v9292_v62  ;;  %v9162_v63 = vld [vmem:[%s17055_s1 + $0xbdc] sm:$0xf0] }
 0x174   : > { %3847 = vmatpush.bf16.msra.mxu0 %v9269_v12  ;;  %3816 = vmatmul.bf16.vlgmr.msrb.gmra.mxu1 %v14292_v33  ;;  %v8853_v12 = vor.u32 %v11529_v1, %v8850_v2  ;;  %v8841_v29 = vor.u32 %v11526_v18, %v8838_v19  ;;  %v8814_v2 = vld [vmem:[%s17055_s1 + $0x924] sm:$0xf0]  ;;  %v11614_v6 = vld [vmem:[%s17055_s1 + $0xc08] sm:$0xf0] }
 0x175   : > { %3860 = vmatpush.bf16.msra.mxu1 %v9365_v13  ;;  %3829 = vmatmul.bf16.vlgmr.msrb.gmra.mxu2 %v14294_v34  ;;  %v11623_v13 = vld [vmem:[%s17055_s1 + $0xc50] sm:$0xf0] }
 0x176   : > { %3873 = vmatpush.bf16.msra.mxu2 %v8889_v17  ;;  %3842 = vmatmul.bf16.vlgmr.msrb.gmra.mxu3 %v14308_v51  ;;  %v8949_v17 = vor.u32 %v11553_v4, %v8946_v5  ;;  %v9221_v22 = vor.u32 %v11623_v13, %v9220_v28  ;;  %v8910_v4 = vld [vmem:[%s17055_s1 + $0x9e4] sm:$0xf0]  ;;  %v9184_v5 = vld [vmem:[%s17055_s1 + $0xc00] sm:$0xf]  ;;  %v3017_v13 = vshll.u32 %v13475_v47, 16 }
 0x177   : > { %3886 = vmatpush.bf16.msra.mxu3 %v8985_v23  ;;  %v9317_v23 = vor.u32 %v11647_v11, %v9316_v14  ;;  %v9280_v28 = vld [vmem:[%s17055_s1 + $0xcc0] sm:$0xf]  ;;  %v11517_v11 = vld [vmem:[%s17055_s1 + $0x904] sm:$0xf]  ;;  %v8913_v19 = vor.u32 %v11544_v3, %v8910_v4 }
 0x178   : > { %3848 = vmatpush.bf16.msra.mxu0 %v9257_v38  ;;  %v2613_v31 = vpop.f32.mrf.mxu2  ;;  %v9304_v38 = vld [vmem:[%s17055_s1 + $0xcf0] sm:$0xf]  ;;  %v2589_v54 = vpop.f32.mrf.mxu0  ;;  %v3019_v48 = vrot.slane %v3017_v13, 1  ;;  %v9150_v13 = vld [vmem:[%s17055_s1 + $0xbc4] sm:$0xf0] }
 0x179   : > { %3861 = vmatpush.bf16.msra.mxu1 %v9353_v26  ;;  %v11644_v26 = vld [vmem:[%s17055_s1 + $0xcf8] sm:$0xf0]  ;;  %v2614_v40 = vadd.f32 %v2613_v31, %v2601_v16  ;;  %v2626_v50 = vpop.f32.mrf.mxu3  ;;  %v8802_v16 = vld [vmem:[%s17055_s1 + $0x90c] sm:$0xf0]  ;;  %v9366_v54 = vld [vmem:[%s17055_s1 + $0xd74] sm:$0xf0] }
 0x17a   : > { %3874 = vmatpush.bf16.msra.mxu2 %v8877_v42  ;;  %v8937_v42 = vor.u32 %v11550_v20, %v8934_v21  ;;  %v9078_v20 = vld [vmem:[%s17055_s1 + $0xb34] sm:$0xf0]  ;;  %v11610_v21 = vld [vmem:[%s17055_s1 + $0xbec] sm:$0xf]  ;;  %v14497_v3 = vor.u32 %v3019_v48, %v3015_v44  ;;  %v9330_v44 = vld [vmem:[%s17055_s1 + $0xd2c] sm:$0xf0] }
 0x17b   : > { %3887 = vmatpush.bf16.msra.mxu3 %v8973_v52  ;;  %v11547_v52 = vld [vmem:[%s17055_s1 + $0x9f4] sm:$0xf]  ;;  %v14399_v15 = vadd.f32 %v2626_v50, %v2614_v40  ;;  %v11541_v40 = vld [vmem:[%s17055_s1 + $0x9c4] sm:$0xf]  ;;  %v8805_v50 = vor.u32 %v11517_v11, %v8802_v16  ;;  %v9246_v11 = vld [vmem:[%s17055_s1 + $0xc84] sm:$0xf0] }
 0x17c   : > { %3849 = vmatpush.bf16.msra.mxu0 %v9245_v56  ;;  %v9305_v56 = vor.u32 %v11644_v26, %v9304_v38  ;;  %v8925_v1 = vor.u32 %v11547_v52, %v8922_v53  ;;  %v9185_v38 = vor.u32 %v11614_v6, %v9184_v5  ;;  %v11658_v53 = vld [vmem:[%s17055_s1 + $0xd6c] sm:$0xf]  ;;  %v11655_v5 = vld [vmem:[%s17055_s1 + $0xd54] sm:$0xf]  ;;  %v9354_v6 = vld [vmem:[%s17055_s1 + $0xd5c] sm:$0xf0] }
 0x17d   : > { %3862 = vmatpush.bf16.msra.mxu1 %v9341_v58  ;;  %v9196_v58 = vld [vmem:[%s17055_s1 + $0xc18] sm:$0xf]  ;;  %v9357_v16 = vor.u32 %v11655_v5, %v9354_v6  ;;  %v11571_v5 = vld [vmem:[%s17055_s1 + $0xab4] sm:$0xf]  ;;  %v9018_v6 = vld [vmem:[%s17055_s1 + $0xabc] sm:$0xf0] }
 0x17e   : > { %3875 = vmatpush.bf16.msra.mxu2 %v8865_v60  ;;  %v2602_v60 = vpop.f32.mrf.mxu1 }
 0x17f   : > { %3888 = vmatpush.bf16.msra.mxu3 %v8961_v0  ;;  %v11520_v0 = vld [vmem:[%s17055_s1 + $0x91c] sm:$0xf]  ;;  %v11607_v60 = vld [vmem:[%s17055_s1 + $0xbd4] sm:$0xf] }
 0x180   : > { %3850 = vmatpush.bf16.msra.mxu0 %v9233_v7  ;;  %v3010_v7 = vshll.u32 %v13462_v37, 16  ;;  %v8817_v14 = vor.u32 %v11520_v0, %v8814_v2  ;;  %v2615_v18 = vpop.f32.mrf.mxu2  ;;  %v11631_v0 = vld [vmem:[%s17055_s1 + $0xc94] sm:$0xf]  ;;  %v9369_v2 = vor.u32 %v11658_v53, %v9366_v54  ;;  %v11574_v54 = vld [vmem:[%s17055_s1 + $0xacc] sm:$0xf] }
 0x181   : > { %3863 = vmatpush.bf16.msra.mxu1 %v9329_v9  ;;  %v9197_v9 = vor.u32 %v11617_v59, %v9196_v58  ;;  %v2628_v32 = vpop.f32.mrf.mxu3  ;;  %v11583_v58 = vld [vmem:[%s17055_s1 + $0xb14] sm:$0xf]  ;;  %v9066_v59 = vld [vmem:[%s17055_s1 + $0xb1c] sm:$0xf0]  ;;  %v11652_v18 = vld [vmem:[%s17055_s1 + $0xd3c] sm:$0xf] }
 0x182   : > { %3876 = vmatpush.bf16.msra.mxu2 %v8853_v12  ;;  %v11638_v12 = vld [vmem:[%s17055_s1 + $0xcc8] sm:$0xf0]  ;;  %v3012_v31 = vrot.slane %v3010_v7, 1  ;;  %v9069_v4 = vor.u32 %v11583_v58, %v9066_v59  ;;  %v9165_v7 = vor.u32 %v11607_v60, %v9162_v63  ;;  %v9234_v32 = vld [vmem:[%s17055_s1 + $0xc6c] sm:$0xf0] }
 0x183   : > { %3889 = vmatpush.bf16.msra.mxu3 %v8949_v17  ;;  %v11586_v17 = vld [vmem:[%s17055_s1 + $0xb2c] sm:$0xf]  ;;  %v9281_v26 = vor.u32 %v11638_v12, %v9280_v28  ;;  %v9054_v28 = vld [vmem:[%s17055_s1 + $0xb04] sm:$0xf0]  ;;  %v11604_v12 = vld [vmem:[%s17055_s1 + $0xbbc] sm:$0xf] }
 0x184   : > { %3851 = vmatpush.bf16.msra.mxu0 %v9221_v22  ;;  %v9174_v22 = vld [vmem:[%s17055_s1 + $0xbf4] sm:$0xf0]  ;;  %v9081_v52 = vor.u32 %v11586_v17, %v9078_v20  ;;  %v9153_v20 = vor.u32 %v11604_v12, %v9150_v13  ;;  %v9210_v12 = vld [vmem:[%s17055_s1 + $0xc3c] sm:$0xf0] }
 0x185   : > { %3864 = vmatpush.bf16.msra.mxu1 %v9317_v23  ;;  %v11634_v23 = vld [vmem:[%s17055_s1 + $0xcac] sm:$0xf]  ;;  %v9126_v58 = vld [vmem:[%s17055_s1 + $0xb94] sm:$0xf0] }
 0x186   : > { %3877 = vmatpush.bf16.msra.mxu2 %v8841_v29  ;;  %v3008_v29 = vshrl.u32 %v13462_v37, 16  ;;  %v9222_v59 = vld [vmem:[%s17055_s1 + $0xc54] sm:$0xf0] }
 0x187   : > { %3890 = vmatpush.bf16.msra.mxu3 %v8937_v42  ;;  %v8898_v42 = vld [vmem:[%s17055_s1 + $0x9cc] sm:$0xf0] }
 0x188   : > { %3852 = vmatpush.bf16.msra.mxu0 %v9209_v55  ;;  %v9177_v55 = vor.u32 %v11610_v21, %v9174_v22  ;;  %v14486_v62 = vor.u32 %v3012_v31, %v3008_v29  ;;  %v11577_v22 = vld [vmem:[%s17055_s1 + $0xae4] sm:$0xf]  ;;  %v9138_v29 = vld [vmem:[%s17055_s1 + $0xbac] sm:$0xf0] }
 0x189   : > { %3865 = vmatpush.bf16.msra.mxu1 %v9305_v56  ;;  %v9273_v56 = vor.u32 %v11634_v23, %v9270_v27  ;;  %v9042_v23 = vld [vmem:[%s17055_s1 + $0xaec] sm:$0xf0]  ;;  %v11601_v27 = vld [vmem:[%s17055_s1 + $0xba4] sm:$0xf] }
 0x18a   : > { %3878 = vmatpush.bf16.msra.mxu2 %v8829_v61  ;;  %v8901_v61 = vor.u32 %v11541_v40, %v8898_v42  ;;  %v11625_v31 = vld [vmem:[%s17055_s1 + $0xc64] sm:$0xf]  ;;  %v9045_v40 = vor.u32 %v11577_v22, %v9042_v23  ;;  %v11568_v23 = vld [vmem:[%s17055_s1 + $0xa9c] sm:$0xf] }
 0x18b   : > { %3891 = vmatpush.bf16.msra.mxu3 %v8925_v1  ;;  %v9258_v1 = vld [vmem:[%s17055_s1 + $0xc9c] sm:$0xf0]  ;;  %v11649_v42 = vld [vmem:[%s17055_s1 + $0xd24] sm:$0xf] }
 0x18c   : > { %3853 = vmatpush.bf16.msra.mxu0 %v9197_v9  ;;  %v9261_v9 = vor.u32 %v11631_v0, %v9258_v1  ;;  %v11646_v0 = vld [vmem:[%s17055_s1 + $0xd0c] sm:$0xf]  ;;  %v9318_v1 = vld [vmem:[%s17055_s1 + $0xd14] sm:$0xf0] }
 0x18d   : > { %3866 = vmatpush.bf16.msra.mxu1 %v9293_v10  ;;  %v11580_v10 = vld [vmem:[%s17055_s1 + $0xafc] sm:$0xf] }
 0x18e   : > { %3879 = vmatpush.bf16.msra.mxu2 %v8817_v14  ;;  %v11628_v14 = vld [vmem:[%s17055_s1 + $0xc7c] sm:$0xf]  ;;  %v9057_v17 = vor.u32 %v11580_v10, %v9054_v28  ;;  %v9114_v10 = vld [vmem:[%s17055_s1 + $0xb7c] sm:$0xf0]  ;;  %v11619_v28 = vld [vmem:[%s17055_s1 + $0xc34] sm:$0xf] }
 0x18f   : > { %3892 = vmatpush.bf16.msra.mxu3 %v8913_v19  ;;  %v9342_v19 = vld [vmem:[%s17055_s1 + $0xd44] sm:$0xf0]  ;;  %v9249_v21 = vor.u32 %v11628_v14, %v9246_v11  ;;  %v9321_v14 = vor.u32 %v11646_v0, %v9318_v1  ;;  %v9213_v22 = vor.u32 %v11619_v28, %v9210_v12  ;;  %v8988_v0 = vld [vmem:[%s17055_s1 + $0xa70] sm:$0xf]  ;;  %v11564_v1 = vld [vmem:[%s17055_s1 + $0xa78] sm:$0xf0] }
 0x190   : > { %3854 = vmatpush.bf16.msra.mxu0 %v9185_v38  ;;  %v9345_v38 = vor.u32 %v11652_v18, %v9342_v19  ;;  %v9306_v18 = vld [vmem:[%s17055_s1 + $0xcfc] sm:$0xf0]  ;;  %v9180_v12 = vld [vmem:[%s17055_s1 + $0xbf0] sm:$0xf] }
 0x191   : > { %3867 = vmatpush.bf16.msra.mxu1 %v9281_v26  ;;  %v2639_v26 = vpop.f32.mrf.mxu0  ;;  %v2652_v53 = vpop.f32.mrf.mxu1 }
 0x192   : > { %3880 = vmatpush.bf16.msra.mxu2 %v8805_v50  ;;  %v2640_v48 = vadd.f32 %v2639_v26, %v13802_v8  ;;  %v9141_v50 = vor.u32 %v11601_v27, %v9138_v29  ;;  %v11622_v8 = vld [vmem:[%s17055_s1 + $0xc4c] sm:$0xf]  ;;  %v9006_v27 = vld [vmem:[%s17055_s1 + $0xaa4] sm:$0xf0]  ;;  %v11592_v29 = vld [vmem:[%s17055_s1 + $0xb5c] sm:$0xf] }
 0x193   : > { %3893 = vmatpush.bf16.msra.mxu3 %v8901_v61  ;;  %3855 = vmatmul.bf16.vlgmr.msra.gmra.mxu0 %v14486_v62  ;;  %v9333_v61 = vor.u32 %v11649_v42, %v9330_v44  ;;  %v9198_v26 = vld [vmem:[%s17055_s1 + $0xc24] sm:$0xf0]  ;;  %v11640_v42 = vld [vmem:[%s17055_s1 + $0xcdc] sm:$0xf]  ;;  %v9009_v44 = vor.u32 %v11568_v23, %v9006_v27  ;;  %v11561_v23 = vld [vmem:[%s17055_s1 + $0xa60] sm:$0xf0] }
 0x194   : > { %3899 = vmatpush.bf16.msrb.mxu0 %v9081_v52  ;;  %3868 = vmatmul.bf16.vlgmr.msra.gmra.mxu1 %v14497_v3  ;;  %v9237_v52 = vor.u32 %v11625_v31, %v9234_v32  ;;  %v2653_v60 = vadd.f32 %v2652_v53, %v2640_v48  ;;  %v9102_v32 = vld [vmem:[%s17055_s1 + $0xb64] sm:$0xf0]  ;;  %v9072_v27 = vld [vmem:[%s17055_s1 + $0xb18] sm:$0xf] }
 0x195   : > { %3912 = vmatpush.bf16.msrb.mxu1 %v9177_v55  ;;  %3881 = vmatmul.bf16.vlgmr.msra.gmra.mxu2 %v14284_v30  ;;  %v9030_v55 = vld [vmem:[%s17055_s1 + $0xad4] sm:$0xf0]  ;;  %v9294_v48 = vld [vmem:[%s17055_s1 + $0xce4] sm:$0xf0]  ;;  %v9105_v53 = vor.u32 %v11592_v29, %v9102_v32  ;;  %v11585_v29 = vld [vmem:[%s17055_s1 + $0xb20] sm:$0xf0] }
 0x196   : > { %3925 = vmatpush.bf16.msrb.mxu2 %v9273_v56  ;;  %3894 = vmatmul.bf16.vlgmr.msra.gmra.mxu3 %v14292_v33  ;;  %v11598_v56 = vld [vmem:[%s17055_s1 + $0xb8c] sm:$0xf]  ;;  %v9033_v63 = vor.u32 %v11574_v54, %v9030_v55  ;;  %v11589_v55 = vld [vmem:[%s17055_s1 + $0xb44] sm:$0xf] }
 0x197   : > { %3938 = vmatpush.bf16.msrb.mxu3 %v9369_v2  ;;  %v9129_v2 = vor.u32 %v11598_v56, %v9126_v58  ;;  %v9090_v56 = vld [vmem:[%s17055_s1 + $0xb4c] sm:$0xf0]  ;;  %v11613_v58 = vld [vmem:[%s17055_s1 + $0xc04] sm:$0xf] }
 0x198   : > { %3900 = vmatpush.bf16.msrb.mxu0 %v9069_v4  ;;  %v9225_v4 = vor.u32 %v11622_v8, %v9222_v59  ;;  %v9186_v8 = vld [vmem:[%s17055_s1 + $0xc0c] sm:$0xf0]  ;;  %v11609_v32 = vld [vmem:[%s17055_s1 + $0xbe0] sm:$0xf0] }
 0x199   : > { %3913 = vmatpush.bf16.msrb.mxu1 %v9165_v7  ;;  %v11595_v7 = vld [vmem:[%s17055_s1 + $0xb74] sm:$0xf]  ;;  %v2678_v11 = vpop.f32.mrf.mxu3  ;;  %v2641_v19 = vpop.f32.mrf.mxu0  ;;  %v8892_v59 = vld [vmem:[%s17055_s1 + $0x9b0] sm:$0xf]  ;;  %v9189_v28 = vor.u32 %v11613_v58, %v9186_v8 }
 0x19a   : > { %3926 = vmatpush.bf16.msrb.mxu2 %v9261_v9  ;;  %v2665_v9 = vpop.f32.mrf.mxu2  ;;  %v2654_v31 = vpop.f32.mrf.mxu1  ;;  %v11537_v19 = vld [vmem:[%s17055_s1 + $0x9a0] sm:$0xf0] }
 0x19b   : > { %3939 = vmatpush.bf16.msrb.mxu3 %v9357_v16  ;;  %v2666_v13 = vadd.f32 %v2665_v9, %v2653_v60  ;;  %v9021_v16 = vor.u32 %v11571_v5, %v9018_v6  ;;  %v11540_v60 = vld [vmem:[%s17055_s1 + $0x9b8] sm:$0xf0]  ;;  %v11637_v6 = vld [vmem:[%s17055_s1 + $0xcc4] sm:$0xf]  ;;  %v9168_v31 = vld [vmem:[%s17055_s1 + $0xbd8] sm:$0xf] }
 0x19c   : > { %3901 = vmatpush.bf16.msrb.mxu0 %v9057_v17  ;;  %v11643_v17 = vld [vmem:[%s17055_s1 + $0xcf4] sm:$0xf]  ;;  %v11588_v5 = vld [vmem:[%s17055_s1 + $0xb38] sm:$0xf0] }
 0x19d   : > { %3914 = vmatpush.bf16.msrb.mxu1 %v9153_v20  ;;  %v14606_v20 = vadd.f32 %v2678_v11, %v2666_v13  ;;  %v11612_v13 = vld [vmem:[%s17055_s1 + $0xbf8] sm:$0xf0]  ;;  %v8989_v11 = vor.u32 %v11564_v1, %v8988_v0  ;;  %v11555_v1 = vld [vmem:[%s17055_s1 + $0xa30] sm:$0xf0] }
 0x19e   : > { %3927 = vmatpush.bf16.msrb.mxu2 %v9249_v21  ;;  %v9117_v21 = vor.u32 %v11595_v7, %v9114_v10  ;;  %v9282_v7 = vld [vmem:[%s17055_s1 + $0xccc] sm:$0xf0]  ;;  %v9093_v10 = vor.u32 %v11589_v55, %v9090_v56  ;;  %v9156_v55 = vld [vmem:[%s17055_s1 + $0xbc0] sm:$0xf]  ;;  %v11606_v56 = vld [vmem:[%s17055_s1 + $0xbc8] sm:$0xf0] }
 0x19f   : > { %3940 = vmatpush.bf16.msrb.mxu3 %v9345_v38  ;;  %v11616_v38 = vld [vmem:[%s17055_s1 + $0xc1c] sm:$0xf]  ;;  %v9157_v0 = vor.u32 %v11606_v56, %v9156_v55 }
 0x1a0   : > { %3902 = vmatpush.bf16.msrb.mxu0 %v9045_v40  ;;  %v9309_v40 = vor.u32 %v11643_v17, %v9306_v18  ;;  %v9201_v54 = vor.u32 %v11616_v38, %v9198_v26  ;;  %v9285_v17 = vor.u32 %v11637_v6, %v9282_v7  ;;  %v8880_v18 = vld [vmem:[%s17055_s1 + $0x998] sm:$0xf]  ;;  %v11603_v6 = vld [vmem:[%s17055_s1 + $0xbb0] sm:$0xf0] }
 0x1a1   : > { %3915 = vmatpush.bf16.msrb.mxu1 %v9141_v50  ;;  %v11565_v50 = vld [vmem:[%s17055_s1 + $0xa84] sm:$0xf]  ;;  %v2680_v9 = vpop.f32.mrf.mxu3  ;;  %v8881_v38 = vor.u32 %v11537_v19, %v8880_v18  ;;  %v9036_v18 = vld [vmem:[%s17055_s1 + $0xad0] sm:$0xf]  ;;  %v11576_v19 = vld [vmem:[%s17055_s1 + $0xad8] sm:$0xf0] }
 0x1a2   : > { %3928 = vmatpush.bf16.msrb.mxu2 %v9237_v52  ;;  %v8994_v52 = vld [vmem:[%s17055_s1 + $0xa8c] sm:$0xf0] }
 0x1a3   : > { %3941 = vmatpush.bf16.msrb.mxu3 %v9333_v61  ;;  %v2667_v61 = vpop.f32.mrf.mxu2 }
 0x1a4   : > { %3903 = vmatpush.bf16.msrb.mxu0 %v9033_v63  ;;  %v9297_v63 = vor.u32 %v11640_v42, %v9294_v48  ;;  %v8868_v42 = vld [vmem:[%s17055_s1 + $0x980] sm:$0xf]  ;;  %v11531_v61 = vld [vmem:[%s17055_s1 + $0x970] sm:$0xf0] }
 0x1a5   : > { %3916 = vmatpush.bf16.msrb.mxu1 %v9129_v2  ;;  %v9084_v2 = vld [vmem:[%s17055_s1 + $0xb30] sm:$0xf]  ;;  %v8964_v48 = vld [vmem:[%s17055_s1 + $0xa40] sm:$0xf] }
 0x1a6   : > { %3929 = vmatpush.bf16.msrb.mxu2 %v9225_v4  ;;  %v8997_v4 = vor.u32 %v11565_v50, %v8994_v52  ;;  %v9169_v50 = vor.u32 %v11609_v32, %v9168_v31  ;;  %v11558_v52 = vld [vmem:[%s17055_s1 + $0xa48] sm:$0xf0]  ;;  %v9037_v31 = vor.u32 %v11576_v19, %v9036_v18  ;;  %v8832_v32 = vld [vmem:[%s17055_s1 + $0x938] sm:$0xf]  ;;  %v9276_v18 = vld [vmem:[%s17055_s1 + $0xcb0] sm:$0xf] }
 0x1a7   : > { %3942 = vmatpush.bf16.msrb.mxu3 %v9321_v14  ;;  %v8893_v14 = vor.u32 %v11540_v60, %v8892_v59  ;;  %v8965_v8 = vor.u32 %v11558_v52, %v8964_v48  ;;  %v8856_v60 = vld [vmem:[%s17055_s1 + $0x968] sm:$0xf]  ;;  %v9024_v48 = vld [vmem:[%s17055_s1 + $0xab8] sm:$0xf]  ;;  %v11636_v19 = vld [vmem:[%s17055_s1 + $0xcb8] sm:$0xf0] }
 0x1a8   : > { %3904 = vmatpush.bf16.msrb.mxu0 %v9021_v16  ;;  %v9085_v16 = vor.u32 %v11588_v5, %v9084_v2  ;;  %v9048_v2 = vld [vmem:[%s17055_s1 + $0xae8] sm:$0xf]  ;;  %v8857_v9 = vor.u32 %v11531_v61, %v8856_v60  ;;  %v11522_v61 = vld [vmem:[%s17055_s1 + $0x928] sm:$0xf0] }
 0x1a9   : > { %3917 = vmatpush.bf16.msrb.mxu1 %v9117_v21  ;;  %v8976_v21 = vld [vmem:[%s17055_s1 + $0xa58] sm:$0xf]  ;;  %v9144_v5 = vld [vmem:[%s17055_s1 + $0xba8] sm:$0xf] }
 0x1aa   : > { %3930 = vmatpush.bf16.msrb.mxu2 %v9213_v22  ;;  %v9181_v22 = vor.u32 %v11612_v13, %v9180_v12  ;;  %v8977_v26 = vor.u32 %v11561_v23, %v8976_v21  ;;  %v11600_v23 = vld [vmem:[%s17055_s1 + $0xb98] sm:$0xf0] }
 0x1ab   : > { %3943 = vmatpush.bf16.msrb.mxu3 %v9309_v40  ;;  %v9073_v40 = vor.u32 %v11585_v29, %v9072_v27 }
 0x1ac   : > { %3905 = vmatpush.bf16.msrb.mxu0 %v9009_v44  ;;  %v11534_v44 = vld [vmem:[%s17055_s1 + $0x988] sm:$0xf0] }
 0x1ad   : > { %3918 = vmatpush.bf16.msrb.mxu1 %v9105_v53  ;;  %v9060_v53 = vld [vmem:[%s17055_s1 + $0xb00] sm:$0xf]  ;;  %v8869_v58 = vor.u32 %v11534_v44, %v8868_v42  ;;  %v11549_v44 = vld [vmem:[%s17055_s1 + $0xa00] sm:$0xf0] }
 0x1ae   : > { %3931 = vmatpush.bf16.msrb.mxu2 %v9201_v54  ;;  %v11582_v54 = vld [vmem:[%s17055_s1 + $0xb08] sm:$0xf0] }
 0x1af   : > { %3944 = vmatpush.bf16.msrb.mxu3 %v9297_v63  ;;  %v9061_v59 = vor.u32 %v11582_v54, %v9060_v53  ;;  %v8952_v63 = vld [vmem:[%s17055_s1 + $0xa28] sm:$0xf]  ;;  %v9120_v53 = vld [vmem:[%s17055_s1 + $0xb78] sm:$0xf]  ;;  %v11597_v54 = vld [vmem:[%s17055_s1 + $0xb80] sm:$0xf0] }
 0x1b0   : > { %3906 = vmatpush.bf16.msrb.mxu0 %v8997_v4  ;;  %v11579_v4 = vld [vmem:[%s17055_s1 + $0xaf0] sm:$0xf0]  ;;  %v2691_v7 = vpop.f32.mrf.mxu0 }
 0x1b1   : > { %3919 = vmatpush.bf16.msrb.mxu1 %v9093_v10  ;;  %v2692_v10 = vadd.f32 %v2691_v7, %v14606_v20  ;;  %v9049_v12 = vor.u32 %v11579_v4, %v9048_v2  ;;  %v2704_v13 = vpop.f32.mrf.mxu1  ;;  %v11552_v20 = vld [vmem:[%s17055_s1 + $0xa18] sm:$0xf0]  ;;  %v11546_v2 = vld [vmem:[%s17055_s1 + $0x9e8] sm:$0xf0]  ;;  %v9012_v4 = vld [vmem:[%s17055_s1 + $0xaa0] sm:$0xf] }
 0x1b2   : > { %3932 = vmatpush.bf16.msrb.mxu2 %v9189_v28  ;;  %v8953_v28 = vor.u32 %v11555_v1, %v8952_v63  ;;  %v8916_v63 = vld [vmem:[%s17055_s1 + $0x9e0] sm:$0xf]  ;;  %v9121_v1 = vor.u32 %v11597_v54, %v9120_v53  ;;  %v11594_v7 = vld [vmem:[%s17055_s1 + $0xb68] sm:$0xf0]  ;;  %v9264_v54 = vld [vmem:[%s17055_s1 + $0xc98] sm:$0xf] }
 0x1b3   : > { %3945 = vmatpush.bf16.msrb.mxu3 %v9285_v17  ;;  %3907 = vmatmul.bf16.vlgmr.msrb.gmra.mxu0 %v14294_v34  ;;  %v9145_v17 = vor.u32 %v11603_v6, %v9144_v5  ;;  %v14775_v21 = vadd.f32 %v2704_v13, %v2692_v10  ;;  %v11570_v5 = vld [vmem:[%s17055_s1 + $0xaa8] sm:$0xf0]  ;;  %v9108_v6 = vld [vmem:[%s17055_s1 + $0xb60] sm:$0xf]  ;;  %v8808_v10 = vld [vmem:[%s17055_s1 + $0x908] sm:$0xf] }
 0x1b4   : > { %3951 = vmatpush.bf16.msra.mxu0 %v8893_v14  ;;  %3920 = vmatmul.bf16.vlgmr.msrb.gmra.mxu1 %v14308_v51  ;;  %v8844_v14 = vld [vmem:[%s17055_s1 + $0x950] sm:$0xf]  ;;  %v9013_v13 = vor.u32 %v11570_v5, %v9012_v4  ;;  %v9252_v5 = vld [vmem:[%s17055_s1 + $0xc80] sm:$0xf] }
 0x1b5   : > { %3964 = vmatpush.bf16.msra.mxu1 %v8989_v11  ;;  %3933 = vmatmul.bf16.vlgmr.msrb.gmra.mxu2 %v14486_v62  ;;  %v11528_v11 = vld [vmem:[%s17055_s1 + $0x958] sm:$0xf0] }
 0x1b6   : > { %3977 = vmatpush.bf16.msra.mxu2 %v9085_v16  ;;  %3946 = vmatmul.bf16.vlgmr.msrb.gmra.mxu3 %v14497_v3  ;;  %v8940_v16 = vld [vmem:[%s17055_s1 + $0xa10] sm:$0xf]  ;;  %v8845_v27 = vor.u32 %v11528_v11, %v8844_v14  ;;  %v8904_v14 = vld [vmem:[%s17055_s1 + $0x9c8] sm:$0xf]  ;;  %v11543_v11 = vld [vmem:[%s17055_s1 + $0x9d0] sm:$0xf0] }
 0x1b7   : > { %3990 = vmatpush.bf16.msra.mxu3 %v9181_v22  ;;  %v9132_v22 = vld [vmem:[%s17055_s1 + $0xb90] sm:$0xf]  ;;  %v8941_v29 = vor.u32 %v11552_v20, %v8940_v16  ;;  %v9000_v16 = vld [vmem:[%s17055_s1 + $0xa88] sm:$0xf]  ;;  %v11567_v20 = vld [vmem:[%s17055_s1 + $0xa90] sm:$0xf0] }
 0x1b8   : > { %3952 = vmatpush.bf16.msra.mxu0 %v8881_v38  ;;  %v11525_v38 = vld [vmem:[%s17055_s1 + $0x940] sm:$0xf0]  ;;  %v9133_v42 = vor.u32 %v11600_v23, %v9132_v22  ;;  %v9372_v23 = vld [vmem:[%s17055_s1 + $0xd70] sm:$0xf] }
 0x1b9   : > { %3965 = vmatpush.bf16.msra.mxu1 %v8977_v26  ;;  %v8928_v26 = vld [vmem:[%s17055_s1 + $0x9f8] sm:$0xf]  ;;  %v2730_v55 = vpop.f32.mrf.mxu3  ;;  %v8833_v56 = vor.u32 %v11525_v38, %v8832_v32  ;;  %v11683_v32 = vld [vmem:[%s17055_s1 + $0xe30] sm:$0xf0]  ;;  %v9096_v38 = vld [vmem:[%s17055_s1 + $0xb48] sm:$0xf] }
 0x1ba   : > { %3978 = vmatpush.bf16.msra.mxu2 %v9073_v40  ;;  %v2717_v40 = vpop.f32.mrf.mxu2 }
 0x1bb   : > { %3991 = vmatpush.bf16.msra.mxu3 %v9169_v50  ;;  %v11573_v50 = vld [vmem:[%s17055_s1 + $0xac0] sm:$0xf0]  ;;  %v2718_v52 = vadd.f32 %v2717_v40, %v14151_v57  ;;  %v8820_v57 = vld [vmem:[%s17055_s1 + $0x920] sm:$0xf] }
 0x1bc   : > { %3953 = vmatpush.bf16.msra.mxu0 %v8869_v58  ;;  %v2693_v58 = vpop.f32.mrf.mxu0  ;;  %v9025_v60 = vor.u32 %v11573_v50, %v9024_v48  ;;  %v9748_v48 = vld [vmem:[%s17055_s1 + $0xee8] sm:$0xf]  ;;  %v11707_v50 = vld [vmem:[%s17055_s1 + $0xef0] sm:$0xf0] }
 0x1bd   : > { %3966 = vmatpush.bf16.msra.mxu1 %v8965_v8  ;;  %v14808_v8 = vadd.f32 %v2730_v55, %v2718_v52  ;;  %v9277_v52 = vor.u32 %v11636_v19, %v9276_v18  ;;  %v11633_v58 = vld [vmem:[%s17055_s1 + $0xca0] sm:$0xf0]  ;;  %v11627_v18 = vld [vmem:[%s17055_s1 + $0xc70] sm:$0xf0] }
 0x1be   : > { %3979 = vmatpush.bf16.msra.mxu2 %v9061_v59  ;;  %v8929_v59 = vor.u32 %v11549_v44, %v8928_v26  ;;  %v11591_v26 = vld [vmem:[%s17055_s1 + $0xb50] sm:$0xf0]  ;;  %v9001_v44 = vor.u32 %v11567_v20, %v9000_v16 }
 0x1bf   : > { %3992 = vmatpush.bf16.msra.mxu3 %v9157_v0  ;;  %v2706_v0 = vpop.f32.mrf.mxu1 }
 0x1c0   : > { %3954 = vmatpush.bf16.msra.mxu0 %v8857_v9  ;;  %v8821_v9 = vor.u32 %v11522_v61, %v8820_v57  ;;  %v9749_v57 = vor.u32 %v11707_v50, %v9748_v48  ;;  %v9640_v61 = vld [vmem:[%s17055_s1 + $0xe10] sm:$0xf]  ;;  %v11648_v50 = vld [vmem:[%s17055_s1 + $0xd18] sm:$0xf0] }
 0x1c1   : > { %3967 = vmatpush.bf16.msra.mxu1 %v8953_v28  ;;  %v11519_v28 = vld [vmem:[%s17055_s1 + $0x910] sm:$0xf0]  ;;  %v2732_v40 = vpop.f32.mrf.mxu3  ;;  %v9736_v0 = vld [vmem:[%s17055_s1 + $0xed0] sm:$0xf] }
 0x1c2   : > { %3980 = vmatpush.bf16.msra.mxu2 %v9049_v12  ;;  %v8917_v12 = vor.u32 %v11546_v2, %v8916_v63  ;;  %v2719_v22 = vpop.f32.mrf.mxu2  ;;  %v11680_v63 = vld [vmem:[%s17055_s1 + $0xe18] sm:$0xf0]  ;;  %v9265_v2 = vor.u32 %v11633_v58, %v9264_v54  ;;  %v9324_v48 = vld [vmem:[%s17055_s1 + $0xd10] sm:$0xf] }
 0x1c3   : > { %3993 = vmatpush.bf16.msra.mxu3 %v9145_v17  ;;  %v9109_v17 = vor.u32 %v11594_v7, %v9108_v6  ;;  %v9641_v6 = vor.u32 %v11680_v63, %v9640_v61  ;;  %v11630_v7 = vld [vmem:[%s17055_s1 + $0xc88] sm:$0xf0]  ;;  %v9616_v22 = vld [vmem:[%s17055_s1 + $0xde0] sm:$0xf]  ;;  %v11621_v61 = vld [vmem:[%s17055_s1 + $0xc40] sm:$0xf0] }
 0x1c4   : > { %3955 = vmatpush.bf16.msra.mxu0 %v8845_v27  ;;  %v11660_v27 = vld [vmem:[%s17055_s1 + $0xd78] sm:$0xf0]  ;;  %v9253_v16 = vor.u32 %v11630_v7, %v9252_v5  ;;  %v9312_v63 = vld [vmem:[%s17055_s1 + $0xcf8] sm:$0xf]  ;;  %v9688_v7 = vld [vmem:[%s17055_s1 + $0xe70] sm:$0xf] }
 0x1c5   : > { %3968 = vmatpush.bf16.msra.mxu1 %v8941_v29  ;;  %v9652_v29 = vld [vmem:[%s17055_s1 + $0xe28] sm:$0xf]  ;;  %v9373_v53 = vor.u32 %v11660_v27, %v9372_v23  ;;  %v11674_v23 = vld [vmem:[%s17055_s1 + $0xde8] sm:$0xf0]  ;;  %v9712_v27 = vld [vmem:[%s17055_s1 + $0xea0] sm:$0xf] }
 0x1c6   : > { %3981 = vmatpush.bf16.msra.mxu2 %v9037_v31  ;;  %v8809_v31 = vor.u32 %v11519_v28, %v8808_v10  ;;  %v9653_v55 = vor.u32 %v11683_v32, %v9652_v29  ;;  %v11654_v10 = vld [vmem:[%s17055_s1 + $0xd48] sm:$0xf0]  ;;  %v9617_v40 = vor.u32 %v11674_v23, %v9616_v22  ;;  %v11668_v5 = vld [vmem:[%s17055_s1 + $0xdb8] sm:$0xf0]  ;;  %v9676_v22 = vld [vmem:[%s17055_s1 + $0xe58] sm:$0xf] }
 0x1c7   : > { %3994 = vmatpush.bf16.msra.mxu3 %v9133_v42  ;;  %v8905_v42 = vor.u32 %v11543_v11, %v8904_v14  ;;  %v9724_v14 = vld [vmem:[%s17055_s1 + $0xeb8] sm:$0xf]  ;;  %v11701_v11 = vld [vmem:[%s17055_s1 + $0xec0] sm:$0xf0]  ;;  %v11698_v29 = vld [vmem:[%s17055_s1 + $0xea8] sm:$0xf0] }
 0x1c8   : > { %3956 = vmatpush.bf16.msra.mxu0 %v8833_v56  ;;  %v9097_v56 = vor.u32 %v11591_v26, %v9096_v38  ;;  %v9725_v19 = vor.u32 %v11701_v11, %v9724_v14  ;;  %v9228_v38 = vld [vmem:[%s17055_s1 + $0xc50] sm:$0xf]  ;;  %v11689_v23 = vld [vmem:[%s17055_s1 + $0xe60] sm:$0xf0] }
 0x1c9   : > { %3969 = vmatpush.bf16.msra.mxu1 %v8929_v59  ;;  %v9360_v59 = vld [vmem:[%s17055_s1 + $0xd58] sm:$0xf] }
 0x1ca   : > { %3982 = vmatpush.bf16.msra.mxu2 %v9025_v60  ;;  %v11657_v60 = vld [vmem:[%s17055_s1 + $0xd60] sm:$0xf0] }
 0x1cb   : > { %3995 = vmatpush.bf16.msra.mxu3 %v9121_v1  ;;  %v11704_v1 = vld [vmem:[%s17055_s1 + $0xed8] sm:$0xf0]  ;;  %v9361_v4 = vor.u32 %v11657_v60, %v9360_v59  ;;  %v9325_v59 = vor.u32 %v11648_v50, %v9324_v48  ;;  %v9216_v60 = vld [vmem:[%s17055_s1 + $0xc38] sm:$0xf]  ;;  %v4228_v48 = vshll.u32 %v12511_v24, 16  ;;  %v9677_v50 = vor.u32 %v11689_v23, %v9676_v22 }
 0x1cc   : > { %3957 = vmatpush.bf16.msra.mxu0 %v8821_v9  ;;  %v9348_v9 = vld [vmem:[%s17055_s1 + $0xd40] sm:$0xf]  ;;  %v9737_v28 = vor.u32 %v11704_v1, %v9736_v0  ;;  %v11645_v0 = vld [vmem:[%s17055_s1 + $0xd00] sm:$0xf0]  ;;  %v9820_v23 = vld [vmem:[%s17055_s1 + $0xf78] sm:$0xf] }
 0x1cd   : > { %3970 = vmatpush.bf16.msra.mxu1 %v8917_v12  ;;  %v9628_v12 = vld [vmem:[%s17055_s1 + $0xdf8] sm:$0xf] }
 0x1ce   : > { %3983 = vmatpush.bf16.msra.mxu2 %v9013_v13  ;;  %v11677_v13 = vld [vmem:[%s17055_s1 + $0xe00] sm:$0xf0] }
 0x1cf   : > { %3996 = vmatpush.bf16.msra.mxu3 %v9109_v17  ;;  %v9349_v17 = vor.u32 %v11654_v10, %v9348_v9  ;;  %v9629_v20 = vor.u32 %v11677_v13, %v9628_v12  ;;  %v11692_v9 = vld [vmem:[%s17055_s1 + $0xe78] sm:$0xf0]  ;;  %v9313_v12 = vor.u32 %v11645_v0, %v9312_v63  ;;  %v9204_v13 = vld [vmem:[%s17055_s1 + $0xc20] sm:$0xf]  ;;  %v10132_v63 = vld [vmem:[%s17055_s1 + $0x11e8] sm:$0xf] }
 0x1d0   : > { %3958 = vmatpush.bf16.msra.mxu0 %v8809_v31 }
 0x1d1   : > { %3971 = vmatpush.bf16.msra.mxu1 %v8905_v42  ;;  %v2756_v42 = vpop.f32.mrf.mxu1 }
 0x1d2   : > { %3984 = vmatpush.bf16.msra.mxu2 %v9001_v44  ;;  %v11624_v44 = vld [vmem:[%s17055_s1 + $0xc58] sm:$0xf0] }
 0x1d3   : > { %3997 = vmatpush.bf16.msra.mxu3 %v9097_v56  ;;  %3959 = vmatmul.bf16.vlgmr.msra.gmra.mxu0 %v14284_v30  ;;  %v9240_v30 = vld [vmem:[%s17055_s1 + $0xc68] sm:$0xf]  ;;  %v11695_v56 = vld [vmem:[%s17055_s1 + $0xe90] sm:$0xf0]  ;;  %v9229_v58 = vor.u32 %v11624_v44, %v9228_v38 }
 0x1d4   : > { %4003 = vmatpush.bf16.msrb.mxu0 %v9277_v52  ;;  %3972 = vmatmul.bf16.vlgmr.msra.gmra.mxu1 %v14292_v33  ;;  %v9336_v33 = vld [vmem:[%s17055_s1 + $0xd28] sm:$0xf]  ;;  %v9241_v31 = vor.u32 %v11627_v18, %v9240_v30  ;;  %v9713_v52 = vor.u32 %v11698_v29, %v9712_v27  ;;  %v9300_v30 = vld [vmem:[%s17055_s1 + $0xce0] sm:$0xf]  ;;  %v11615_v29 = vld [vmem:[%s17055_s1 + $0xc10] sm:$0xf0] }
 0x1d5   : > { %4016 = vmatpush.bf16.msrb.mxu1 %v9373_v53  ;;  %3985 = vmatmul.bf16.vlgmr.msra.gmra.mxu2 %v14294_v34  ;;  %v11651_v34 = vld [vmem:[%s17055_s1 + $0xd30] sm:$0xf0]  ;;  %v9192_v27 = vld [vmem:[%s17055_s1 + $0xc08] sm:$0xf] }
 0x1d6   : > { %5041 = vmatpush.bf16.msrb.mxu2 %v9653_v55  ;;  %3998 = vmatmul.bf16.vlgmr.msra.gmra.mxu3 %v14308_v51  ;;  %v2743_v51 = vpop.f32.mrf.mxu0  ;;  %v9337_v32 = vor.u32 %v11651_v34, %v9336_v33  ;;  %v11671_v53 = vld [vmem:[%s17055_s1 + $0xdd0] sm:$0xf0]  ;;  %v9700_v55 = vld [vmem:[%s17055_s1 + $0xe88] sm:$0xf]  ;;  %v9689_v33 = vor.u32 %v11692_v9, %v9688_v7  ;;  %v9580_v34 = vld [vmem:[%s17055_s1 + $0xd98] sm:$0xf] }
 0x1d7   : > { %5054 = vmatpush.bf16.msrb.mxu3 %v9749_v57  ;;  %v2744_v26 = vadd.f32 %v2743_v51, %v14808_v8  ;;  %v9604_v8 = vld [vmem:[%s17055_s1 + $0xdc8] sm:$0xf]  ;;  %v11639_v38 = vld [vmem:[%s17055_s1 + $0xcd0] sm:$0xf0]  ;;  %v4230_v7 = vrot.slane %v4228_v48, 1 }
 0x1d8   : > { %4004 = vmatpush.bf16.msrb.mxu0 %v9265_v2  ;;  %v9605_v57 = vor.u32 %v11671_v53, %v9604_v8  ;;  %v2769_v1 = vpop.f32.mrf.mxu2  ;;  %v9701_v2 = vor.u32 %v11695_v56, %v9700_v55  ;;  %v9844_v44 = vld [vmem:[%s17055_s1 + $0xfa8] sm:$0xf]  ;;  %v11755_v53 = vld [vmem:[%s17055_s1 + $0x1070] sm:$0xf0] }
 0x1d9   : > { %4017 = vmatpush.bf16.msrb.mxu1 %v9361_v4  ;;  %v2757_v54 = vadd.f32 %v2756_v42, %v2744_v26  ;;  %v9592_v4 = vld [vmem:[%s17055_s1 + $0xdb0] sm:$0xf]  ;;  %v2782_v10 = vpop.f32.mrf.mxu3  ;;  %v2758_v18 = vpop.f32.mrf.mxu1  ;;  %v9568_v26 = vld [vmem:[%s17055_s1 + $0xd80] sm:$0xf]  ;;  %v11662_v42 = vld [vmem:[%s17055_s1 + $0xd88] sm:$0xf0] }
 0x1da   : > { %5042 = vmatpush.bf16.msrb.mxu2 %v9641_v6  ;;  %v9940_v8 = vld [vmem:[%s17055_s1 + $0x1068] sm:$0xf]  ;;  %v11779_v56 = vld [vmem:[%s17055_s1 + $0x1130] sm:$0xf0] }
 0x1db   : > { %5055 = vmatpush.bf16.msrb.mxu3 %v9737_v28  ;;  %v2770_v6 = vadd.f32 %v2769_v1, %v2757_v54  ;;  %v9217_v28 = vor.u32 %v11621_v61, %v9216_v60  ;;  %v10036_v55 = vld [vmem:[%s17055_s1 + $0x1128] sm:$0xf]  ;;  %v11686_v61 = vld [vmem:[%s17055_s1 + $0xe48] sm:$0xf0]  ;;  %v9569_v1 = vor.u32 %v11662_v42, %v9568_v26  ;;  %v9941_v9 = vor.u32 %v11755_v53, %v9940_v8  ;;  %v11797_v42 = vld [vmem:[%s17055_s1 + $0x11c0] sm:$0xf0] }
 0x1dc   : > { %4005 = vmatpush.bf16.msrb.mxu0 %v9253_v16  ;;  %v9593_v16 = vor.u32 %v11668_v5, %v9592_v4  ;;  %v11803_v4 = vld [vmem:[%s17055_s1 + $0x11f0] sm:$0xf0]  ;;  %v9832_v5 = vld [vmem:[%s17055_s1 + $0xf90] sm:$0xf]  ;;  %v11746_v8 = vld [vmem:[%s17055_s1 + $0x1028] sm:$0xf0] }
 0x1dd   : > { %4018 = vmatpush.bf16.msrb.mxu1 %v9349_v17  ;;  %v15010_v11 = vadd.f32 %v2782_v10, %v2770_v6  ;;  %v11618_v17 = vld [vmem:[%s17055_s1 + $0xc28] sm:$0xf0]  ;;  %v4226_v6 = vshrl.u32 %v12511_v24, 16  ;;  %v10037_v10 = vor.u32 %v11779_v56, %v10036_v55  ;;  %v10024_v24 = vld [vmem:[%s17055_s1 + $0x1110] sm:$0xf] }
 0x1de   : > { %5043 = vmatpush.bf16.msrb.mxu2 %v9629_v20  ;;  %v2745_v14 = vpop.f32.mrf.mxu0  ;;  %v11642_v20 = vld [vmem:[%s17055_s1 + $0xce8] sm:$0xf0]  ;;  %v9205_v51 = vor.u32 %v11618_v17, %v9204_v13  ;;  %v11752_v13 = vld [vmem:[%s17055_s1 + $0x1058] sm:$0xf0]  ;;  %v4233_v17 = vshrl.u32 %v12513_v25, 16 }
 0x1df   : > { %5056 = vmatpush.bf16.msrb.mxu3 %v9725_v19  ;;  %v11665_v19 = vld [vmem:[%s17055_s1 + $0xda0] sm:$0xf0]  ;;  %v10000_v53 = vld [vmem:[%s17055_s1 + $0x10e0] sm:$0xf] }
 0x1e0   : > { %4006 = vmatpush.bf16.msrb.mxu0 %v9241_v31  ;;  %v9301_v31 = vor.u32 %v11642_v20, %v9300_v30  ;;  %v2771_v54 = vpop.f32.mrf.mxu2  ;;  %v10133_v20 = vor.u32 %v11803_v4, %v10132_v63  ;;  %v11719_v63 = vld [vmem:[%s17055_s1 + $0xf50] sm:$0xf0]  ;;  %v9988_v4 = vld [vmem:[%s17055_s1 + $0x10c8] sm:$0xf] }
 0x1e1   : > { %4019 = vmatpush.bf16.msrb.mxu1 %v9337_v32  ;;  %v9288_v32 = vld [vmem:[%s17055_s1 + $0xcc8] sm:$0xf]  ;;  %v2784_v0 = vpop.f32.mrf.mxu3  ;;  %v11770_v54 = vld [vmem:[%s17055_s1 + $0x10e8] sm:$0xf0] }
 0x1e2   : > { %5044 = vmatpush.bf16.msrb.mxu2 %v9617_v40  ;;  %v9581_v40 = vor.u32 %v11665_v19, %v9580_v34  ;;  %v9289_v60 = vor.u32 %v11639_v38, %v9288_v32  ;;  %v11800_v34 = vld [vmem:[%s17055_s1 + $0x11d8] sm:$0xf0]  ;;  %v15109_v19 = vor.u32 %v4230_v7, %v4226_v6  ;;  %v11773_v32 = vld [vmem:[%s17055_s1 + $0x1100] sm:$0xf0]  ;;  %v9892_v0 = vld [vmem:[%s17055_s1 + $0x1008] sm:$0xf] }
 0x1e3   : > { %5057 = vmatpush.bf16.msrb.mxu3 %v9713_v52  ;;  %v11731_v52 = vld [vmem:[%s17055_s1 + $0xfb0] sm:$0xf0] }
 0x1e4   : > { %4007 = vmatpush.bf16.msrb.mxu0 %v9229_v58  ;;  %v4235_v58 = vshll.u32 %v12513_v25, 16 }
 0x1e5   : > { %4020 = vmatpush.bf16.msrb.mxu1 %v9325_v59  ;;  %v9193_v59 = vor.u32 %v11615_v29, %v9192_v27  ;;  %v11725_v27 = vld [vmem:[%s17055_s1 + $0xf80] sm:$0xf0]  ;;  %v9916_v29 = vld [vmem:[%s17055_s1 + $0x1038] sm:$0xf] }
 0x1e6   : > { %5045 = vmatpush.bf16.msrb.mxu2 %v9605_v57  ;;  %v9664_v57 = vld [vmem:[%s17055_s1 + $0xe40] sm:$0xf]  ;;  %v4237_v30 = vrot.slane %v4235_v58, 1 }
 0x1e7   : > { %5058 = vmatpush.bf16.msrb.mxu3 %v9701_v2  ;;  %v9845_v2 = vor.u32 %v11731_v52, %v9844_v44  ;;  %v9665_v14 = vor.u32 %v11686_v61, %v9664_v57  ;;  %v9904_v52 = vld [vmem:[%s17055_s1 + $0x1020] sm:$0xf]  ;;  %v10001_v57 = vor.u32 %v11770_v54, %v10000_v53  ;;  %v9796_v61 = vld [vmem:[%s17055_s1 + $0xf48] sm:$0xf]  ;;  %v11710_v54 = vld [vmem:[%s17055_s1 + $0xf08] sm:$0xf0] }
 0x1e8   : > { %4008 = vmatpush.bf16.msrb.mxu0 %v9217_v28  ;;  %v11728_v28 = vld [vmem:[%s17055_s1 + $0xf98] sm:$0xf0]  ;;  %v15130_v38 = vor.u32 %v4237_v30, %v4233_v17  ;;  %v10096_v58 = vld [vmem:[%s17055_s1 + $0x11a0] sm:$0xf]  ;;  %v9880_v17 = vld [vmem:[%s17055_s1 + $0xff0] sm:$0xf] }
 0x1e9   : > { %4021 = vmatpush.bf16.msrb.mxu1 %v9313_v12  ;;  %v9928_v12 = vld [vmem:[%s17055_s1 + $0x1050] sm:$0xf]  ;;  %v9833_v18 = vor.u32 %v11728_v28, %v9832_v5  ;;  %v11767_v5 = vld [vmem:[%s17055_s1 + $0x10d0] sm:$0xf0]  ;;  %v10084_v28 = vld [vmem:[%s17055_s1 + $0x1188] sm:$0xf] }
 0x1ea   : > { %5046 = vmatpush.bf16.msrb.mxu2 %v9593_v16  ;;  %v11776_v16 = vld [vmem:[%s17055_s1 + $0x1118] sm:$0xf0]  ;;  %v9929_v25 = vor.u32 %v11752_v13, %v9928_v12  ;;  %v11791_v12 = vld [vmem:[%s17055_s1 + $0x1190] sm:$0xf0] }
 0x1eb   : > { %5059 = vmatpush.bf16.msrb.mxu3 %v9689_v33  ;;  %v10120_v33 = vld [vmem:[%s17055_s1 + $0x11d0] sm:$0xf]  ;;  %v10025_v22 = vor.u32 %v11776_v16, %v10024_v24  ;;  %v11716_v16 = vld [vmem:[%s17055_s1 + $0xf38] sm:$0xf0] }
 0x1ec   : > { %4009 = vmatpush.bf16.msrb.mxu0 %v9205_v51  ;;  %v11749_v51 = vld [vmem:[%s17055_s1 + $0x1040] sm:$0xf0]  ;;  %v10121_v26 = vor.u32 %v11800_v34, %v10120_v33  ;;  %v9784_v24 = vld [vmem:[%s17055_s1 + $0xf30] sm:$0xf]  ;;  %v11740_v30 = vld [vmem:[%s17055_s1 + $0xff8] sm:$0xf0]  ;;  %v10085_v33 = vor.u32 %v11791_v12, %v10084_v28 }
 0x1ed   : > { %4022 = vmatpush.bf16.msrb.mxu1 %v9301_v31  ;;  %v10012_v31 = vld [vmem:[%s17055_s1 + $0x10f8] sm:$0xf]  ;;  %v9917_v44 = vor.u32 %v11749_v51, %v9916_v29  ;;  %v10072_v34 = vld [vmem:[%s17055_s1 + $0x1170] sm:$0xf]  ;;  %v11730_v12 = vld [vmem:[%s17055_s1 + $0xfac] sm:$0xf] }
 0x1ee   : > { %5047 = vmatpush.bf16.msrb.mxu2 %v9581_v40  ;;  %v10108_v40 = vld [vmem:[%s17055_s1 + $0x11b8] sm:$0xf]  ;;  %v10013_v48 = vor.u32 %v11773_v32, %v10012_v31  ;;  %v9881_v31 = vor.u32 %v11740_v30, %v9880_v17  ;;  %v11782_v17 = vld [vmem:[%s17055_s1 + $0x1148] sm:$0xf0]  ;;  %v4254_v30 = vshrl.u32 %v12671_v43, 16 }
 0x1ef   : > { %5060 = vmatpush.bf16.msrb.mxu3 %v9677_v50  ;;  %v11722_v50 = vld [vmem:[%s17055_s1 + $0xf68] sm:$0xf0]  ;;  %v10109_v55 = vor.u32 %v11797_v42, %v10108_v40  ;;  %v9868_v29 = vld [vmem:[%s17055_s1 + $0xfd8] sm:$0xf]  ;;  %v11761_v40 = vld [vmem:[%s17055_s1 + $0x10a0] sm:$0xf0] }
 0x1f0   : > { %4010 = vmatpush.bf16.msrb.mxu0 %v9193_v59  ;;  %v11794_v59 = vld [vmem:[%s17055_s1 + $0x11a8] sm:$0xf0] }
 0x1f1   : > { %4023 = vmatpush.bf16.msrb.mxu1 %v9289_v60  ;;  %v9905_v60 = vor.u32 %v11746_v8, %v9904_v52  ;;  %v3817_v6 = vpop.f32.mrf.mxu1  ;;  %v10097_v7 = vor.u32 %v11794_v59, %v10096_v58 }
 0x1f2   : > { %5048 = vmatpush.bf16.msrb.mxu2 %v9569_v1  ;;  %v3804_v1 = vpop.f32.mrf.mxu0 }
 0x1f3   : > { %5061 = vmatpush.bf16.msrb.mxu3 %v9665_v14  ;;  %4011 = vmatmul.bf16.vlgmr.msrb.gmra.mxu0 %v14486_v62  ;;  %v9821_v62 = vor.u32 %v11725_v27, %v9820_v23  ;;  %v9989_v14 = vor.u32 %v11767_v5, %v9988_v4  ;;  %v9772_v23 = vld [vmem:[%s17055_s1 + $0xf18] sm:$0xf]  ;;  %v11713_v27 = vld [vmem:[%s17055_s1 + $0xf20] sm:$0xf0]  ;;  %v4242_v4 = vshll.u32 %v12535_v36, 16  ;;  %v4249_v5 = vshll.u32 %v12545_v41, 16 }
 0x1f4   : > { %5067 = vmatpush.bf16.msra.mxu0 %v9845_v2  ;;  %4024 = vmatmul.bf16.vlgmr.msrb.gmra.mxu1 %v14497_v3  ;;  %v9808_v3 = vld [vmem:[%s17055_s1 + $0xf60] sm:$0xf]  ;;  %v11743_v2 = vld [vmem:[%s17055_s1 + $0x1010] sm:$0xf0]  ;;  %v9773_v59 = vor.u32 %v11713_v27, %v9772_v23  ;;  %v4247_v23 = vshrl.u32 %v12545_v41, 16 }
 0x1f5   : > { %5080 = vmatpush.bf16.msra.mxu1 %v9941_v9  ;;  %5049 = vmatmul.bf16.vlgmr.msrb.gmra.mxu2 %v15109_v19  ;;  %v9809_v56 = vor.u32 %v11722_v50, %v9808_v3  ;;  %v3818_v9 = vadd.f32 %v3817_v6, %v3804_v1  ;;  %v9893_v13 = vor.u32 %v11743_v2, %v9892_v0  ;;  %v11785_v3 = vld [vmem:[%s17055_s1 + $0x1160] sm:$0xf0]  ;;  %v9760_v50 = vld [vmem:[%s17055_s1 + $0xf00] sm:$0xf]  ;;  %v11682_v1 = vld [vmem:[%s17055_s1 + $0xe2c] sm:$0xf] }
 0x1f6   : > { %5093 = vmatpush.bf16.msra.mxu2 %v10037_v10  ;;  %5062 = vmatmul.bf16.vlgmr.msrb.gmra.mxu3 %v15130_v38  ;;  %v9797_v10 = vor.u32 %v11719_v63, %v9796_v61  ;;  %v4256_v61 = vshll.u32 %v12671_v43, 16  ;;  %v9654_v2 = vld [vmem:[%s17055_s1 + $0xe34] sm:$0xf0]  ;;  %v11706_v6 = vld [vmem:[%s17055_s1 + $0xeec] sm:$0xf]  ;;  %v9761_v28 = vor.u32 %v11710_v54, %v9760_v50  ;;  %v4251_v27 = vrot.slane %v4249_v5, 1 }
 0x1f7   : > { %5106 = vmatpush.bf16.msra.mxu3 %v10133_v20  ;;  %v9976_v20 = vld [vmem:[%s17055_s1 + $0x10b0] sm:$0xf]  ;;  %v11703_v41 = vld [vmem:[%s17055_s1 + $0xed4] sm:$0xf]  ;;  %v9918_v5 = vld [vmem:[%s17055_s1 + $0x1044] sm:$0xf0] }
 0x1f8   : > { %5068 = vmatpush.bf16.msra.mxu0 %v9833_v18  ;;  %v11764_v18 = vld [vmem:[%s17055_s1 + $0x10b8] sm:$0xf0]  ;;  %v3830_v51 = vpop.f32.mrf.mxu2 }
 0x1f9   : > { %5081 = vmatpush.bf16.msra.mxu1 %v9929_v25  ;;  %v11788_v25 = vld [vmem:[%s17055_s1 + $0x1178] sm:$0xf0]  ;;  %v9977_v32 = vor.u32 %v11764_v18, %v9976_v20  ;;  %v3819_v52 = vpop.f32.mrf.mxu1  ;;  %v3843_v8 = vpop.f32.mrf.mxu3  ;;  %v4258_v20 = vrot.slane %v4256_v61, 1  ;;  %v11754_v18 = vld [vmem:[%s17055_s1 + $0x106c] sm:$0xf] }
 0x1fa   : > { %5094 = vmatpush.bf16.msra.mxu2 %v10025_v22  ;;  %v9785_v22 = vor.u32 %v11716_v16, %v9784_v24  ;;  %v3806_v42 = vpop.f32.mrf.mxu0  ;;  %v10073_v53 = vor.u32 %v11788_v25, %v10072_v34  ;;  %v9942_v34 = vld [vmem:[%s17055_s1 + $0x1074] sm:$0xf0]  ;;  %v4240_v25 = vshrl.u32 %v12535_v36, 16  ;;  %v9642_v36 = vld [vmem:[%s17055_s1 + $0xe1c] sm:$0xf0]  ;;  %v15317_v52 = vor.u32 %v4251_v27, %v4247_v23 }
 0x1fb   : > { %5107 = vmatpush.bf16.msra.mxu3 %v10121_v26  ;;  %v11737_v26 = vld [vmem:[%s17055_s1 + $0xfe0] sm:$0xf0]  ;;  %v15304_v42 = vor.u32 %v4258_v20, %v4254_v30  ;;  %v11700_v61 = vld [vmem:[%s17055_s1 + $0xebc] sm:$0xf]  ;;  %v9906_v30 = vld [vmem:[%s17055_s1 + $0x102c] sm:$0xf0] }
 0x1fc   : > { %5069 = vmatpush.bf16.msra.mxu0 %v9821_v62  ;;  %v9964_v62 = vld [vmem:[%s17055_s1 + $0x1098] sm:$0xf]  ;;  %v9869_v63 = vor.u32 %v11737_v26, %v9868_v29  ;;  %v9657_v29 = vor.u32 %v11682_v1, %v9654_v2  ;;  %v11724_v1 = vld [vmem:[%s17055_s1 + $0xf7c] sm:$0xf]  ;;  %v9822_v2 = vld [vmem:[%s17055_s1 + $0xf84] sm:$0xf0] }
 0x1fd   : > { %5082 = vmatpush.bf16.msra.mxu1 %v9917_v44  ;;  %v3831_v44 = vadd.f32 %v3830_v51, %v3818_v9  ;;  %v9965_v0 = vor.u32 %v11761_v40, %v9964_v62  ;;  %v4263_v9 = vshll.u32 %v12673_v45, 16  ;;  %v4261_v51 = vshrl.u32 %v12673_v45, 16  ;;  %v11679_v40 = vld [vmem:[%s17055_s1 + $0xe14] sm:$0xf]  ;;  %v11670_v23 = vld [vmem:[%s17055_s1 + $0xdcc] sm:$0xf] }
 0x1fe   : > { %5095 = vmatpush.bf16.msra.mxu2 %v10013_v48  ;;  %v10060_v48 = vld [vmem:[%s17055_s1 + $0x1158] sm:$0xf]  ;;  %v9945_v45 = vor.u32 %v11754_v18, %v9942_v34 }
 0x1ff   : > { %5108 = vmatpush.bf16.msra.mxu3 %v10109_v55  ;;  %v9856_v55 = vld [vmem:[%s17055_s1 + $0xfc0] sm:$0xf]  ;;  %v15249_v58 = vadd.f32 %v3843_v8, %v3831_v44  ;;  %v11751_v8 = vld [vmem:[%s17055_s1 + $0x1054] sm:$0xf]  ;;  %v9606_v27 = vld [vmem:[%s17055_s1 + $0xdd4] sm:$0xf0] }
 0x200   : > { %5070 = vmatpush.bf16.msra.mxu0 %v9809_v56  ;;  %v11734_v56 = vld [vmem:[%s17055_s1 + $0xfc8] sm:$0xf0]  ;;  %v9738_v44 = vld [vmem:[%s17055_s1 + $0xedc] sm:$0xf0] }
 0x201   : > { %5083 = vmatpush.bf16.msra.mxu1 %v9905_v60  ;;  %v9952_v60 = vld [vmem:[%s17055_s1 + $0x1080] sm:$0xf]  ;;  %v9857_v24 = vor.u32 %v11734_v56, %v9856_v55  ;;  %v9645_v55 = vor.u32 %v11679_v40, %v9642_v36  ;;  %v9741_v56 = vor.u32 %v11703_v41, %v9738_v44  ;;  %v9609_v40 = vor.u32 %v11670_v23, %v9606_v27  ;;  %v11667_v44 = vld [vmem:[%s17055_s1 + $0xdb4] sm:$0xf]  ;;  %v11778_v23 = vld [vmem:[%s17055_s1 + $0x112c] sm:$0xf] }
 0x202   : > { %5096 = vmatpush.bf16.msra.mxu2 %v10001_v57  ;;  %v11758_v57 = vld [vmem:[%s17055_s1 + $0x1088] sm:$0xf0]  ;;  %v10038_v27 = vld [vmem:[%s17055_s1 + $0x1134] sm:$0xf0] }
 0x203   : > { %5109 = vmatpush.bf16.msra.mxu3 %v10097_v7  ;;  %v9750_v7 = vld [vmem:[%s17055_s1 + $0xef4] sm:$0xf0]  ;;  %v9953_v16 = vor.u32 %v11758_v57, %v9952_v60  ;;  %v11676_v60 = vld [vmem:[%s17055_s1 + $0xdfc] sm:$0xf]  ;;  %v9630_v57 = vld [vmem:[%s17055_s1 + $0xe04] sm:$0xf0] }
 0x204   : > { %5071 = vmatpush.bf16.msra.mxu0 %v9797_v10  ;;  %v10061_v10 = vor.u32 %v11785_v3, %v10060_v48  ;;  %v9753_v43 = vor.u32 %v11706_v6, %v9750_v7  ;;  %v11727_v48 = vld [vmem:[%s17055_s1 + $0xf94] sm:$0xf]  ;;  %v9834_v3 = vld [vmem:[%s17055_s1 + $0xf9c] sm:$0xf0]  ;;  %v9633_v6 = vor.u32 %v11676_v60, %v9630_v57 }
 0x205   : > { %5084 = vmatpush.bf16.msra.mxu1 %v9893_v13  ;;  %v9846_v13 = vld [vmem:[%s17055_s1 + $0xfb4] sm:$0xf0] }
 0x206   : > { %5097 = vmatpush.bf16.msra.mxu2 %v9989_v14  ;;  %v10048_v14 = vld [vmem:[%s17055_s1 + $0x1140] sm:$0xf]  ;;  %v9849_v26 = vor.u32 %v11730_v12, %v9846_v13  ;;  %v11697_v12 = vld [vmem:[%s17055_s1 + $0xea4] sm:$0xf] }
 0x207   : > { %5110 = vmatpush.bf16.msra.mxu3 %v10085_v33  ;;  %v3832_v33 = vpop.f32.mrf.mxu2  ;;  %v10049_v62 = vor.u32 %v11782_v17, %v10048_v14  ;;  %v9714_v14 = vld [vmem:[%s17055_s1 + $0xeac] sm:$0xf0]  ;;  %v11745_v17 = vld [vmem:[%s17055_s1 + $0x1024] sm:$0xf] }
 0x208   : > { %5072 = vmatpush.bf16.msra.mxu0 %v9785_v22  ;;  %v4244_v22 = vrot.slane %v4242_v4, 1  ;;  %v11748_v4 = vld [vmem:[%s17055_s1 + $0x103c] sm:$0xf]  ;;  %v9717_v34 = vor.u32 %v11697_v12, %v9714_v14 }
 0x209   : > { %5085 = vmatpush.bf16.msra.mxu1 %v9881_v31  ;;  %v4265_v31 = vrot.slane %v4263_v9, 1  ;;  %v9825_v9 = vor.u32 %v11724_v1, %v9822_v2  ;;  %v9921_v13 = vor.u32 %v11748_v4, %v9918_v5  ;;  %v11664_v1 = vld [vmem:[%s17055_s1 + $0xd9c] sm:$0xf]  ;;  %v9582_v2 = vld [vmem:[%s17055_s1 + $0xda4] sm:$0xf0] }
 0x20a   : > { %5098 = vmatpush.bf16.msra.mxu2 %v9977_v32  ;;  %v3845_v32 = vpop.f32.mrf.mxu3  ;;  %v15315_v50 = vor.u32 %v4244_v22, %v4240_v25  ;;  %v11688_v4 = vld [vmem:[%s17055_s1 + $0xe5c] sm:$0xf] }
 0x20b   : > { %5111 = vmatpush.bf16.msra.mxu3 %v10073_v53  ;;  %v9930_v53 = vld [vmem:[%s17055_s1 + $0x105c] sm:$0xf0]  ;;  %v15325_v54 = vor.u32 %v4265_v31, %v4261_v51  ;;  %v11718_v51 = vld [vmem:[%s17055_s1 + $0xf4c] sm:$0xf]  ;;  %v9798_v31 = vld [vmem:[%s17055_s1 + $0xf54] sm:$0xf0] }
 0x20c   : > { %5073 = vmatpush.bf16.msra.mxu0 %v9773_v59  ;;  %v9837_v59 = vor.u32 %v11727_v48, %v9834_v3  ;;  %v9594_v48 = vld [vmem:[%s17055_s1 + $0xdbc] sm:$0xf0]  ;;  %v11691_v3 = vld [vmem:[%s17055_s1 + $0xe74] sm:$0xf]  ;;  %v11736_v12 = vld [vmem:[%s17055_s1 + $0xfdc] sm:$0xf] }
 0x20d   : > { %5086 = vmatpush.bf16.msra.mxu1 %v9869_v63  ;;  %v9933_v63 = vor.u32 %v11751_v8, %v9930_v53  ;;  %v11715_v53 = vld [vmem:[%s17055_s1 + $0xf34] sm:$0xf]  ;;  %v9597_v60 = vor.u32 %v11667_v44, %v9594_v48  ;;  %v11708_v44 = vld [vmem:[%s17055_s1 + $0xef8] sm:$0xf0]  ;;  %v10041_v48 = vor.u32 %v11778_v23, %v10038_v27  ;;  %v9624_v23 = vld [vmem:[%s17055_s1 + $0xde8] sm:$0xf] }
 0x20e   : > { %5099 = vmatpush.bf16.msra.mxu2 %v9965_v0  ;;  %v9726_v0 = vld [vmem:[%s17055_s1 + $0xec4] sm:$0xf0]  ;;  %v11675_v27 = vld [vmem:[%s17055_s1 + $0xdf0] sm:$0xf0] }
 0x20f   : > { %5112 = vmatpush.bf16.msra.mxu3 %v10061_v10  ;;  %v9729_v7 = vor.u32 %v11700_v61, %v9726_v0  ;;  %v11673_v10 = vld [vmem:[%s17055_s1 + $0xde4] sm:$0xf] }
 0x210   : > { %5074 = vmatpush.bf16.msra.mxu0 %v9761_v28  ;;  %v9618_v28 = vld [vmem:[%s17055_s1 + $0xdec] sm:$0xf0]  ;;  %v3856_v20 = vpop.f32.mrf.mxu0 }
 0x211   : > { %5087 = vmatpush.bf16.msra.mxu1 %v9857_v24  ;;  %v11721_v24 = vld [vmem:[%s17055_s1 + $0xf64] sm:$0xf]  ;;  %v9621_v18 = vor.u32 %v11673_v10, %v9618_v28  ;;  %v3857_v33 = vadd.f32 %v3856_v20, %v15249_v58  ;;  %v3869_v22 = vpop.f32.mrf.mxu1  ;;  %v9702_v58 = vld [vmem:[%s17055_s1 + $0xe94] sm:$0xf0]  ;;  %v9774_v10 = vld [vmem:[%s17055_s1 + $0xf24] sm:$0xf0] }
 0x212   : > { %5100 = vmatpush.bf16.msra.mxu2 %v9953_v16  ;;  %v9810_v16 = vld [vmem:[%s17055_s1 + $0xf6c] sm:$0xf0] }
 0x213   : > { %5113 = vmatpush.bf16.msra.mxu3 %v10049_v62  ;;  %5075 = vmatmul.bf16.vlgmr.msra.gmra.mxu0 %v15315_v50  ;;  %v9813_v25 = vor.u32 %v11721_v24, %v9810_v16  ;;  %v3870_v32 = vadd.f32 %v3869_v22, %v3857_v33  ;;  %v9894_v62 = vld [vmem:[%s17055_s1 + $0x1014] sm:$0xf0]  ;;  %v9585_v24 = vor.u32 %v11664_v1, %v9582_v2  ;;  %v11661_v16 = vld [vmem:[%s17055_s1 + $0xd84] sm:$0xf]  ;;  %v9666_v33 = vld [vmem:[%s17055_s1 + $0xe4c] sm:$0xf0] }
 0x214   : > { %5119 = vmatpush.bf16.msrb.mxu0 %v9657_v29  ;;  %5088 = vmatmul.bf16.vlgmr.msra.gmra.mxu1 %v15317_v52  ;;  %v11694_v29 = vld [vmem:[%s17055_s1 + $0xe8c] sm:$0xf]  ;;  %v9762_v22 = vld [vmem:[%s17055_s1 + $0xf0c] sm:$0xf0]  ;;  %v11705_v1 = vld [vmem:[%s17055_s1 + $0xee0] sm:$0xf0] }
 0x215   : > { %5132 = vmatpush.bf16.msrb.mxu1 %v9753_v43  ;;  %5101 = vmatmul.bf16.vlgmr.msra.gmra.mxu2 %v15304_v42  ;;  %v9909_v43 = vor.u32 %v11745_v17, %v9906_v30  ;;  %v15405_v36 = vadd.f32 %v3870_v32, %v14399_v15  ;;  %v9705_v41 = vor.u32 %v11694_v29, %v9702_v58  ;;  %v9690_v15 = vld [vmem:[%s17055_s1 + $0xe7c] sm:$0xf0]  ;;  %v9570_v17 = vld [vmem:[%s17055_s1 + $0xd8c] sm:$0xf0]  ;;  %v11802_v29 = vld [vmem:[%s17055_s1 + $0x11ec] sm:$0xf] }
 0x216   : > { %5145 = vmatpush.bf16.msrb.mxu2 %v9849_v26  ;;  %5114 = vmatmul.bf16.vlgmr.msra.gmra.mxu3 %v15325_v54  ;;  %v11742_v26 = vld [vmem:[%s17055_s1 + $0x100c] sm:$0xf]  ;;  %v9660_v58 = vld [vmem:[%s17055_s1 + $0xe30] sm:$0xf]  ;;  %v11733_v32 = vld [vmem:[%s17055_s1 + $0xfc4] sm:$0xf] }
 0x217   : > { %5158 = vmatpush.bf16.msrb.mxu3 %v9945_v45  ;;  %v9801_v45 = vor.u32 %v11718_v51, %v9798_v31  ;;  %v9897_v8 = vor.u32 %v11742_v26, %v9894_v62  ;;  %v9573_v51 = vor.u32 %v11661_v16, %v9570_v17  ;;  %v11684_v31 = vld [vmem:[%s17055_s1 + $0xe38] sm:$0xf0]  ;;  %v9858_v26 = vld [vmem:[%s17055_s1 + $0xfcc] sm:$0xf0]  ;;  %v11702_v16 = vld [vmem:[%s17055_s1 + $0xec8] sm:$0xf0] }
 0x218   : > { %5120 = vmatpush.bf16.msrb.mxu0 %v9645_v55  ;;  %v9786_v55 = vld [vmem:[%s17055_s1 + $0xf3c] sm:$0xf0]  ;;  %v3882_v57 = vpop.f32.mrf.mxu2  ;;  %v3858_v61 = vpop.f32.mrf.mxu0 }
 0x219   : > { %5133 = vmatpush.bf16.msrb.mxu1 %v9741_v56  ;;  %v11739_v56 = vld [vmem:[%s17055_s1 + $0xff4] sm:$0xf]  ;;  %v9789_v0 = vor.u32 %v11715_v53, %v9786_v55  ;;  %v3871_v5 = vpop.f32.mrf.mxu1  ;;  %v3895_v28 = vpop.f32.mrf.mxu3  ;;  %v9661_v53 = vor.u32 %v11684_v31, %v9660_v58  ;;  %v9861_v55 = vor.u32 %v11733_v32, %v9858_v26  ;;  %v9648_v61 = vld [vmem:[%s17055_s1 + $0xe18] sm:$0xf]  ;;  %v11766_v31 = vld [vmem:[%s17055_s1 + $0x10cc] sm:$0xf]  ;;  %v9625_v32 = vor.u32 %v11675_v27, %v9624_v23 }
 0x21a   : > { %5146 = vmatpush.bf16.msrb.mxu2 %v9837_v59  ;;  %v9882_v59 = vld [vmem:[%s17055_s1 + $0xffc] sm:$0xf0]  ;;  %v15455_v14 = vadd.f32 %v3895_v28, %v3882_v57  ;;  %v11772_v5 = vld [vmem:[%s17055_s1 + $0x10fc] sm:$0xf]  ;;  %v11690_v27 = vld [vmem:[%s17055_s1 + $0xe68] sm:$0xf0] }
 0x21b   : > { %5159 = vmatpush.bf16.msrb.mxu3 %v9933_v63  ;;  %v9693_v63 = vor.u32 %v11691_v3, %v9690_v15  ;;  %v9684_v23 = vld [vmem:[%s17055_s1 + $0xe60] sm:$0xf] }
 0x21c   : > { %5121 = vmatpush.bf16.msrb.mxu0 %v9633_v6  ;;  %v9885_v6 = vor.u32 %v11739_v56, %v9882_v59  ;;  %v10026_v56 = vld [vmem:[%s17055_s1 + $0x111c] sm:$0xf0]  ;;  %v11799_v59 = vld [vmem:[%s17055_s1 + $0x11d4] sm:$0xf] }
 0x21d   : > { %5134 = vmatpush.bf16.msrb.mxu1 %v9729_v7  ;;  %v9678_v7 = vld [vmem:[%s17055_s1 + $0xe64] sm:$0xf0] }
 0x21e   : > { %5147 = vmatpush.bf16.msrb.mxu2 %v9825_v9  ;;  %v11712_v9 = vld [vmem:[%s17055_s1 + $0xf1c] sm:$0xf]  ;;  %v9681_v30 = vor.u32 %v11688_v4, %v9678_v7  ;;  %v10014_v7 = vld [vmem:[%s17055_s1 + $0x1104] sm:$0xf0] }
 0x21f   : > { %5160 = vmatpush.bf16.msrb.mxu3 %v9921_v13  ;;  %v9870_v13 = vld [vmem:[%s17055_s1 + $0xfe4] sm:$0xf0]  ;;  %v9777_v20 = vor.u32 %v11712_v9, %v9774_v10  ;;  %v11796_v9 = vld [vmem:[%s17055_s1 + $0x11bc] sm:$0xf]  ;;  %v10017_v17 = vor.u32 %v11772_v5, %v10014_v7  ;;  %v11693_v7 = vld [vmem:[%s17055_s1 + $0xe80] sm:$0xf0] }
 0x220   : > { %5122 = vmatpush.bf16.msrb.mxu0 %v9621_v18  ;;  %v11685_v18 = vld [vmem:[%s17055_s1 + $0xe44] sm:$0xf]  ;;  %v3884_v62 = vpop.f32.mrf.mxu2  ;;  %v10110_v10 = vld [vmem:[%s17055_s1 + $0x11c4] sm:$0xf0] }
 0x221   : > { %5135 = vmatpush.bf16.msrb.mxu1 %v9717_v34  ;;  %v11709_v34 = vld [vmem:[%s17055_s1 + $0xf04] sm:$0xf]  ;;  %v3897_v15 = vpop.f32.mrf.mxu3 }
 0x222   : > { %5148 = vmatpush.bf16.msrb.mxu2 %v9813_v25  ;;  %v9873_v25 = vor.u32 %v11736_v12, %v9870_v13  ;;  %v9636_v12 = vld [vmem:[%s17055_s1 + $0xe00] sm:$0xf]  ;;  %v11678_v13 = vld [vmem:[%s17055_s1 + $0xe08] sm:$0xf0]  ;;  %v9708_v15 = vld [vmem:[%s17055_s1 + $0xe90] sm:$0xf] }
 0x223   : > { %5161 = vmatpush.bf16.msrb.mxu3 %v9909_v43  ;;  %v10134_v43 = vld [vmem:[%s17055_s1 + $0x11f4] sm:$0xf0] }
 0x224   : > { %5123 = vmatpush.bf16.msrb.mxu0 %v9609_v40  ;;  %v9669_v40 = vor.u32 %v11685_v18, %v9666_v33  ;;  %v10137_v3 = vor.u32 %v11802_v29, %v10134_v43  ;;  %v9637_v18 = vor.u32 %v11678_v13, %v9636_v12  ;;  %v10002_v33 = vld [vmem:[%s17055_s1 + $0x10ec] sm:$0xf0]  ;;  %v9720_v29 = vld [vmem:[%s17055_s1 + $0xea8] sm:$0xf]  ;;  %v11699_v43 = vld [vmem:[%s17055_s1 + $0xeb0] sm:$0xf0] }
 0x225   : > { %5136 = vmatpush.bf16.msrb.mxu1 %v9705_v41  ;;  %v9765_v41 = vor.u32 %v11709_v34, %v9762_v22  ;;  %v11793_v34 = vld [vmem:[%s17055_s1 + $0x11a4] sm:$0xf]  ;;  %v11760_v12 = vld [vmem:[%s17055_s1 + $0x109c] sm:$0xf] }
 0x226   : > { %5149 = vmatpush.bf16.msrb.mxu2 %v9801_v45  ;;  %v9756_v45 = vld [vmem:[%s17055_s1 + $0xef0] sm:$0xf] }
 0x227   : > { %5162 = vmatpush.bf16.msrb.mxu3 %v9897_v8  ;;  %v11775_v8 = vld [vmem:[%s17055_s1 + $0x1114] sm:$0xf]  ;;  %v9757_v57 = vor.u32 %v11708_v44, %v9756_v45  ;;  %v10086_v45 = vld [vmem:[%s17055_s1 + $0x1194] sm:$0xf0] }
 0x228   : > { %5124 = vmatpush.bf16.msrb.mxu0 %v9597_v60  ;;  %v10122_v60 = vld [vmem:[%s17055_s1 + $0x11dc] sm:$0xf0]  ;;  %v10029_v2 = vor.u32 %v11775_v8, %v10026_v56  ;;  %v11672_v8 = vld [vmem:[%s17055_s1 + $0xdd8] sm:$0xf0] }
 0x229   : > { %5137 = vmatpush.bf16.msrb.mxu1 %v9693_v63  ;;  %v11681_v63 = vld [vmem:[%s17055_s1 + $0xe20] sm:$0xf0]  ;;  %v10125_v4 = vor.u32 %v11799_v59, %v10122_v60  ;;  %v11763_v59 = vld [vmem:[%s17055_s1 + $0x10b4] sm:$0xf] }
 0x22a   : > { %5150 = vmatpush.bf16.msrb.mxu2 %v9789_v0  ;;  %v9744_v0 = vld [vmem:[%s17055_s1 + $0xed8] sm:$0xf] }
 0x22b   : > { %5163 = vmatpush.bf16.msrb.mxu3 %v9885_v6  ;;  %v9649_v6 = vor.u32 %v11681_v63, %v9648_v61  ;;  %v9745_v28 = vor.u32 %v11705_v1, %v9744_v0  ;;  %v11787_v61 = vld [vmem:[%s17055_s1 + $0x1174] sm:$0xf]  ;;  %v10074_v63 = vld [vmem:[%s17055_s1 + $0x117c] sm:$0xf0] }
 0x22c   : > { %5125 = vmatpush.bf16.msrb.mxu0 %v9585_v24  ;;  %v9732_v24 = vld [vmem:[%s17055_s1 + $0xec0] sm:$0xf] }
 0x22d   : > { %5138 = vmatpush.bf16.msrb.mxu1 %v9681_v30  ;;  %v10113_v30 = vor.u32 %v11796_v9, %v10110_v10  ;;  %v9733_v22 = vor.u32 %v11702_v16, %v9732_v24  ;;  %v9966_v16 = vld [vmem:[%s17055_s1 + $0x10a4] sm:$0xf0] }
 0x22e   : > { %5151 = vmatpush.bf16.msrb.mxu2 %v9777_v20  ;;  %v11769_v20 = vld [vmem:[%s17055_s1 + $0x10e4] sm:$0xf] }
 0x22f   : > { %5164 = vmatpush.bf16.msrb.mxu3 %v9873_v25  ;;  %v10098_v25 = vld [vmem:[%s17055_s1 + $0x11ac] sm:$0xf0]  ;;  %v10005_v58 = vor.u32 %v11769_v20, %v10002_v33 }
 0x230   : > { %5126 = vmatpush.bf16.msrb.mxu0 %v9573_v51  ;;  %v10101_v51 = vor.u32 %v11793_v34, %v10098_v25  ;;  %v3908_v26 = vpop.f32.mrf.mxu0  ;;  %v9588_v34 = vld [vmem:[%s17055_s1 + $0xda0] sm:$0xf]  ;;  %v11666_v25 = vld [vmem:[%s17055_s1 + $0xda8] sm:$0xf0] }
 0x231   : > { %5139 = vmatpush.bf16.msrb.mxu1 %v9669_v40  ;;  %v3921_v62 = vpop.f32.mrf.mxu1  ;;  %v9990_v40 = vld [vmem:[%s17055_s1 + $0x10d4] sm:$0xf0]  ;;  %v3909_v44 = vadd.f32 %v3908_v26, %v15455_v14  ;;  %v9576_v26 = vld [vmem:[%s17055_s1 + $0xd88] sm:$0xf] }
 0x232   : > { %5152 = vmatpush.bf16.msrb.mxu2 %v9765_v41  ;;  %v11790_v41 = vld [vmem:[%s17055_s1 + $0x118c] sm:$0xf] }
 0x233   : > { %5165 = vmatpush.bf16.msrb.mxu3 %v9861_v55  ;;  %5127 = vmatmul.bf16.vlgmr.msrb.gmra.mxu0 %v15109_v19  ;;  %v3922_v14 = vadd.f32 %v3921_v62, %v3909_v44  ;;  %v9993_v55 = vor.u32 %v11766_v31, %v9990_v40  ;;  %v10089_v56 = vor.u32 %v11790_v41, %v10086_v45  ;;  %v11663_v62 = vld [vmem:[%s17055_s1 + $0xd90] sm:$0xf0]  ;;  %v9852_v41 = vld [vmem:[%s17055_s1 + $0xfb0] sm:$0xf]  ;;  %v11732_v45 = vld [vmem:[%s17055_s1 + $0xfb8] sm:$0xf0] }
 0x234   : > { %5171 = vmatpush.bf16.msra.mxu0 %v10041_v48  ;;  %5140 = vmatmul.bf16.vlgmr.msrb.gmra.mxu1 %v15130_v38  ;;  %v9721_v48 = vor.u32 %v11699_v43, %v9720_v29  ;;  %v9969_v29 = vor.u32 %v11760_v12, %v9966_v16  ;;  %v9589_v31 = vor.u32 %v11666_v25, %v9588_v34  ;;  %v9948_v44 = vld [vmem:[%s17055_s1 + $0x1070] sm:$0xf]  ;;  %v10020_v34 = vld [vmem:[%s17055_s1 + $0x1100] sm:$0xf]  ;;  %v11774_v25 = vld [vmem:[%s17055_s1 + $0x1108] sm:$0xf0] }
 0x235   : > { %5184 = vmatpush.bf16.msra.mxu1 %v10137_v3  ;;  %5153 = vmatmul.bf16.vlgmr.msrb.gmra.mxu2 %v15315_v50  ;;  %v9612_v3 = vld [vmem:[%s17055_s1 + $0xdd0] sm:$0xf]  ;;  %v9685_v40 = vor.u32 %v11690_v27, %v9684_v23 }
 0x236   : > { %5197 = vmatpush.bf16.msra.mxu2 %v9661_v53  ;;  %5166 = vmatmul.bf16.vlgmr.msrb.gmra.mxu3 %v15317_v52  ;;  %v11696_v53 = vld [vmem:[%s17055_s1 + $0xe98] sm:$0xf0]  ;;  %v9613_v60 = vor.u32 %v11672_v8, %v9612_v3  ;;  %v10044_v8 = vld [vmem:[%s17055_s1 + $0x1130] sm:$0xf] }
 0x237   : > { %5210 = vmatpush.bf16.msra.mxu3 %v9757_v57  ;;  %v9978_v57 = vld [vmem:[%s17055_s1 + $0x10bc] sm:$0xf0]  ;;  %v9709_v1 = vor.u32 %v11696_v53, %v9708_v15  ;;  %v11756_v3 = vld [vmem:[%s17055_s1 + $0x1078] sm:$0xf0] }
 0x238   : > { %5172 = vmatpush.bf16.msra.mxu0 %v10029_v2  ;;  %v3934_v0 = vpop.f32.mrf.mxu2  ;;  %v9600_v2 = vld [vmem:[%s17055_s1 + $0xdb8] sm:$0xf]  ;;  %v9981_v10 = vor.u32 %v11763_v59, %v9978_v57  ;;  %v3910_v20 = vpop.f32.mrf.mxu0  ;;  %v11780_v15 = vld [vmem:[%s17055_s1 + $0x1138] sm:$0xf0]  ;;  %v9853_v57 = vor.u32 %v11732_v45, %v9852_v41  ;;  %v10104_v45 = vld [vmem:[%s17055_s1 + $0x11a8] sm:$0xf] }
 0x239   : > { %5185 = vmatpush.bf16.msra.mxu1 %v10125_v4  ;;  %v11669_v4 = vld [vmem:[%s17055_s1 + $0xdc0] sm:$0xf0]  ;;  %v3935_v5 = vadd.f32 %v3934_v0, %v3922_v14  ;;  %v3947_v9 = vpop.f32.mrf.mxu3  ;;  %v9949_v0 = vor.u32 %v11756_v3, %v9948_v44  ;;  %v11726_v20 = vld [vmem:[%s17055_s1 + $0xf88] sm:$0xf0]  ;;  %v11795_v44 = vld [vmem:[%s17055_s1 + $0x11b0] sm:$0xf0] }
 0x23a   : > { %5198 = vmatpush.bf16.msra.mxu2 %v9649_v6  ;;  %v9696_v6 = vld [vmem:[%s17055_s1 + $0xe78] sm:$0xf]  ;;  %v9601_v24 = vor.u32 %v11669_v4, %v9600_v2  ;;  %v11729_v4 = vld [vmem:[%s17055_s1 + $0xfa0] sm:$0xf0] }
 0x23b   : > { %5211 = vmatpush.bf16.msra.mxu3 %v9745_v28  ;;  %v10077_v28 = vor.u32 %v11787_v61, %v10074_v63  ;;  %v3948_v13 = vadd.f32 %v3947_v9, %v3935_v5  ;;  %v9697_v33 = vor.u32 %v11693_v7, %v9696_v6  ;;  %v10140_v61 = vld [vmem:[%s17055_s1 + $0x11f0] sm:$0xf]  ;;  %v11804_v63 = vld [vmem:[%s17055_s1 + $0x11f8] sm:$0xf0]  ;;  %v9840_v2 = vld [vmem:[%s17055_s1 + $0xf98] sm:$0xf] }
 0x23c   : > { %5173 = vmatpush.bf16.msra.mxu0 %v10017_v17  ;;  %v11784_v17 = vld [vmem:[%s17055_s1 + $0x115c] sm:$0xf]  ;;  %v9936_v5 = vld [vmem:[%s17055_s1 + $0x1058] sm:$0xf]  ;;  %v11753_v7 = vld [vmem:[%s17055_s1 + $0x1060] sm:$0xf0]  ;;  %v9841_v12 = vor.u32 %v11729_v4, %v9840_v2 }
 0x23d   : > { %5186 = vmatpush.bf16.msra.mxu1 %v10113_v30  ;;  %v10062_v30 = vld [vmem:[%s17055_s1 + $0x1164] sm:$0xf0]  ;;  %v10032_v9 = vld [vmem:[%s17055_s1 + $0x1118] sm:$0xf]  ;;  %v9937_v16 = vor.u32 %v11753_v7, %v9936_v5  ;;  %v11717_v5 = vld [vmem:[%s17055_s1 + $0xf40] sm:$0xf0] }
 0x23e   : > { %5199 = vmatpush.bf16.msra.mxu2 %v9637_v18  ;;  %v3923_v18 = vpop.f32.mrf.mxu1  ;;  %v10065_v43 = vor.u32 %v11784_v17, %v10062_v30  ;;  %v9828_v30 = vld [vmem:[%s17055_s1 + $0xf80] sm:$0xf]  ;;  %v9792_v4 = vld [vmem:[%s17055_s1 + $0xf38] sm:$0xf]  ;;  %v11741_v7 = vld [vmem:[%s17055_s1 + $0x1000] sm:$0xf0] }
 0x23f   : > { %5212 = vmatpush.bf16.msra.mxu3 %v9733_v22  ;;  %v15649_v22 = vadd.f32 %v3948_v13, %v14775_v21  ;;  %v9954_v21 = vld [vmem:[%s17055_s1 + $0x108c] sm:$0xf0]  ;;  %v10128_v13 = vld [vmem:[%s17055_s1 + $0x11d8] sm:$0xf]  ;;  %v9924_v18 = vld [vmem:[%s17055_s1 + $0x1040] sm:$0xf]  ;;  %v9829_v27 = vor.u32 %v11726_v20, %v9828_v30 }
 0x240   : > { %5174 = vmatpush.bf16.msra.mxu0 %v10005_v58  ;;  %v11757_v58 = vld [vmem:[%s17055_s1 + $0x1084] sm:$0xf]  ;;  %v9780_v20 = vld [vmem:[%s17055_s1 + $0xf20] sm:$0xf] }
 0x241   : > { %5187 = vmatpush.bf16.msra.mxu1 %v10101_v51  ;;  %v11781_v51 = vld [vmem:[%s17055_s1 + $0x1144] sm:$0xf]  ;;  %v9957_v53 = vor.u32 %v11757_v58, %v9954_v21  ;;  %v3949_v59 = vpop.f32.mrf.mxu3  ;;  %v10021_v21 = vor.u32 %v11774_v25, %v10020_v34 }
 0x242   : > { %5200 = vmatpush.bf16.msra.mxu2 %v9625_v32  ;;  %v10050_v32 = vld [vmem:[%s17055_s1 + $0x114c] sm:$0xf0] }
 0x243   : > { %5213 = vmatpush.bf16.msra.mxu3 %v9721_v48  ;;  %v3936_v48 = vpop.f32.mrf.mxu2  ;;  %v10053_v14 = vor.u32 %v11781_v51, %v10050_v32  ;;  %v9816_v51 = vld [vmem:[%s17055_s1 + $0xf68] sm:$0xf] }
 0x244   : > { %5175 = vmatpush.bf16.msra.mxu0 %v9993_v55  ;;  %v9672_v55 = vld [vmem:[%s17055_s1 + $0xe48] sm:$0xf] }
 0x245   : > { %5188 = vmatpush.bf16.msra.mxu1 %v10089_v56  ;;  %v11687_v56 = vld [vmem:[%s17055_s1 + $0xe50] sm:$0xf0]  ;;  %v9912_v32 = vld [vmem:[%s17055_s1 + $0x1028] sm:$0xf] }
 0x246   : > { %5201 = vmatpush.bf16.msra.mxu2 %v9613_v60  ;;  %v9577_v60 = vor.u32 %v11663_v62, %v9576_v26  ;;  %v9673_v6 = vor.u32 %v11687_v56, %v9672_v55  ;;  %v10008_v26 = vld [vmem:[%s17055_s1 + $0x10e8] sm:$0xf]  ;;  %v11771_v62 = vld [vmem:[%s17055_s1 + $0x10f0] sm:$0xf0]  ;;  %v9996_v55 = vld [vmem:[%s17055_s1 + $0x10d0] sm:$0xf] }
 0x247   : > { %5214 = vmatpush.bf16.msra.mxu3 %v9709_v1  ;;  %v10045_v1 = vor.u32 %v11780_v15, %v10044_v8  ;;  %v10009_v3 = vor.u32 %v11771_v62, %v10008_v26  ;;  %v11720_v8 = vld [vmem:[%s17055_s1 + $0xf58] sm:$0xf0]  ;;  %v9900_v15 = vld [vmem:[%s17055_s1 + $0x1010] sm:$0xf]  ;;  %v9768_v26 = vld [vmem:[%s17055_s1 + $0xf08] sm:$0xf] }
 0x248   : > { %5176 = vmatpush.bf16.msra.mxu0 %v9981_v10  ;;  %v11777_v10 = vld [vmem:[%s17055_s1 + $0x1120] sm:$0xf0]  ;;  %v11768_v56 = vld [vmem:[%s17055_s1 + $0x10d8] sm:$0xf0]  ;;  %v11711_v62 = vld [vmem:[%s17055_s1 + $0xf10] sm:$0xf0] }
 0x249   : > { %5189 = vmatpush.bf16.msra.mxu1 %v10077_v28  ;;  %v10141_v28 = vor.u32 %v11804_v63, %v10140_v61  ;;  %v10033_v17 = vor.u32 %v11777_v10, %v10032_v9  ;;  %v10092_v63 = vld [vmem:[%s17055_s1 + $0x1190] sm:$0xf]  ;;  %v9997_v2 = vor.u32 %v11768_v56, %v9996_v55  ;;  %v9984_v9 = vld [vmem:[%s17055_s1 + $0x10b8] sm:$0xf]  ;;  %v11765_v10 = vld [vmem:[%s17055_s1 + $0x10c0] sm:$0xf0]  ;;  %v9769_v56 = vor.u32 %v11711_v62, %v9768_v26 }
 0x24a   : > { %5202 = vmatpush.bf16.msra.mxu2 %v9601_v24  ;;  %v11801_v24 = vld [vmem:[%s17055_s1 + $0x11e0] sm:$0xf0]  ;;  %v9985_v30 = vor.u32 %v11765_v10, %v9984_v9  ;;  %v10612_v55 = vld [vmem:[%s17055_s1 + $0x1428] sm:$0xf]  ;;  %v10408_v10 = vld [vmem:[%s17055_s1 + $0x1290] sm:$0xf] }
 0x24b   : > { %5215 = vmatpush.bf16.msra.mxu3 %v9697_v33  ;;  %v11750_v33 = vld [vmem:[%s17055_s1 + $0x1048] sm:$0xf0]  ;;  %v10129_v23 = vor.u32 %v11801_v24, %v10128_v13  ;;  %v10080_v13 = vld [vmem:[%s17055_s1 + $0x1178] sm:$0xf]  ;;  %v11789_v24 = vld [vmem:[%s17055_s1 + $0x1180] sm:$0xf0] }
 0x24c   : > { %5177 = vmatpush.bf16.msra.mxu0 %v9969_v29  ;;  %v10116_v29 = vld [vmem:[%s17055_s1 + $0x11c0] sm:$0xf]  ;;  %v9925_v58 = vor.u32 %v11750_v33, %v9924_v18  ;;  %v11714_v18 = vld [vmem:[%s17055_s1 + $0xf28] sm:$0xf0] }
 0x24d   : > { %5190 = vmatpush.bf16.msra.mxu1 %v10065_v43  ;;  %v11798_v43 = vld [vmem:[%s17055_s1 + $0x11c8] sm:$0xf0]  ;;  %v9876_v33 = vld [vmem:[%s17055_s1 + $0xfe0] sm:$0xf] }
 0x24e   : > { %5203 = vmatpush.bf16.msra.mxu2 %v9589_v31  ;;  %v11723_v31 = vld [vmem:[%s17055_s1 + $0xf70] sm:$0xf0]  ;;  %v10480_v62 = vld [vmem:[%s17055_s1 + $0x1320] sm:$0xf] }
 0x24f   : > { %5216 = vmatpush.bf16.msra.mxu3 %v9685_v40  ;;  %v10117_v40 = vor.u32 %v11798_v43, %v10116_v29  ;;  %v9817_v41 = vor.u32 %v11723_v31, %v9816_v51  ;;  %v11762_v29 = vld [vmem:[%s17055_s1 + $0x10a8] sm:$0xf0]  ;;  %v10068_v51 = vld [vmem:[%s17055_s1 + $0x1160] sm:$0xf] }
 0x250   : > { %5178 = vmatpush.bf16.msra.mxu0 %v9957_v53  ;;  %v3960_v53 = vpop.f32.mrf.mxu0 }
 0x251   : > { %5191 = vmatpush.bf16.msra.mxu1 %v10053_v14  ;;  %v11744_v14 = vld [vmem:[%s17055_s1 + $0x1018] sm:$0xf0]  ;;  %v3973_v59 = vpop.f32.mrf.mxu1 }
 0x252   : > { %5204 = vmatpush.bf16.msra.mxu2 %v9577_v60  ;;  %v10105_v60 = vor.u32 %v11795_v44, %v10104_v45  ;;  %v9864_v45 = vld [vmem:[%s17055_s1 + $0xfc8] sm:$0xf]  ;;  %v11735_v44 = vld [vmem:[%s17055_s1 + $0xfd0] sm:$0xf0] }
 0x253   : > { %5217 = vmatpush.bf16.msra.mxu3 %v9673_v6  ;;  %5179 = vmatmul.bf16.vlgmr.msra.gmra.mxu0 %v15304_v42  ;;  %v9888_v6 = vld [vmem:[%s17055_s1 + $0xff8] sm:$0xf] }
 0x254   : > { %5223 = vmatpush.bf16.msrb.mxu0 %v9853_v57  ;;  %5192 = vmatmul.bf16.vlgmr.msra.gmra.mxu1 %v15325_v54  ;;  %v3974_v57 = vadd.f32 %v3973_v59, %v3960_v53  ;;  %v10516_v53 = vld [vmem:[%s17055_s1 + $0x1368] sm:$0xf]  ;;  %v11875_v59 = vld [vmem:[%s17055_s1 + $0x1430] sm:$0xf0] }
 0x255   : > { %5236 = vmatpush.bf16.msrb.mxu1 %v9949_v0  ;;  %5205 = vmatmul.bf16.vlgmr.msra.gmra.mxu2 %v15109_v19  ;;  %v11747_v19 = vld [vmem:[%s17055_s1 + $0x1030] sm:$0xf0]  ;;  %v11792_v0 = vld [vmem:[%s17055_s1 + $0x1198] sm:$0xf0] }
 0x256   : > { %5249 = vmatpush.bf16.msrb.mxu2 %v10045_v1  ;;  %5218 = vmatmul.bf16.vlgmr.msra.gmra.mxu3 %v15130_v38  ;;  %v9913_v48 = vor.u32 %v11747_v19, %v9912_v32  ;;  %v9804_v38 = vld [vmem:[%s17055_s1 + $0xf50] sm:$0xf]  ;;  %v9901_v1 = vor.u32 %v11744_v14, %v9900_v15  ;;  %v9781_v32 = vor.u32 %v11714_v18, %v9780_v20  ;;  %v11786_v19 = vld [vmem:[%s17055_s1 + $0x1168] sm:$0xf0]  ;;  %v11851_v14 = vld [vmem:[%s17055_s1 + $0x1370] sm:$0xf0] }
 0x257   : > { %5262 = vmatpush.bf16.msrb.mxu3 %v10141_v28  ;;  %v9805_v61 = vor.u32 %v11720_v8, %v9804_v38  ;;  %v10093_v28 = vor.u32 %v11792_v0, %v10092_v63  ;;  %v10420_v38 = vld [vmem:[%s17055_s1 + $0x12a8] sm:$0xf]  ;;  %v11827_v8 = vld [vmem:[%s17055_s1 + $0x12b0] sm:$0xf0]  ;;  %v10069_v15 = vor.u32 %v11786_v19, %v10068_v51  ;;  %v9865_v63 = vor.u32 %v11735_v44, %v9864_v45  ;;  %v11896_v20 = vld [vmem:[%s17055_s1 + $0x14d8] sm:$0xf0] }
 0x258   : > { %5224 = vmatpush.bf16.msrb.mxu0 %v9841_v12  ;;  %v9793_v12 = vor.u32 %v11717_v5, %v9792_v4  ;;  %v3962_v34 = vpop.f32.mrf.mxu0  ;;  %v10421_v4 = vor.u32 %v11827_v8, %v10420_v38  ;;  %v10517_v5 = vor.u32 %v11851_v14, %v10516_v53  ;;  %v11893_v51 = vld [vmem:[%s17055_s1 + $0x14c0] sm:$0xf0]  ;;  %v11866_v45 = vld [vmem:[%s17055_s1 + $0x13e8] sm:$0xf0]  ;;  %v10672_v44 = vld [vmem:[%s17055_s1 + $0x14a0] sm:$0xf] }
 0x259   : > { %5237 = vmatpush.bf16.msrb.mxu1 %v9937_v16  ;;  %v3986_v16 = vpop.f32.mrf.mxu2  ;;  %v3975_v43 = vpop.f32.mrf.mxu1 }
 0x25a   : > { %5250 = vmatpush.bf16.msrb.mxu2 %v10033_v17  ;;  %v9889_v17 = vor.u32 %v11741_v7, %v9888_v6  ;;  %v3987_v25 = vadd.f32 %v3986_v16, %v3974_v57  ;;  %v11783_v57 = vld [vmem:[%s17055_s1 + $0x1150] sm:$0xf0]  ;;  %v10613_v7 = vor.u32 %v11875_v59, %v10612_v55  ;;  %v10600_v16 = vld [vmem:[%s17055_s1 + $0x1410] sm:$0xf]  ;;  %v11845_v43 = vld [vmem:[%s17055_s1 + $0x1340] sm:$0xf0] }
 0x25b   : > { %5263 = vmatpush.bf16.msrb.mxu3 %v10129_v23  ;;  %v11738_v23 = vld [vmem:[%s17055_s1 + $0xfe8] sm:$0xf0]  ;;  %v10372_v55 = vld [vmem:[%s17055_s1 + $0x1248] sm:$0xf] }
 0x25c   : > { %5225 = vmatpush.bf16.msrb.mxu0 %v9829_v27  ;;  %v9972_v27 = vld [vmem:[%s17055_s1 + $0x10a0] sm:$0xf]  ;;  %v10468_v59 = vld [vmem:[%s17055_s1 + $0x1308] sm:$0xf] }
 0x25d   : > { %5238 = vmatpush.bf16.msrb.mxu1 %v9925_v58  ;;  %v3999_v58 = vpop.f32.mrf.mxu3 }
 0x25e   : > { %5251 = vmatpush.bf16.msrb.mxu2 %v10021_v21  ;;  %v10081_v21 = vor.u32 %v11789_v24, %v10080_v13  ;;  %v15850_v31 = vadd.f32 %v3999_v58, %v3987_v25  ;;  %v11848_v24 = vld [vmem:[%s17055_s1 + $0x1358] sm:$0xf0]  ;;  %v10396_v25 = vld [vmem:[%s17055_s1 + $0x1278] sm:$0xf] }
 0x25f   : > { %5264 = vmatpush.bf16.msrb.mxu3 %v10117_v40  ;;  %v9877_v40 = vor.u32 %v11738_v23, %v9876_v33  ;;  %v11821_v23 = vld [vmem:[%s17055_s1 + $0x1280] sm:$0xf0]  ;;  %v10588_v58 = vld [vmem:[%s17055_s1 + $0x13f8] sm:$0xf] }
 0x260   : > { %5226 = vmatpush.bf16.msrb.mxu0 %v9817_v41  ;;  %v9973_v41 = vor.u32 %v11762_v29, %v9972_v27  ;;  %v10492_v27 = vld [vmem:[%s17055_s1 + $0x1338] sm:$0xf] }
 0x261   : > { %5239 = vmatpush.bf16.msrb.mxu1 %v9913_v48  ;;  %v9960_v48 = vld [vmem:[%s17055_s1 + $0x1088] sm:$0xf]  ;;  %v10493_v19 = vor.u32 %v11845_v43, %v10492_v27  ;;  %v11833_v43 = vld [vmem:[%s17055_s1 + $0x12e0] sm:$0xf0] }
 0x262   : > { %5252 = vmatpush.bf16.msrb.mxu2 %v10009_v3  ;;  %v11759_v3 = vld [vmem:[%s17055_s1 + $0x1090] sm:$0xf0] }
 0x263   : > { %5265 = vmatpush.bf16.msrb.mxu3 %v10105_v60  ;;  %v10056_v60 = vld [vmem:[%s17055_s1 + $0x1148] sm:$0xf]  ;;  %v9961_v0 = vor.u32 %v11759_v3, %v9960_v48  ;;  %v11890_v48 = vld [vmem:[%s17055_s1 + $0x14a8] sm:$0xf0] }
 0x264   : > { %5227 = vmatpush.bf16.msrb.mxu0 %v9805_v61  ;;  %v3988_v61 = vpop.f32.mrf.mxu2  ;;  %v10057_v9 = vor.u32 %v11783_v57, %v10056_v60  ;;  %v10673_v60 = vor.u32 %v11890_v48, %v10672_v44  ;;  %v10564_v57 = vld [vmem:[%s17055_s1 + $0x13c8] sm:$0xf]  ;;  %v11854_v48 = vld [vmem:[%s17055_s1 + $0x1388] sm:$0xf0] }
 0x265   : > { %5240 = vmatpush.bf16.msrb.mxu1 %v9901_v1  ;;  %v10708_v1 = vld [vmem:[%s17055_s1 + $0x14e8] sm:$0xf]  ;;  %v4001_v6 = vpop.f32.mrf.mxu3  ;;  %v11863_v61 = vld [vmem:[%s17055_s1 + $0x13d0] sm:$0xf0] }
 0x266   : > { %5253 = vmatpush.bf16.msrb.mxu2 %v9997_v2  ;;  %v11899_v2 = vld [vmem:[%s17055_s1 + $0x14f0] sm:$0xf0]  ;;  %v10565_v6 = vor.u32 %v11863_v61, %v10564_v57  ;;  %v11850_v61 = vld [vmem:[%s17055_s1 + $0x136c] sm:$0xf] }
 0x267   : > { %5266 = vmatpush.bf16.msrb.mxu3 %v10093_v28  ;;  %v11824_v28 = vld [vmem:[%s17055_s1 + $0x1298] sm:$0xf0]  ;;  %v10709_v13 = vor.u32 %v11899_v2, %v10708_v1  ;;  %v11887_v1 = vld [vmem:[%s17055_s1 + $0x1490] sm:$0xf0] }
 0x268   : > { %5228 = vmatpush.bf16.msrb.mxu0 %v9793_v12  ;;  %v10504_v12 = vld [vmem:[%s17055_s1 + $0x1350] sm:$0xf]  ;;  %v10409_v18 = vor.u32 %v11824_v28, %v10408_v10 }
 0x269   : > { %5241 = vmatpush.bf16.msrb.mxu1 %v9889_v17  ;;  %v11872_v17 = vld [vmem:[%s17055_s1 + $0x1418] sm:$0xf0]  ;;  %v10505_v33 = vor.u32 %v11848_v24, %v10504_v12  ;;  %v10456_v10 = vld [vmem:[%s17055_s1 + $0x12f0] sm:$0xf] }
 0x26a   : > { %5254 = vmatpush.bf16.msrb.mxu2 %v9985_v30  ;;  %v10696_v30 = vld [vmem:[%s17055_s1 + $0x14d0] sm:$0xf]  ;;  %v10601_v34 = vor.u32 %v11872_v17, %v10600_v16  ;;  %v11884_v16 = vld [vmem:[%s17055_s1 + $0x1478] sm:$0xf0] }
 0x26b   : > { %5267 = vmatpush.bf16.msrb.mxu3 %v10081_v21  ;;  %v10697_v29 = vor.u32 %v11896_v20, %v10696_v30  ;;  %v11869_v21 = vld [vmem:[%s17055_s1 + $0x1400] sm:$0xf0]  ;;  %v10552_v12 = vld [vmem:[%s17055_s1 + $0x13b0] sm:$0xf] }
 0x26c   : > { %5229 = vmatpush.bf16.msrb.mxu0 %v9781_v32  ;;  %v10397_v32 = vor.u32 %v11821_v23, %v10396_v25  ;;  %v10589_v26 = vor.u32 %v11869_v21, %v10588_v58  ;;  %v10648_v24 = vld [vmem:[%s17055_s1 + $0x1470] sm:$0xf]  ;;  %v11809_v25 = vld [vmem:[%s17055_s1 + $0x1220] sm:$0xf0]  ;;  %v10444_v23 = vld [vmem:[%s17055_s1 + $0x12d8] sm:$0xf] }
 0x26d   : > { %5242 = vmatpush.bf16.msrb.mxu1 %v9877_v40  ;;  %v11842_v40 = vld [vmem:[%s17055_s1 + $0x1328] sm:$0xf0]  ;;  %v10540_v58 = vld [vmem:[%s17055_s1 + $0x1398] sm:$0xf]  ;;  %v11857_v21 = vld [vmem:[%s17055_s1 + $0x13a0] sm:$0xf0] }
 0x26e   : > { %5255 = vmatpush.bf16.msrb.mxu2 %v9973_v41  ;;  %v10576_v41 = vld [vmem:[%s17055_s1 + $0x13e0] sm:$0xf] }
 0x26f   : > { %5268 = vmatpush.bf16.msrb.mxu3 %v10069_v15  ;;  %v10481_v15 = vor.u32 %v11842_v40, %v10480_v62  ;;  %v10577_v53 = vor.u32 %v11866_v45, %v10576_v41  ;;  %v10445_v62 = vor.u32 %v11833_v43, %v10444_v23  ;;  %v10432_v40 = vld [vmem:[%s17055_s1 + $0x12c0] sm:$0xf]  ;;  %v11830_v41 = vld [vmem:[%s17055_s1 + $0x12c8] sm:$0xf0]  ;;  %v16151_v23 = vrot.slane %v13473_v46, 1 }
 0x270   : > { %5230 = vmatpush.bf16.msrb.mxu0 %v9769_v56  ;;  %v4012_v3 = vpop.f32.mrf.mxu0  ;;  %v11815_v56 = vld [vmem:[%s17055_s1 + $0x1250] sm:$0xf0]  ;;  %v10528_v45 = vld [vmem:[%s17055_s1 + $0x1380] sm:$0xf]  ;;  %v10398_v43 = vld [vmem:[%s17055_s1 + $0x1284] sm:$0xf0] }
 0x271   : > { %5243 = vmatpush.bf16.msrb.mxu1 %v9865_v63  ;;  %v4013_v8 = vadd.f32 %v4012_v3, %v15850_v31  ;;  %v4025_v14 = vpop.f32.mrf.mxu1  ;;  %v11839_v31 = vld [vmem:[%s17055_s1 + $0x1310] sm:$0xf0]  ;;  %v10373_v2 = vor.u32 %v11815_v56, %v10372_v55  ;;  %v10804_v3 = vld [vmem:[%s17055_s1 + $0x15a8] sm:$0xf]  ;;  %v10422_v55 = vld [vmem:[%s17055_s1 + $0x12b4] sm:$0xf0]  ;;  %v10529_v57 = vor.u32 %v11854_v48, %v10528_v45 }
 0x272   : > { %5256 = vmatpush.bf16.msrb.mxu2 %v9961_v0  ;;  %v10660_v0 = vld [vmem:[%s17055_s1 + $0x1488] sm:$0xf]  ;;  %v10624_v56 = vld [vmem:[%s17055_s1 + $0x1440] sm:$0xf]  ;;  %v10482_v45 = vld [vmem:[%s17055_s1 + $0x132c] sm:$0xf0] }
 0x273   : > { %5269 = vmatpush.bf16.msrb.mxu3 %v10057_v9  ;;  %5231 = vmatmul.bf16.vlgmr.msrb.gmra.mxu0 %v15315_v50  ;;  %v10384_v50 = vld [vmem:[%s17055_s1 + $0x1260] sm:$0xf]  ;;  %v4026_v63 = vadd.f32 %v4025_v14, %v4013_v8  ;;  %v11812_v9 = vld [vmem:[%s17055_s1 + $0x1238] sm:$0xf0]  ;;  %v10661_v28 = vor.u32 %v11887_v1, %v10660_v0  ;;  %v10900_v8 = vld [vmem:[%s17055_s1 + $0x1668] sm:$0xf] }
 0x274   : > { %6257 = vmatpush.bf16.msra.mxu0 %v10421_v4  ;;  %5244 = vmatmul.bf16.vlgmr.msrb.gmra.mxu1 %v15317_v52  ;;  %v11818_v52 = vld [vmem:[%s17055_s1 + $0x1268] sm:$0xf0]  ;;  %v10494_v46 = vld [vmem:[%s17055_s1 + $0x1344] sm:$0xf0] }
 0x275   : > { %6270 = vmatpush.bf16.msra.mxu1 %v10517_v5  ;;  %5257 = vmatmul.bf16.vlgmr.msrb.gmra.mxu2 %v15304_v42  ;;  %v10684_v42 = vld [vmem:[%s17055_s1 + $0x14b8] sm:$0xf]  ;;  %v10385_v38 = vor.u32 %v11818_v52, %v10384_v50  ;;  %v16005_v4 = vadd.f32 %v4026_v63, %v15010_v11  ;;  %v10469_v5 = vor.u32 %v11839_v31, %v10468_v59  ;;  %v11836_v11 = vld [vmem:[%s17055_s1 + $0x12f8] sm:$0xf0]  ;;  %v10336_v50 = vld [vmem:[%s17055_s1 + $0x1200] sm:$0xf] }
 0x276   : > { %6283 = vmatpush.bf16.msra.mxu2 %v10613_v7  ;;  %5270 = vmatmul.bf16.vlgmr.msrb.gmra.mxu3 %v15325_v54  ;;  %v10685_v54 = vor.u32 %v11893_v51, %v10684_v42  ;;  %v10360_v7 = vld [vmem:[%s17055_s1 + $0x1230] sm:$0xf]  ;;  %v10636_v51 = vld [vmem:[%s17055_s1 + $0x1458] sm:$0xf]  ;;  %v11806_v52 = vld [vmem:[%s17055_s1 + $0x1208] sm:$0xf0]  ;;  %v10433_v31 = vor.u32 %v11830_v41, %v10432_v40 }
 0x277   : > { %6296 = vmatpush.bf16.msra.mxu3 %v10709_v13  ;;  %v11860_v13 = vld [vmem:[%s17055_s1 + $0x13b8] sm:$0xf0]  ;;  %v10361_v17 = vor.u32 %v11812_v9, %v10360_v7  ;;  %v10337_v14 = vor.u32 %v11806_v52, %v10336_v50  ;;  %v11878_v59 = vld [vmem:[%s17055_s1 + $0x1448] sm:$0xf0]  ;;  %v10518_v63 = vld [vmem:[%s17055_s1 + $0x1374] sm:$0xf0] }
 0x278   : > { %6258 = vmatpush.bf16.msra.mxu0 %v10409_v18  ;;  %v5050_v30 = vpop.f32.mrf.mxu2  ;;  %v4014_v20 = vpop.f32.mrf.mxu0  ;;  %v10457_v18 = vor.u32 %v11836_v11, %v10456_v10  ;;  %v10625_v7 = vor.u32 %v11878_v59, %v10624_v56  ;;  %v11920_v9 = vld [vmem:[%s17055_s1 + $0x1598] sm:$0xf0]  ;;  %v10888_v10 = vld [vmem:[%s17055_s1 + $0x1650] sm:$0xf]  ;;  %v10521_v11 = vor.u32 %v11850_v61, %v10518_v63  ;;  %v10864_v50 = vld [vmem:[%s17055_s1 + $0x1620] sm:$0xf] }
 0x279   : > { %6271 = vmatpush.bf16.msra.mxu1 %v10505_v33  ;;  %v10553_v33 = vor.u32 %v11860_v13, %v10552_v12  ;;  %v4027_v27 = vpop.f32.mrf.mxu1  ;;  %v5063_v42 = vpop.f32.mrf.mxu3  ;;  %v11823_v12 = vld [vmem:[%s17055_s1 + $0x1294] sm:$0xf]  ;;  %v10410_v13 = vld [vmem:[%s17055_s1 + $0x129c] sm:$0xf0]  ;;  %v16136_v20 = vrot.slane %v13460_v35, 1 }
 0x27a   : > { %6284 = vmatpush.bf16.msra.mxu2 %v10601_v34  ;;  %v10348_v34 = vld [vmem:[%s17055_s1 + $0x1218] sm:$0xf]  ;;  %v11941_v35 = vld [vmem:[%s17055_s1 + $0x1640] sm:$0xf0]  ;;  %v11938_v52 = vld [vmem:[%s17055_s1 + $0x1628] sm:$0xf0] }
 0x27b   : > { %6297 = vmatpush.bf16.msra.mxu3 %v10697_v29  ;;  %v10649_v29 = vor.u32 %v11884_v16, %v10648_v24  ;;  %v16124_v24 = vrot.slane %v13256_v39, 1  ;;  %v11847_v16 = vld [vmem:[%s17055_s1 + $0x1354] sm:$0xf]  ;;  %v10386_v40 = vld [vmem:[%s17055_s1 + $0x126c] sm:$0xf0]  ;;  %v10865_v48 = vor.u32 %v11938_v52, %v10864_v50 }
 0x27c   : > { %6259 = vmatpush.bf16.msra.mxu0 %v10397_v32  ;;  %v11881_v32 = vld [vmem:[%s17055_s1 + $0x1460] sm:$0xf0]  ;;  %v10470_v61 = vld [vmem:[%s17055_s1 + $0x1314] sm:$0xf0]  ;;  %v10720_v52 = vld [vmem:[%s17055_s1 + $0x1500] sm:$0xf] }
 0x27d   : > { %6272 = vmatpush.bf16.msra.mxu1 %v10493_v19  ;;  %v16055_v19 = vadd.f32 %v5063_v42, %v5050_v30  ;;  %v10637_v44 = vor.u32 %v11881_v32, %v10636_v51  ;;  %v16133_v30 = vrot.slane %v13273_v49, 1  ;;  %v10876_v49 = vld [vmem:[%s17055_s1 + $0x1638] sm:$0xf]  ;;  %v10768_v51 = vld [vmem:[%s17055_s1 + $0x1560] sm:$0xf] }
 0x27e   : > { %6285 = vmatpush.bf16.msra.mxu2 %v10589_v26  ;;  %v10349_v26 = vor.u32 %v11809_v25, %v10348_v34  ;;  %v11917_v34 = vld [vmem:[%s17055_s1 + $0x1580] sm:$0xf0]  ;;  %v10413_v25 = vor.u32 %v11823_v12, %v10410_v13  ;;  %v10877_v42 = vor.u32 %v11941_v35, %v10876_v49  ;;  %v11835_v13 = vld [vmem:[%s17055_s1 + $0x12f4] sm:$0xf]  ;;  %v10828_v35 = vld [vmem:[%s17055_s1 + $0x15d8] sm:$0xf] }
 0x27f   : > { %6298 = vmatpush.bf16.msra.mxu3 %v10685_v54  ;;  %v10541_v54 = vor.u32 %v11857_v21, %v10540_v58  ;;  %v11844_v58 = vld [vmem:[%s17055_s1 + $0x133c] sm:$0xf]  ;;  %v11841_v41 = vld [vmem:[%s17055_s1 + $0x1324] sm:$0xf] }
 0x280   : > { %6260 = vmatpush.bf16.msra.mxu0 %v10385_v38  ;;  %v11923_v38 = vld [vmem:[%s17055_s1 + $0x15b0] sm:$0xf0]  ;;  %v10485_v59 = vor.u32 %v11841_v41, %v10482_v45  ;;  %v11905_v49 = vld [vmem:[%s17055_s1 + $0x1520] sm:$0xf0]  ;;  %v10338_v45 = vld [vmem:[%s17055_s1 + $0x120c] sm:$0xf0] }
 0x281   : > { %6273 = vmatpush.bf16.msra.mxu1 %v10481_v15  ;;  %v11947_v15 = vld [vmem:[%s17055_s1 + $0x1670] sm:$0xf0]  ;;  %v10805_v0 = vor.u32 %v11923_v38, %v10804_v3  ;;  %v10756_v3 = vld [vmem:[%s17055_s1 + $0x1548] sm:$0xf]  ;;  %v11805_v41 = vld [vmem:[%s17055_s1 + $0x1204] sm:$0xf] }
 0x282   : > { %6286 = vmatpush.bf16.msra.mxu2 %v10577_v53  ;;  %v11826_v53 = vld [vmem:[%s17055_s1 + $0x12ac] sm:$0xf]  ;;  %v10901_v1 = vor.u32 %v11947_v15, %v10900_v8 }
 0x283   : > { %6299 = vmatpush.bf16.msra.mxu3 %v10673_v60  ;;  %v5052_v60 = vpop.f32.mrf.mxu2 }
 0x284   : > { %6261 = vmatpush.bf16.msra.mxu0 %v10373_v2  ;;  %v10792_v2 = vld [vmem:[%s17055_s1 + $0x1590] sm:$0xf]  ;;  %v11814_v60 = vld [vmem:[%s17055_s1 + $0x124c] sm:$0xf] }
 0x285   : > { %6274 = vmatpush.bf16.msra.mxu1 %v10469_v5  ;;  %v5065_v5 = vpop.f32.mrf.mxu3  ;;  %v10793_v39 = vor.u32 %v11920_v9, %v10792_v2 }
 0x286   : > { %6287 = vmatpush.bf16.msra.mxu2 %v10565_v6  ;;  %v10425_v6 = vor.u32 %v11826_v53, %v10422_v55  ;;  %v11911_v53 = vld [vmem:[%s17055_s1 + $0x1550] sm:$0xf0]  ;;  %v11908_v5 = vld [vmem:[%s17055_s1 + $0x1538] sm:$0xf0] }
 0x287   : > { %6300 = vmatpush.bf16.msra.mxu3 %v10661_v28  ;;  %v11944_v28 = vld [vmem:[%s17055_s1 + $0x1658] sm:$0xf0]  ;;  %v11935_v55 = vld [vmem:[%s17055_s1 + $0x1610] sm:$0xf0]  ;;  %v10757_v63 = vor.u32 %v11911_v53, %v10756_v3  ;;  %v10614_v3 = vld [vmem:[%s17055_s1 + $0x1434] sm:$0xf0] }
 0x288   : > { %6262 = vmatpush.bf16.msra.mxu0 %v10361_v17  ;;  %v10506_v17 = vld [vmem:[%s17055_s1 + $0x135c] sm:$0xf0]  ;;  %v11922_v53 = vld [vmem:[%s17055_s1 + $0x15ac] sm:$0xf] }
 0x289   : > { %6275 = vmatpush.bf16.msra.mxu1 %v10457_v18  ;;  %v10889_v18 = vor.u32 %v11944_v28, %v10888_v10  ;;  %v10509_v27 = vor.u32 %v11847_v16, %v10506_v17  ;;  %v11811_v28 = vld [vmem:[%s17055_s1 + $0x1234] sm:$0xf]  ;;  %v10458_v16 = vld [vmem:[%s17055_s1 + $0x12fc] sm:$0xf0] }
 0x28a   : > { %6288 = vmatpush.bf16.msra.mxu2 %v10553_v33  ;;  %v10780_v33 = vld [vmem:[%s17055_s1 + $0x1578] sm:$0xf] }
 0x28b   : > { %6301 = vmatpush.bf16.msra.mxu3 %v10649_v29  ;;  %v11820_v29 = vld [vmem:[%s17055_s1 + $0x127c] sm:$0xf]  ;;  %v10781_v21 = vor.u32 %v11917_v34, %v10780_v33  ;;  %v10732_v33 = vld [vmem:[%s17055_s1 + $0x1518] sm:$0xf] }
 0x28c   : > { %6263 = vmatpush.bf16.msra.mxu0 %v10349_v26  ;;  %v10401_v32 = vor.u32 %v11820_v29, %v10398_v43  ;;  %v11914_v26 = vld [vmem:[%s17055_s1 + $0x1568] sm:$0xf0] }
 0x28d   : > { %6276 = vmatpush.bf16.msra.mxu1 %v10445_v62  ;;  %v10497_v62 = vor.u32 %v11844_v58, %v10494_v46  ;;  %v10461_v58 = vor.u32 %v11835_v13, %v10458_v16  ;;  %v11808_v46 = vld [vmem:[%s17055_s1 + $0x121c] sm:$0xf]  ;;  %v11943_v16 = vld [vmem:[%s17055_s1 + $0x1654] sm:$0xf] }
 0x28e   : > { %6289 = vmatpush.bf16.msra.mxu2 %v10541_v54  ;;  %v11817_v54 = vld [vmem:[%s17055_s1 + $0x1264] sm:$0xf] }
 0x28f   : > { %6302 = vmatpush.bf16.msra.mxu3 %v10637_v44  ;;  %v10769_v44 = vor.u32 %v11914_v26, %v10768_v51  ;;  %v10389_v38 = vor.u32 %v11817_v54, %v10386_v40  ;;  %v11832_v51 = vld [vmem:[%s17055_s1 + $0x12dc] sm:$0xf]  ;;  %v10733_v26 = vor.u32 %v11905_v49, %v10732_v33  ;;  %v11926_v40 = vld [vmem:[%s17055_s1 + $0x15c8] sm:$0xf0]  ;;  %v10590_v33 = vld [vmem:[%s17055_s1 + $0x1404] sm:$0xf0] }
 0x290   : > { %6264 = vmatpush.bf16.msra.mxu0 %v10337_v14  ;;  %v5076_v8 = vpop.f32.mrf.mxu0  ;;  %v10852_v14 = vld [vmem:[%s17055_s1 + $0x1608] sm:$0xf]  ;;  %v11916_v49 = vld [vmem:[%s17055_s1 + $0x157c] sm:$0xf] }
 0x291   : > { %6277 = vmatpush.bf16.msra.mxu1 %v10433_v31  ;;  %v5089_v15 = vpop.f32.mrf.mxu1  ;;  %v5077_v56 = vadd.f32 %v5076_v8, %v16055_v19  ;;  %v10374_v31 = vld [vmem:[%s17055_s1 + $0x1254] sm:$0xf0] }
 0x292   : > { %6290 = vmatpush.bf16.msra.mxu2 %v10529_v57  ;;  %v11838_v57 = vld [vmem:[%s17055_s1 + $0x130c] sm:$0xf]  ;;  %v10377_v2 = vor.u32 %v11814_v60, %v10374_v31  ;;  %v10434_v60 = vld [vmem:[%s17055_s1 + $0x12cc] sm:$0xf0] }
 0x293   : > { %6303 = vmatpush.bf16.msra.mxu3 %v10625_v7  ;;  %6265 = vmatmul.bf16.vlgmr.msra.gmra.mxu0 %v16124_v24  ;;  %v5090_v19 = vadd.f32 %v5089_v15, %v5077_v56  ;;  %v11932_v7 = vld [vmem:[%s17055_s1 + $0x15f8] sm:$0xf0]  ;;  %v10473_v10 = vor.u32 %v11838_v57, %v10470_v61  ;;  %v10710_v15 = vld [vmem:[%s17055_s1 + $0x14f4] sm:$0xf0]  ;;  %v10341_v57 = vor.u32 %v11805_v41, %v10338_v45  ;;  %v10866_v41 = vld [vmem:[%s17055_s1 + $0x162c] sm:$0xf0] }
 0x294   : > { %6309 = vmatpush.bf16.msrb.mxu0 %v10805_v0  ;;  %6278 = vmatmul.bf16.vlgmr.msra.gmra.mxu1 %v16133_v30  ;;  %v10853_v0 = vor.u32 %v11935_v55, %v10852_v14  ;;  %v10806_v14 = vld [vmem:[%s17055_s1 + $0x15b4] sm:$0xf0] }
 0x295   : > { %6322 = vmatpush.bf16.msrb.mxu1 %v10901_v1  ;;  %6291 = vmatmul.bf16.vlgmr.msra.gmra.mxu2 %v16136_v20  ;;  %v10744_v1 = vld [vmem:[%s17055_s1 + $0x1530] sm:$0xf] }
 0x296   : > { %6335 = vmatpush.bf16.msrb.mxu2 %v10425_v6  ;;  %6304 = vmatmul.bf16.vlgmr.msra.gmra.mxu3 %v16151_v23  ;;  %v10840_v6 = vld [vmem:[%s17055_s1 + $0x15f0] sm:$0xf] }
 0x297   : > { %6348 = vmatpush.bf16.msrb.mxu3 %v10521_v11  ;;  %v10362_v11 = vld [vmem:[%s17055_s1 + $0x123c] sm:$0xf0] }
 0x298   : > { %6310 = vmatpush.bf16.msrb.mxu0 %v10793_v39  ;;  %v5102_v9 = vpop.f32.mrf.mxu2  ;;  %v10745_v39 = vor.u32 %v11908_v5, %v10744_v1  ;;  %v5078_v29 = vpop.f32.mrf.mxu0  ;;  %v11871_v5 = vld [vmem:[%s17055_s1 + $0x1414] sm:$0xf] }
 0x299   : > { %6323 = vmatpush.bf16.msrb.mxu1 %v10889_v18  ;;  %v5103_v12 = vadd.f32 %v5102_v9, %v5090_v19  ;;  %v5115_v17 = vpop.f32.mrf.mxu3  ;;  %v10841_v18 = vor.u32 %v11932_v7, %v10840_v6  ;;  %v5091_v43 = vpop.f32.mrf.mxu1  ;;  %v16312_v19 = vrot.slane %v13462_v37, 1  ;;  %v10602_v37 = vld [vmem:[%s17055_s1 + $0x141c] sm:$0xf0]  ;;  %v11895_v6 = vld [vmem:[%s17055_s1 + $0x14d4] sm:$0xf] }
 0x29a   : > { %6336 = vmatpush.bf16.msrb.mxu2 %v10413_v25  ;;  %v10365_v25 = vor.u32 %v11811_v28, %v10362_v11  ;;  %v10698_v9 = vld [vmem:[%s17055_s1 + $0x14dc] sm:$0xf0]  ;;  %v10605_v13 = vor.u32 %v11871_v5, %v10602_v37  ;;  %v11940_v43 = vld [vmem:[%s17055_s1 + $0x163c] sm:$0xf]  ;;  %v11907_v37 = vld [vmem:[%s17055_s1 + $0x1534] sm:$0xf] }
 0x29b   : > { %6349 = vmatpush.bf16.msrb.mxu3 %v10509_v27  ;;  %v5116_v34 = vadd.f32 %v5115_v17, %v5103_v12  ;;  %v11929_v27 = vld [vmem:[%s17055_s1 + $0x15e0] sm:$0xf0]  ;;  %v10794_v28 = vld [vmem:[%s17055_s1 + $0x159c] sm:$0xf0]  ;;  %v16339_v12 = vrot.slane %v13475_v47, 1 }
 0x29c   : > { %6311 = vmatpush.bf16.msrb.mxu0 %v10781_v21  ;;  %v10350_v21 = vld [vmem:[%s17055_s1 + $0x1224] sm:$0xf0]  ;;  %v10829_v50 = vor.u32 %v11929_v27, %v10828_v35  ;;  %v10890_v17 = vld [vmem:[%s17055_s1 + $0x165c] sm:$0xf0]  ;;  %v11868_v47 = vld [vmem:[%s17055_s1 + $0x13fc] sm:$0xf] }
 0x29d   : > { %6324 = vmatpush.bf16.msrb.mxu1 %v10877_v42  ;;  %v16261_v42 = vadd.f32 %v5116_v34, %v15405_v36  ;;  %v11902_v36 = vld [vmem:[%s17055_s1 + $0x1508] sm:$0xf0]  ;;  %v10353_v54 = vor.u32 %v11808_v46, %v10350_v21  ;;  %v11892_v34 = vld [vmem:[%s17055_s1 + $0x14bc] sm:$0xf]  ;;  %v10782_v35 = vld [vmem:[%s17055_s1 + $0x1584] sm:$0xf0]  ;;  %v10893_v27 = vor.u32 %v11943_v16, %v10890_v17  ;;  %v10593_v29 = vor.u32 %v11868_v47, %v10590_v33 }
 0x29e   : > { %6337 = vmatpush.bf16.msrb.mxu2 %v10401_v32  ;;  %v10446_v32 = vld [vmem:[%s17055_s1 + $0x12e4] sm:$0xf0]  ;;  %v10721_v55 = vor.u32 %v11902_v36, %v10720_v52  ;;  %v10785_v21 = vor.u32 %v11916_v49, %v10782_v35  ;;  %v11913_v52 = vld [vmem:[%s17055_s1 + $0x1564] sm:$0xf]  ;;  %v10770_v36 = vld [vmem:[%s17055_s1 + $0x156c] sm:$0xf0] }
 0x29f   : > { %6350 = vmatpush.bf16.msrb.mxu3 %v10497_v62  ;;  %v10816_v62 = vld [vmem:[%s17055_s1 + $0x15c0] sm:$0xf]  ;;  %v11856_v17 = vld [vmem:[%s17055_s1 + $0x139c] sm:$0xf]  ;;  %v10734_v49 = vld [vmem:[%s17055_s1 + $0x1524] sm:$0xf0] }
 0x2a0   : > { %6312 = vmatpush.bf16.msrb.mxu0 %v10769_v44  ;;  %v10449_v44 = vor.u32 %v11832_v51, %v10446_v32  ;;  %v5104_v8 = vpop.f32.mrf.mxu2  ;;  %v10817_v56 = vor.u32 %v11926_v40, %v10816_v62  ;;  %v11865_v51 = vld [vmem:[%s17055_s1 + $0x13e4] sm:$0xf]  ;;  %v10578_v32 = vld [vmem:[%s17055_s1 + $0x13ec] sm:$0xf0]  ;;  %v10650_v5 = vld [vmem:[%s17055_s1 + $0x147c] sm:$0xf0] }
 0x2a1   : > { %6325 = vmatpush.bf16.msrb.mxu1 %v10865_v48  ;;  %v11874_v48 = vld [vmem:[%s17055_s1 + $0x142c] sm:$0xf]  ;;  %v5117_v31 = vpop.f32.mrf.mxu3  ;;  %v11937_v40 = vld [vmem:[%s17055_s1 + $0x1624] sm:$0xf] }
 0x2a2   : > { %6338 = vmatpush.bf16.msrb.mxu2 %v10389_v38  ;;  %v11898_v38 = vld [vmem:[%s17055_s1 + $0x14ec] sm:$0xf]  ;;  %v10617_v61 = vor.u32 %v11874_v48, %v10614_v3  ;;  %v10566_v3 = vld [vmem:[%s17055_s1 + $0x13d4] sm:$0xf0] }
 0x2a3   : > { %6351 = vmatpush.bf16.msrb.mxu3 %v10485_v59  ;;  %v11829_v59 = vld [vmem:[%s17055_s1 + $0x12c4] sm:$0xf]  ;;  %v10713_v1 = vor.u32 %v11898_v38, %v10710_v15  ;;  %v11862_v48 = vld [vmem:[%s17055_s1 + $0x13cc] sm:$0xf]  ;;  %v10662_v15 = vld [vmem:[%s17055_s1 + $0x1494] sm:$0xf0] }
 0x2a4   : > { %6313 = vmatpush.bf16.msrb.mxu0 %v10757_v63  ;;  %v11946_v63 = vld [vmem:[%s17055_s1 + $0x166c] sm:$0xf]  ;;  %v10437_v7 = vor.u32 %v11829_v59, %v10434_v60  ;;  %v10569_v60 = vor.u32 %v11862_v48, %v10566_v3  ;;  %v11852_v48 = vld [vmem:[%s17055_s1 + $0x1378] sm:$0xf0] }
 0x2a5   : > { %6326 = vmatpush.bf16.msrb.mxu1 %v10853_v0  ;;  %v10902_v0 = vld [vmem:[%s17055_s1 + $0x1674] sm:$0xf0]  ;;  %v11886_v38 = vld [vmem:[%s17055_s1 + $0x148c] sm:$0xf] }
 0x2a6   : > { %6339 = vmatpush.bf16.msrb.mxu2 %v10377_v2  ;;  %v10809_v2 = vor.u32 %v11922_v53, %v10806_v14  ;;  %v10905_v11 = vor.u32 %v11946_v63, %v10902_v0  ;;  %v11910_v53 = vld [vmem:[%s17055_s1 + $0x154c] sm:$0xf]  ;;  %v10758_v14 = vld [vmem:[%s17055_s1 + $0x1554] sm:$0xf0]  ;;  %v11859_v0 = vld [vmem:[%s17055_s1 + $0x13b4] sm:$0xf] }
 0x2a7   : > { %6352 = vmatpush.bf16.msrb.mxu3 %v10473_v10  ;;  %v11919_v10 = vld [vmem:[%s17055_s1 + $0x1594] sm:$0xf]  ;;  %v11934_v31 = vld [vmem:[%s17055_s1 + $0x160c] sm:$0xf]  ;;  %v10761_v63 = vor.u32 %v11910_v53, %v10758_v14 }
 0x2a8   : > { %6314 = vmatpush.bf16.msrb.mxu0 %v10745_v39  ;;  %v10701_v39 = vor.u32 %v11895_v6, %v10698_v9  ;;  %v10746_v6 = vld [vmem:[%s17055_s1 + $0x153c] sm:$0xf0] }
 0x2a9   : > { %6327 = vmatpush.bf16.msrb.mxu1 %v10841_v18  ;;  %v10797_v18 = vor.u32 %v11919_v10, %v10794_v28  ;;  %v11931_v10 = vld [vmem:[%s17055_s1 + $0x15f4] sm:$0xf]  ;;  %v10842_v28 = vld [vmem:[%s17055_s1 + $0x15fc] sm:$0xf0]  ;;  %v10749_v16 = vor.u32 %v11907_v37, %v10746_v6 }
 0x2aa   : > { %6340 = vmatpush.bf16.msrb.mxu2 %v10365_v25  ;;  %v10686_v25 = vld [vmem:[%s17055_s1 + $0x14c4] sm:$0xf0] }
 0x2ab   : > { %6353 = vmatpush.bf16.msrb.mxu3 %v10461_v58  ;;  %v10878_v58 = vld [vmem:[%s17055_s1 + $0x1644] sm:$0xf0]  ;;  %v10689_v46 = vor.u32 %v11892_v34, %v10686_v25  ;;  %v11904_v25 = vld [vmem:[%s17055_s1 + $0x151c] sm:$0xf] }
 0x2ac   : > { %6315 = vmatpush.bf16.msrb.mxu0 %v10733_v26  ;;  %v11889_v26 = vld [vmem:[%s17055_s1 + $0x14a4] sm:$0xf]  ;;  %v10881_v62 = vor.u32 %v11940_v43, %v10878_v58  ;;  %v10638_v34 = vld [vmem:[%s17055_s1 + $0x1464] sm:$0xf0] }
 0x2ad   : > { %6328 = vmatpush.bf16.msrb.mxu1 %v10829_v50  ;;  %v10674_v50 = vld [vmem:[%s17055_s1 + $0x14ac] sm:$0xf0] }
 0x2ae   : > { %6341 = vmatpush.bf16.msrb.mxu2 %v10353_v54  ;;  %v10581_v54 = vor.u32 %v11865_v51, %v10578_v32  ;;  %v10677_v45 = vor.u32 %v11889_v26, %v10674_v50  ;;  %v11853_v51 = vld [vmem:[%s17055_s1 + $0x1384] sm:$0xf]  ;;  %v10737_v26 = vor.u32 %v11904_v25, %v10734_v49  ;;  %v10530_v50 = vld [vmem:[%s17055_s1 + $0x138c] sm:$0xf0]  ;;  %v11870_v49 = vld [vmem:[%s17055_s1 + $0x1408] sm:$0xf0] }
 0x2af   : > { %6354 = vmatpush.bf16.msrb.mxu3 %v10449_v44  ;;  %v10773_v44 = vor.u32 %v11913_v52, %v10770_v36  ;;  %v11877_v52 = vld [vmem:[%s17055_s1 + $0x1444] sm:$0xf]  ;;  %v10626_v36 = vld [vmem:[%s17055_s1 + $0x144c] sm:$0xf0]  ;;  %v10533_v3 = vor.u32 %v11853_v51, %v10530_v50  ;;  %v11843_v51 = vld [vmem:[%s17055_s1 + $0x1330] sm:$0xf0] }
 0x2b0   : > { %6316 = vmatpush.bf16.msrb.mxu0 %v10721_v55  ;;  %v5128_v8 = vpop.f32.mrf.mxu0  ;;  %v10629_v53 = vor.u32 %v11877_v52, %v10626_v36  ;;  %v10584_v50 = vld [vmem:[%s17055_s1 + $0x13e8] sm:$0xf] }
 0x2b1   : > { %6329 = vmatpush.bf16.msrb.mxu1 %v10817_v56  ;;  %v5141_v55 = vpop.f32.mrf.mxu1  ;;  %v10869_v56 = vor.u32 %v11937_v40, %v10866_v41  ;;  %v10428_v40 = vld [vmem:[%s17055_s1 + $0x12b0] sm:$0xf] }
 0x2b2   : > { %6342 = vmatpush.bf16.msrb.mxu2 %v10341_v57  ;;  %v5142_v59 = vadd.f32 %v5141_v55, %v5128_v8  ;;  %v10854_v57 = vld [vmem:[%s17055_s1 + $0x1614] sm:$0xf0]  ;;  %v10818_v8 = vld [vmem:[%s17055_s1 + $0x15cc] sm:$0xf0] }
 0x2b3   : > { %6355 = vmatpush.bf16.msrb.mxu3 %v10437_v7  ;;  %6317 = vmatmul.bf16.vlgmr.msrb.gmra.mxu0 %v16312_v19  ;;  %v10857_v7 = vor.u32 %v11934_v31, %v10854_v57  ;;  %v10620_v55 = vld [vmem:[%s17055_s1 + $0x1430] sm:$0xf]  ;;  %v11900_v57 = vld [vmem:[%s17055_s1 + $0x14f8] sm:$0xf0] }
 0x2b4   : > { %6361 = vmatpush.bf16.msra.mxu0 %v10617_v61  ;;  %6330 = vmatmul.bf16.vlgmr.msrb.gmra.mxu1 %v16339_v12  ;;  %v10665_v61 = vor.u32 %v11886_v38, %v10662_v15  ;;  %v11925_v38 = vld [vmem:[%s17055_s1 + $0x15c4] sm:$0xf]  ;;  %v10716_v31 = vld [vmem:[%s17055_s1 + $0x14f0] sm:$0xf] }
 0x2b5   : > { %6374 = vmatpush.bf16.msra.mxu1 %v10713_v1  ;;  %6343 = vmatmul.bf16.vlgmr.msrb.gmra.mxu2 %v16124_v24  ;;  %v10554_v1 = vld [vmem:[%s17055_s1 + $0x13bc] sm:$0xf0]  ;;  %v10717_v6 = vor.u32 %v11900_v57, %v10716_v31 }
 0x2b6   : > { %6387 = vmatpush.bf16.msra.mxu2 %v10809_v2  ;;  %6356 = vmatmul.bf16.vlgmr.msrb.gmra.mxu3 %v16133_v30  ;;  %v11883_v2 = vld [vmem:[%s17055_s1 + $0x1474] sm:$0xf]  ;;  %v10557_v9 = vor.u32 %v11859_v0, %v10554_v1  ;;  %v10416_v0 = vld [vmem:[%s17055_s1 + $0x1298] sm:$0xf]  ;;  %v11825_v1 = vld [vmem:[%s17055_s1 + $0x12a0] sm:$0xf0] }
 0x2b7   : > { %6400 = vmatpush.bf16.msra.mxu3 %v10905_v11 }
 0x2b8   : > { %6362 = vmatpush.bf16.msra.mxu0 %v10605_v13  ;;  %v5154_v11 = vpop.f32.mrf.mxu2  ;;  %v10653_v13 = vor.u32 %v11883_v2, %v10650_v5  ;;  %v5130_v47 = vpop.f32.mrf.mxu0  ;;  %v10512_v2 = vld [vmem:[%s17055_s1 + $0x1358] sm:$0xf]  ;;  %v11849_v5 = vld [vmem:[%s17055_s1 + $0x1360] sm:$0xf0] }
 0x2b9   : > { %6375 = vmatpush.bf16.msra.mxu1 %v10701_v39  ;;  %v10542_v39 = vld [vmem:[%s17055_s1 + $0x13a4] sm:$0xf0]  ;;  %v5155_v33 = vadd.f32 %v5154_v11, %v5142_v59  ;;  %v5143_v35 = vpop.f32.mrf.mxu1  ;;  %v11897_v11 = vld [vmem:[%s17055_s1 + $0x14e0] sm:$0xf0] }
 0x2ba   : > { %6388 = vmatpush.bf16.msra.mxu2 %v10797_v18  ;;  %v11880_v18 = vld [vmem:[%s17055_s1 + $0x145c] sm:$0xf]  ;;  %v10545_v58 = vor.u32 %v11856_v17, %v10542_v39  ;;  %v11822_v17 = vld [vmem:[%s17055_s1 + $0x1288] sm:$0xf0]  ;;  %v10500_v39 = vld [vmem:[%s17055_s1 + $0x1340] sm:$0xf] }
 0x2bb   : > { %6401 = vmatpush.bf16.msra.mxu3 %v10893_v27  ;;  %v5167_v27 = vpop.f32.mrf.mxu3  ;;  %v10641_v32 = vor.u32 %v11880_v18, %v10638_v34  ;;  %v11846_v18 = vld [vmem:[%s17055_s1 + $0x1348] sm:$0xf0]  ;;  %v10596_v34 = vld [vmem:[%s17055_s1 + $0x1400] sm:$0xf] }
 0x2bc   : > { %6363 = vmatpush.bf16.msra.mxu0 %v10593_v29  ;;  %v10845_v29 = vor.u32 %v11931_v10, %v10842_v28  ;;  %v16465_v43 = vadd.f32 %v5167_v27, %v5155_v33  ;;  %v11873_v10 = vld [vmem:[%s17055_s1 + $0x1420] sm:$0xf0]  ;;  %v10704_v28 = vld [vmem:[%s17055_s1 + $0x14d8] sm:$0xf]  ;;  %v10692_v35 = vld [vmem:[%s17055_s1 + $0x14c0] sm:$0xf] }
 0x2bd   : > { %6376 = vmatpush.bf16.msra.mxu1 %v10689_v46  ;;  %v11928_v46 = vld [vmem:[%s17055_s1 + $0x15dc] sm:$0xf]  ;;  %v10705_v33 = vor.u32 %v11897_v11, %v10704_v28  ;;  %v11894_v27 = vld [vmem:[%s17055_s1 + $0x14c8] sm:$0xf0] }
 0x2be   : > { %6389 = vmatpush.bf16.msra.mxu2 %v10785_v21  ;;  %v10830_v21 = vld [vmem:[%s17055_s1 + $0x15e4] sm:$0xf0] }
 0x2bf   : > { %6402 = vmatpush.bf16.msra.mxu3 %v10881_v62  ;;  %v11901_v62 = vld [vmem:[%s17055_s1 + $0x1504] sm:$0xf]  ;;  %v10833_v41 = vor.u32 %v11928_v46, %v10830_v21  ;;  %v11819_v46 = vld [vmem:[%s17055_s1 + $0x1270] sm:$0xf0]  ;;  %v10488_v21 = vld [vmem:[%s17055_s1 + $0x1328] sm:$0xf] }
 0x2c0   : > { %6364 = vmatpush.bf16.msra.mxu0 %v10581_v54  ;;  %v10722_v54 = vld [vmem:[%s17055_s1 + $0x150c] sm:$0xf0]  ;;  %v5156_v15 = vpop.f32.mrf.mxu2 }
 0x2c1   : > { %6377 = vmatpush.bf16.msra.mxu1 %v10677_v45  ;;  %v11828_v45 = vld [vmem:[%s17055_s1 + $0x12b8] sm:$0xf0]  ;;  %v10725_v14 = vor.u32 %v11901_v62, %v10722_v54  ;;  %v11867_v62 = vld [vmem:[%s17055_s1 + $0x13f0] sm:$0xf0]  ;;  %v10680_v54 = vld [vmem:[%s17055_s1 + $0x14a8] sm:$0xf] }
 0x2c2   : > { %6390 = vmatpush.bf16.msra.mxu2 %v10773_v44  ;;  %v10524_v44 = vld [vmem:[%s17055_s1 + $0x1370] sm:$0xf] }
 0x2c3   : > { %6403 = vmatpush.bf16.msra.mxu3 %v10869_v56  ;;  %v10429_v56 = vor.u32 %v11828_v45, %v10428_v40  ;;  %v10525_v59 = vor.u32 %v11852_v48, %v10524_v44  ;;  %v11891_v40 = vld [vmem:[%s17055_s1 + $0x14b0] sm:$0xf0]  ;;  %v10489_v45 = vor.u32 %v11843_v51, %v10488_v21  ;;  %v10380_v48 = vld [vmem:[%s17055_s1 + $0x1250] sm:$0xf]  ;;  %v10344_v21 = vld [vmem:[%s17055_s1 + $0x1208] sm:$0xf] }
 0x2c4   : > { %6365 = vmatpush.bf16.msra.mxu0 %v10569_v60  ;;  %v11876_v60 = vld [vmem:[%s17055_s1 + $0x1438] sm:$0xf0]  ;;  %v11807_v51 = vld [vmem:[%s17055_s1 + $0x1210] sm:$0xf0] }
 0x2c5   : > { %6378 = vmatpush.bf16.msra.mxu1 %v10665_v61  ;;  %v5169_v61 = vpop.f32.mrf.mxu3  ;;  %v10621_v37 = vor.u32 %v11876_v60, %v10620_v55  ;;  %v11888_v60 = vld [vmem:[%s17055_s1 + $0x1498] sm:$0xf0] }
 0x2c6   : > { %6391 = vmatpush.bf16.msra.mxu2 %v10761_v63  ;;  %v10821_v63 = vor.u32 %v11925_v38, %v10818_v8  ;;  %v10476_v38 = vld [vmem:[%s17055_s1 + $0x1310] sm:$0xf]  ;;  %v11840_v8 = vld [vmem:[%s17055_s1 + $0x1318] sm:$0xf0]  ;;  %v10368_v61 = vld [vmem:[%s17055_s1 + $0x1238] sm:$0xf] }
 0x2c7   : > { %6404 = vmatpush.bf16.msra.mxu3 %v10857_v7  ;;  %v10608_v7 = vld [vmem:[%s17055_s1 + $0x1418] sm:$0xf]  ;;  %v10477_v57 = vor.u32 %v11840_v8, %v10476_v38  ;;  %v10632_v8 = vld [vmem:[%s17055_s1 + $0x1448] sm:$0xf] }
 0x2c8   : > { %6366 = vmatpush.bf16.msra.mxu0 %v10557_v9  ;;  %v10417_v9 = vor.u32 %v11825_v1, %v10416_v0  ;;  %v10609_v47 = vor.u32 %v11873_v10, %v10608_v7  ;;  %v10464_v0 = vld [vmem:[%s17055_s1 + $0x12f8] sm:$0xf]  ;;  %v11837_v1 = vld [vmem:[%s17055_s1 + $0x1300] sm:$0xf0] }
 0x2c9   : > { %6379 = vmatpush.bf16.msra.mxu1 %v10653_v13  ;;  %v10513_v13 = vor.u32 %v11849_v5, %v10512_v2  ;;  %v10560_v5 = vld [vmem:[%s17055_s1 + $0x13b8] sm:$0xf]  ;;  %v11885_v10 = vld [vmem:[%s17055_s1 + $0x1480] sm:$0xf0]  ;;  %v10465_v11 = vor.u32 %v11837_v1, %v10464_v0  ;;  %v10788_v0 = vld [vmem:[%s17055_s1 + $0x1580] sm:$0xf] }
 0x2ca   : > { %6392 = vmatpush.bf16.msra.mxu2 %v10749_v16  ;;  %v10404_v16 = vld [vmem:[%s17055_s1 + $0x1280] sm:$0xf]  ;;  %v11918_v1 = vld [vmem:[%s17055_s1 + $0x1588] sm:$0xf0] }
 0x2cb   : > { %6405 = vmatpush.bf16.msra.mxu3 %v10845_v29  ;;  %v10405_v25 = vor.u32 %v11822_v17, %v10404_v16  ;;  %v10501_v29 = vor.u32 %v11846_v18, %v10500_v39  ;;  %v11810_v16 = vld [vmem:[%s17055_s1 + $0x1228] sm:$0xf0]  ;;  %v10452_v39 = vld [vmem:[%s17055_s1 + $0x12e0] sm:$0xf] }
 0x2cc   : > { %6367 = vmatpush.bf16.msra.mxu0 %v10545_v58  ;;  %v10392_v58 = vld [vmem:[%s17055_s1 + $0x1268] sm:$0xf]  ;;  %v11834_v18 = vld [vmem:[%s17055_s1 + $0x12e8] sm:$0xf0] }
 0x2cd   : > { %6380 = vmatpush.bf16.msra.mxu1 %v10641_v32  ;;  %v10597_v32 = vor.u32 %v11870_v49, %v10596_v34  ;;  %v10393_v36 = vor.u32 %v11819_v46, %v10392_v58  ;;  %v10548_v49 = vld [vmem:[%s17055_s1 + $0x13a0] sm:$0xf]  ;;  %v11882_v58 = vld [vmem:[%s17055_s1 + $0x1468] sm:$0xf0]  ;;  %v10453_v46 = vor.u32 %v11834_v18, %v10452_v39  ;;  %v11936_v39 = vld [vmem:[%s17055_s1 + $0x1618] sm:$0xf0] }
 0x2ce   : > { %6393 = vmatpush.bf16.msra.mxu2 %v10737_v26  ;;  %v10693_v26 = vor.u32 %v11894_v27, %v10692_v35  ;;  %v11858_v27 = vld [vmem:[%s17055_s1 + $0x13a8] sm:$0xf0] }
 0x2cf   : > { %6406 = vmatpush.bf16.msra.mxu3 %v10833_v41 }
 0x2d0   : > { %6368 = vmatpush.bf16.msra.mxu0 %v10533_v3  ;;  %v5180_v52 = vpop.f32.mrf.mxu0  ;;  %v11816_v3 = vld [vmem:[%s17055_s1 + $0x1258] sm:$0xf0] }
 0x2d1   : > { %6381 = vmatpush.bf16.msra.mxu1 %v10629_v53  ;;  %v5181_v41 = vadd.f32 %v5180_v52, %v16465_v43  ;;  %v5193_v44 = vpop.f32.mrf.mxu1  ;;  %v10585_v43 = vor.u32 %v11867_v62, %v10584_v50  ;;  %v10681_v53 = vor.u32 %v11891_v40, %v10680_v54  ;;  %v10381_v55 = vor.u32 %v11816_v3, %v10380_v48  ;;  %v10812_v50 = vld [vmem:[%s17055_s1 + $0x15b0] sm:$0xf]  ;;  %v11924_v52 = vld [vmem:[%s17055_s1 + $0x15b8] sm:$0xf0] }
 0x2d2   : > { %6394 = vmatpush.bf16.msra.mxu2 %v10725_v14  ;;  %v10572_v14 = vld [vmem:[%s17055_s1 + $0x13d0] sm:$0xf]  ;;  %v11948_v62 = vld [vmem:[%s17055_s1 + $0x1678] sm:$0xf0]  ;;  %v10549_v54 = vor.u32 %v11858_v27, %v10548_v49  ;;  %v10813_v38 = vor.u32 %v11924_v52, %v10812_v50  ;;  %v10752_v49 = vld [vmem:[%s17055_s1 + $0x1538] sm:$0xf] }
 0x2d3   : > { %6407 = vmatpush.bf16.msra.mxu3 %v10821_v63  ;;  %6369 = vmatmul.bf16.vlgmr.msra.gmra.mxu0 %v16136_v20  ;;  %v5194_v15 = vadd.f32 %v5193_v44, %v5181_v41  ;;  %v11813_v63 = vld [vmem:[%s17055_s1 + $0x1240] sm:$0xf0]  ;;  %v10345_v41 = vor.u32 %v11807_v51, %v10344_v21  ;;  %v11855_v44 = vld [vmem:[%s17055_s1 + $0x1390] sm:$0xf0]  ;;  %v10848_v27 = vld [vmem:[%s17055_s1 + $0x15f8] sm:$0xf] }
 0x2d4   : > { %6413 = vmatpush.bf16.msrb.mxu0 %v10429_v56  ;;  %6382 = vmatmul.bf16.vlgmr.msra.gmra.mxu1 %v16151_v23  ;;  %v11864_v56 = vld [vmem:[%s17055_s1 + $0x13d8] sm:$0xf0]  ;;  %v11906_v50 = vld [vmem:[%s17055_s1 + $0x1528] sm:$0xf0]  ;;  %v11971_v52 = vld [vmem:[%s17057_s3 + $0xb0] sm:$0xff] }
 0x2d5   : > { %6426 = vmatpush.bf16.msrb.mxu1 %v10525_v59  ;;  %6395 = vmatmul.bf16.vlgmr.msra.gmra.mxu2 %v16312_v19  ;;  %v10668_v59 = vld [vmem:[%s17055_s1 + $0x1490] sm:$0xf]  ;;  %v16623_v31 = vadd.f32 %v5194_v15, %v15649_v22  ;;  %v10573_v22 = vor.u32 %v11864_v56, %v10572_v14  ;;  %v11879_v15 = vld [vmem:[%s17055_s1 + $0x1450] sm:$0xf0]  ;;  %v11921_v14 = vld [vmem:[%s17055_s1 + $0x15a0] sm:$0xf0] }
 0x2d6   : > { %6439 = vmatpush.bf16.msrb.mxu2 %v10621_v37  ;;  %6408 = vmatmul.bf16.vlgmr.msra.gmra.mxu3 %v16339_v12  ;;  %v10669_v2 = vor.u32 %v11888_v60, %v10668_v59  ;;  %v10369_v37 = vor.u32 %v11813_v63, %v10368_v61  ;;  %v10896_v56 = vld [vmem:[%s17055_s1 + $0x1658] sm:$0xf]  ;;  %v11945_v59 = vld [vmem:[%s17055_s1 + $0x1660] sm:$0xf0] }
 0x2d7   : > { %6452 = vmatpush.bf16.msrb.mxu3 %v10717_v6  ;;  %v11861_v6 = vld [vmem:[%s17055_s1 + $0x13c0] sm:$0xf0]  ;;  %v10897_v63 = vor.u32 %v11945_v59, %v10896_v56  ;;  %v11955_v56 = vld [vmem:[%s17057_s3 + $0x30] sm:$0xff]  ;;  %v11954_v59 = vld [vmem:[%s17057_s3 + $0x28] sm:$0xff] }
 0x2d8   : > { %6414 = vmatpush.bf16.msrb.mxu0 %v10417_v9  ;;  %v5206_v7 = vpop.f32.mrf.mxu2  ;;  %v10656_v9 = vld [vmem:[%s17055_s1 + $0x1478] sm:$0xf]  ;;  %v5182_v28 = vpop.f32.mrf.mxu0 }
 0x2d9   : > { %6427 = vmatpush.bf16.msrb.mxu1 %v10513_v13  ;;  %v10356_v13 = vld [vmem:[%s17055_s1 + $0x1220] sm:$0xf]  ;;  %v5195_v17 = vpop.f32.mrf.mxu1  ;;  %v10657_v34 = vor.u32 %v11885_v10, %v10656_v9  ;;  %v10764_v28 = vld [vmem:[%s17055_s1 + $0x1550] sm:$0xf] }
 0x2da   : > { %6440 = vmatpush.bf16.msrb.mxu2 %v10609_v47  ;;  %v5219_v47 = vpop.f32.mrf.mxu3  ;;  %v10357_v35 = vor.u32 %v11810_v16, %v10356_v13  ;;  %v10860_v17 = vld [vmem:[%s17055_s1 + $0x1610] sm:$0xf] }
 0x2db   : > { %6453 = vmatpush.bf16.msrb.mxu3 %v10705_v33  ;;  %v10561_v33 = vor.u32 %v11861_v6, %v10560_v5  ;;  %v10789_v5 = vor.u32 %v11918_v1, %v10788_v0  ;;  %v11915_v6 = vld [vmem:[%s17055_s1 + $0x1570] sm:$0xf0]  ;;  %v11968_v0 = vld [vmem:[%s17057_s3 + $0x98] sm:$0xff] }
 0x2dc   : > { %6415 = vmatpush.bf16.msrb.mxu0 %v10405_v25  ;;  %v16661_v25 = vadd.f32 %v5219_v47, %v5206_v7  ;;  %v10872_v7 = vld [vmem:[%s17055_s1 + $0x1628] sm:$0xf] }
 0x2dd   : > { %6428 = vmatpush.bf16.msrb.mxu1 %v10501_v29  ;;  %v10644_v29 = vld [vmem:[%s17055_s1 + $0x1460] sm:$0xf] }
 0x2de   : > { %6441 = vmatpush.bf16.msrb.mxu2 %v10597_v32  ;;  %v10440_v32 = vld [vmem:[%s17055_s1 + $0x12c8] sm:$0xf]  ;;  %v10645_v40 = vor.u32 %v11882_v58, %v10644_v29  ;;  %v11972_v58 = vld [vmem:[%s17057_s3 + $0xb8] sm:$0xff] }
 0x2df   : > { %6454 = vmatpush.bf16.msrb.mxu3 %v10693_v26  ;;  %v11831_v26 = vld [vmem:[%s17055_s1 + $0x12d0] sm:$0xf0] }
 0x2e0   : > { %6416 = vmatpush.bf16.msrb.mxu0 %v10393_v36  ;;  %v10908_v36 = vld [vmem:[%s17055_s1 + $0x1670] sm:$0xf]  ;;  %v5208_v48 = vpop.f32.mrf.mxu2  ;;  %v10441_v3 = vor.u32 %v11831_v26, %v10440_v32  ;;  %v10740_v26 = vld [vmem:[%s17055_s1 + $0x1520] sm:$0xf] }
 0x2e1   : > { %6429 = vmatpush.bf16.msrb.mxu1 %v10489_v45  ;;  %v10536_v45 = vld [vmem:[%s17055_s1 + $0x1388] sm:$0xf] }
 0x2e2   : > { %6442 = vmatpush.bf16.msrb.mxu2 %v10585_v43  ;;  %v10909_v43 = vor.u32 %v11948_v62, %v10908_v36  ;;  %v10537_v60 = vor.u32 %v11855_v44, %v10536_v45  ;;  %v10836_v62 = vld [vmem:[%s17055_s1 + $0x15e0] sm:$0xf]  ;;  %v10741_v44 = vor.u32 %v11906_v50, %v10740_v26 }
 0x2e3   : > { %6455 = vmatpush.bf16.msrb.mxu3 %v10681_v53  ;;  %v10800_v53 = vld [vmem:[%s17055_s1 + $0x1598] sm:$0xf] }
 0x2e4   : > { %6417 = vmatpush.bf16.msrb.mxu0 %v10381_v55  ;;  %v5221_v55 = vpop.f32.mrf.mxu3  ;;  %v10801_v61 = vor.u32 %v11921_v14, %v10800_v53 }
 0x2e5   : > { %6430 = vmatpush.bf16.msrb.mxu1 %v10477_v57  ;;  %v10633_v57 = vor.u32 %v11879_v15, %v10632_v8  ;;  %v10824_v8 = vld [vmem:[%s17055_s1 + $0x15c8] sm:$0xf]  ;;  %v11956_v55 = vld [vmem:[%s17057_s3 + $0x38] sm:$0xff] }
 0x2e6   : > { %6443 = vmatpush.bf16.msrb.mxu2 %v10573_v22  ;;  %v10884_v22 = vld [vmem:[%s17055_s1 + $0x1640] sm:$0xf] }
 0x2e7   : > { %6456 = vmatpush.bf16.msrb.mxu3 %v10669_v2  ;;  %v11942_v2 = vld [vmem:[%s17055_s1 + $0x1648] sm:$0xf0] }
 0x2e8   : > { %6418 = vmatpush.bf16.msrb.mxu0 %v10369_v37  ;;  %v10885_v37 = vor.u32 %v11942_v2, %v10884_v22  ;;  %v11951_v22 = vld [vmem:[%s17057_s3 + $0x10] sm:$0xff] }
 0x2e9   : > { %6431 = vmatpush.bf16.msrb.mxu1 %v10465_v11  ;;  %v11912_v11 = vld [vmem:[%s17055_s1 + $0x1558] sm:$0xf0] }
 0x2ea   : > { %6444 = vmatpush.bf16.msrb.mxu2 %v10561_v33  ;;  %v10765_v47 = vor.u32 %v11912_v11, %v10764_v28 }
 0x2eb   : > { %6457 = vmatpush.bf16.msrb.mxu3 %v10657_v34  ;;  %v10861_v34 = vor.u32 %v11936_v39, %v10860_v17  ;;  %v11961_v39 = vld [vmem:[%s17057_s3 + $0x60] sm:$0xff] }
 0x2ec   : > { %6419 = vmatpush.bf16.msrb.mxu0 %v10357_v35  ;;  %v11909_v35 = vld [vmem:[%s17055_s1 + $0x1540] sm:$0xf0] }
 0x2ed   : > { %6432 = vmatpush.bf16.msrb.mxu1 %v10453_v46  ;;  %v10753_v21 = vor.u32 %v11909_v35, %v10752_v49  ;;  %v11960_v49 = vld [vmem:[%s17057_s3 + $0x58] sm:$0xff] }
 0x2ee   : > { %6445 = vmatpush.bf16.msrb.mxu2 %v10549_v54  ;;  %v11930_v54 = vld [vmem:[%s17055_s1 + $0x15e8] sm:$0xf0] }
 0x2ef   : > { %6458 = vmatpush.bf16.msrb.mxu3 %v10645_v40  ;;  %v10837_v48 = vor.u32 %v11930_v54, %v10836_v62 }
 0x2f0   : > { %6420 = vmatpush.bf16.msrb.mxu0 %v10345_v41  ;;  %v5232_v13 = vpop.f32.mrf.mxu0 }
 0x2f1   : > { %6433 = vmatpush.bf16.msrb.mxu1 %v10441_v3  ;;  %v5245_v16 = vpop.f32.mrf.mxu1  ;;  %v5233_v18 = vadd.f32 %v5232_v13, %v16661_v25  ;;  %v11933_v25 = vld [vmem:[%s17055_s1 + $0x1600] sm:$0xf0]  ;;  %v10728_v3 = vld [vmem:[%s17055_s1 + $0x1508] sm:$0xf] }
 0x2f2   : > { %6446 = vmatpush.bf16.msrb.mxu2 %v10537_v60  ;;  %v10849_v32 = vor.u32 %v11933_v25, %v10848_v27  ;;  %v11970_v60 = vld [vmem:[%s17057_s3 + $0xa8] sm:$0xff] }
 0x2f3   : > { %6421 = vmatmul.bf16.vlgmr.msrb.gmra.mxu0 %v16124_v24  ;;  %6459 = vmatpush.bf16.msrb.mxu3 %v10633_v57  ;;  %v10776_v24 = vld [vmem:[%s17055_s1 + $0x1568] sm:$0xf]  ;;  %v5246_v33 = vadd.f32 %v5245_v16, %v5233_v18  ;;  %v11953_v57 = vld [vmem:[%s17057_s3 + $0x20] sm:$0xff]  ;;  %v11980_v16 = vld [vmem:[%s17057_s3 + $0xf8] sm:$0xff] }
 0x2f4   : > { %6465 = vmatpush.bf16.msra.mxu0 %v10813_v38  ;;  %6434 = vmatmul.bf16.vlgmr.msrb.gmra.mxu1 %v16133_v30  ;;  %v11939_v30 = vld [vmem:[%s17055_s1 + $0x1630] sm:$0xf0]  ;;  %v10777_v9 = vor.u32 %v11915_v6, %v10776_v24  ;;  %v11950_v6 = vld [vmem:[%s17057_s3 + $0x8] sm:$0xff] }
 0x2f5   : > { %6478 = vmatpush.bf16.msra.mxu1 %v10909_v43  ;;  %6447 = vmatmul.bf16.vlgmr.msrb.gmra.mxu2 %v16136_v20  ;;  %v11974_v20 = vld [vmem:[%s17057_s3 + $0xc8] sm:$0xff]  ;;  %v10873_v10 = vor.u32 %v11939_v30, %v10872_v7  ;;  %v11903_v38 = vld [vmem:[%s17055_s1 + $0x1510] sm:$0xf0]  ;;  %v11964_v7 = vld [vmem:[%s17057_s3 + $0x78] sm:$0xff] }
 0x2f6   : > { %6460 = vmatmul.bf16.vlgmr.msrb.gmra.mxu3 %v16151_v23  ;;  %6707 = vmatpush.bf16.msra.mxu2 %v11974_v20  ;;  %v11973_v23 = vld [vmem:[%s17057_s3 + $0xc0] sm:$0xff]  ;;  %v10729_v43 = vor.u32 %v11903_v38, %v10728_v3  ;;  %v11967_v24 = vld [vmem:[%s17057_s3 + $0x90] sm:$0xff]  ;;  %v11982_v30 = vld [vmem:[%s17057_s3 + $0x108] sm:$0xff] }
 0x2f7   : > { %6720 = vmatpush.bf16.msra.mxu3 %v11982_v30  ;;  %v11963_v20 = vld [vmem:[%s17057_s3 + $0x70] sm:$0xff]  ;;  %v11962_v13 = vld [vmem:[%s17057_s3 + $0x68] sm:$0xff] }
 0x2f8   : > { %6466 = vmatpush.bf16.msra.mxu0 %v10801_v61  ;;  %v5258_v29 = vpop.f32.mrf.mxu2  ;;  %v5234_v40 = vpop.f32.mrf.mxu0  ;;  %v11999_v30 = vld [vmem:[%s17057_s3 + $0x190] sm:$0xff] }
 0x2f9   : > { %6479 = vmatpush.bf16.msra.mxu1 %v10897_v63  ;;  %v5259_v46 = vadd.f32 %v5258_v29, %v5246_v33  ;;  %v5271_v51 = vpop.f32.mrf.mxu3  ;;  %v5247_v41 = vpop.f32.mrf.mxu1  ;;  %v11976_v40 = vld [vmem:[%s17057_s3 + $0xd8] sm:$0xff] }
 0x2fa   : > { %6708 = vmatpush.bf16.msra.mxu2 %v11973_v23 }
 0x2fb   : > { %v5272_v36 = vadd.f32 %v5271_v51, %v5259_v46 }
 0x2fc   : > { %6467 = vmatpush.bf16.msra.mxu0 %v10789_v5 }
 0x2fd   : > { %6480 = vmatpush.bf16.msra.mxu1 %v10885_v37  ;;  %v16801_v45 = vadd.f32 %v5272_v36, %v16005_v4  ;;  %v11927_v4 = vld [vmem:[%s17055_s1 + $0x15d0] sm:$0xf0] }
 0x2fe   : > { %6709 = vmatpush.bf16.msra.mxu2 %v11972_v58  ;;  %v10825_v53 = vor.u32 %v11927_v4, %v10824_v8  ;;  %v11978_v58 = vld [vmem:[%s17057_s3 + $0xe8] sm:$0xff] }
 0x300   : > { %6468 = vmatpush.bf16.msra.mxu0 %v10777_v9  ;;  %v5260_v15 = vpop.f32.mrf.mxu2  ;;  %v11981_v9 = vld [vmem:[%s17057_s3 + $0x100] sm:$0xff] }
 0x301   : > { %6481 = vmatpush.bf16.msra.mxu1 %v10873_v10  ;;  %v5273_v14 = vpop.f32.mrf.mxu3  ;;  %v11949_v10 = vld [vmem:[%s17057_s3] sm:$0xff]  ;;  %6721 = vmatpush.bf16.msra.mxu3 %v11981_v9  ;;  %v11991_v9 = vld [vmem:[%s17057_s3 + $0x150] sm:$0xff] }
 0x302   : > { %6710 = vmatpush.bf16.msra.mxu2 %v11971_v52 }
 0x304   : > { %6469 = vmatpush.bf16.msra.mxu0 %v10765_v47  ;;  %v11979_v47 = vld [vmem:[%s17057_s3 + $0xf0] sm:$0xff] }
 0x305   : > { %6482 = vmatpush.bf16.msra.mxu1 %v10861_v34  ;;  %6722 = vmatpush.bf16.msra.mxu3 %v11980_v16  ;;  %v16880_v34 = vld [vmem:[%s17056_s2] sm:$0x7] }
 0x306   : > { %6711 = vmatpush.bf16.msra.mxu2 %v11970_v60  ;;  %v6496_v29 = vperm.slane %v16880_v34, 0 }
 0x308   : > { %6470 = vmatpush.bf16.msra.mxu0 %v10753_v21  ;;  %v11959_v21 = vld [vmem:[%s17057_s3 + $0x50] sm:$0xff] }
 0x309   : > { %6483 = vmatpush.bf16.msra.mxu1 %v10849_v32  ;;  %6723 = vmatpush.bf16.msra.mxu3 %v11979_v47  ;;  %v11977_v32 = vld [vmem:[%s17057_s3 + $0xe0] sm:$0xff] }
 0x30c   : > { %6471 = vmatpush.bf16.msra.mxu0 %v10741_v44  ;;  %v11957_v44 = vld [vmem:[%s17057_s3 + $0x40] sm:$0xff] }
 0x30d   : > { %6484 = vmatpush.bf16.msra.mxu1 %v10837_v48  ;;  %6724 = vmatpush.bf16.msra.mxu3 %v11978_v58  ;;  %v11975_v48 = vld [vmem:[%s17057_s3 + $0xd0] sm:$0xff] }
 0x310   : > { %6472 = vmatpush.bf16.msra.mxu0 %v10729_v43  ;;  %v6266_v61 = vpop.f32.mrf.mxu0 }
 0x311   : > { %6485 = vmatpush.bf16.msra.mxu1 %v10825_v53  ;;  %v6279_v63 = vpop.f32.mrf.mxu1  ;;  %6725 = vmatpush.bf16.msra.mxu3 %v11977_v32  ;;  %v11993_v32 = vld [vmem:[%s17057_s3 + $0x160] sm:$0xff] }
 0x312   : > { %v6280_v23 = vadd.f32 %v6279_v63, %v6266_v61  ;;  %v6497_v61 = vperm.slane %v16880_v34, 1  ;;  %v11966_v63 = vld [vmem:[%s17057_s3 + $0x88] sm:$0xff] }
 0x313   : > { %6473 = vmatmul.bf16.vlgmr.msra.gmra.mxu0 %v16312_v19  ;;  %v11969_v19 = vld [vmem:[%s17057_s3 + $0xa0] sm:$0xff] }
 0x314   : > { %6486 = vmatmul.bf16.vlgmr.msra.gmra.mxu1 %v16339_v12  ;;  %v11952_v12 = vld [vmem:[%s17057_s3 + $0x18] sm:$0xff]  ;;  %6712 = vmatpush.bf16.msra.mxu2 %v11969_v19 }
 0x315   : > { %6856 = vmatpush.bf16.msrb.mxu1 %v11956_v55  ;;  %6726 = vmatpush.bf16.msra.mxu3 %v11976_v40  ;;  %v11984_v19 = vld [vmem:[%s17057_s3 + $0x118] sm:$0xff] }
 0x316   : > { %6739 = vmatpush.bf16.msrb.mxu0 %v11984_v19  ;;  %v12005_v19 = vld [vmem:[%s17059_s5 + $0x10] sm:$0xff] }
 0x318   : > { %v6292_v1 = vpop.f32.mrf.mxu2  ;;  %6713 = vmatpush.bf16.msra.mxu2 %v11968_v0  ;;  %v6268_v2 = vpop.f32.mrf.mxu0 }
 0x319   : > { %6857 = vmatpush.bf16.msrb.mxu1 %v11955_v56  ;;  %v6281_v5 = vpop.f32.mrf.mxu1  ;;  %v6305_v37 = vpop.f32.mrf.mxu3  ;;  %v6293_v17 = vadd.f32 %v6292_v1, %v6280_v23  ;;  %6727 = vmatpush.bf16.msra.mxu3 %v11975_v48  ;;  %v12002_v23 = vld [vmem:[%s17057_s3 + $0x1a8] sm:$0xff] }
 0x31a   : > { %v11983_v5 = vld [vmem:[%s17057_s3 + $0x110] sm:$0xff] }
 0x31b   : > { %v6306_v18 = vadd.f32 %v6305_v37, %v6293_v17  ;;  %6740 = vmatpush.bf16.msrb.mxu0 %v11983_v5  ;;  %v11989_v17 = vld [vmem:[%s17057_s3 + $0x140] sm:$0xff]  ;;  %v12008_v5 = vld [vmem:[%s17061_s7 + $0x8] sm:$0xff] }
 0x31c   : > { %6714 = vmatpush.bf16.msra.mxu2 %v11967_v24 }
 0x31d   : > { %6858 = vmatpush.bf16.msrb.mxu1 %v11954_v59  ;;  %6888 = vmatpush.bf16.msrb.mxu3 %v11966_v63  ;;  %v12006_v63 = vld [vmem:[%s17059_s5 + $0x18] sm:$0xff] }
 0x320   : > { %6869 = vmatpush.bf16.msrb.mxu2 %v11964_v7  ;;  %v6294_v28 = vpop.f32.mrf.mxu2  ;;  %v11992_v7 = vld [vmem:[%s17057_s3 + $0x158] sm:$0xff] }
 0x321   : > { %6859 = vmatpush.bf16.msrb.mxu1 %v11953_v57  ;;  %v6307_v11 = vpop.f32.mrf.mxu3  ;;  %7051 = vmatpush.bf16.msra.mxu0 %v11992_v7  ;;  %v11998_v28 = vld [vmem:[%s17057_s3 + $0x188] sm:$0xff] }
 0x322   : > { %v11990_v11 = vld [vmem:[%s17057_s3 + $0x148] sm:$0xff] }
 0x324   : > { %6870 = vmatpush.bf16.msrb.mxu2 %v11963_v20 }
 0x325   : > { %6860 = vmatpush.bf16.msrb.mxu1 %v11952_v12  ;;  %7052 = vmatpush.bf16.msra.mxu0 %v11991_v9 }
 0x328   : > { %6871 = vmatpush.bf16.msrb.mxu2 %v11962_v13  ;;  %v11997_v13 = vld [vmem:[%s17057_s3 + $0x180] sm:$0xff] }
 0x329   : > { %6861 = vmatpush.bf16.msrb.mxu1 %v11951_v22  ;;  %v11965_v22 = vld [vmem:[%s17057_s3 + $0x80] sm:$0xff]  ;;  %7053 = vmatpush.bf16.msra.mxu0 %v11990_v11 }
 0x32a   : > { %6889 = vmatpush.bf16.msrb.mxu3 %v11965_v22 }
 0x32c   : > { %6872 = vmatpush.bf16.msrb.mxu2 %v11961_v39  ;;  %v12001_v39 = vld [vmem:[%s17057_s3 + $0x1a0] sm:$0xff] }
 0x32d   : > { %6862 = vmatpush.bf16.msrb.mxu1 %v11950_v6  ;;  %7054 = vmatpush.bf16.msra.mxu0 %v11989_v17 }
 0x330   : > { %v6318_v33 = vpop.f32.mrf.mxu0  ;;  %6873 = vmatpush.bf16.msrb.mxu2 %v11960_v49  ;;  %v11996_v49 = vld [vmem:[%s17057_s3 + $0x178] sm:$0xff] }
 0x331   : > { %6863 = vmatpush.bf16.msrb.mxu1 %v11949_v10  ;;  %v6319_v35 = vadd.f32 %v6318_v33, %v6306_v18  ;;  %v6331_v27 = vpop.f32.mrf.mxu1 }
 0x333   : > { %v6332_v25 = vadd.f32 %v6331_v27, %v6319_v35  ;;  %v11988_v35 = vld [vmem:[%s17057_s3 + $0x138] sm:$0xff]  ;;  %v11995_v27 = vld [vmem:[%s17057_s3 + $0x170] sm:$0xff] }
 0x334   : > { %6874 = vmatpush.bf16.msrb.mxu2 %v11959_v21  ;;  %7055 = vmatpush.bf16.msra.mxu0 %v11988_v35  ;;  %v11986_v21 = vld [vmem:[%s17057_s3 + $0x128] sm:$0xff] }
 0x335   : > { %v6491_v46 = vadd.f32 %v6332_v25, %v16261_v42  ;;  %v11958_v42 = vld [vmem:[%s17057_s3 + $0x48] sm:$0xff]  ;;  %7083 = vmatpush.bf16.msra.mxu1 %v12002_v23  ;;  %v11987_v25 = vld [vmem:[%s17057_s3 + $0x130] sm:$0xff] }
 0x337   : > { %v6502_v51 = vadd.f32 %v6496_v29, %v6491_v46  ;;  %v11994_v29 = vld [vmem:[%s17057_s3 + $0x168] sm:$0xff] }
 0x338   : > { %v6344_v26 = vpop.f32.mrf.mxu2  ;;  %v6320_v50 = vpop.f32.mrf.mxu0  ;;  %6875 = vmatpush.bf16.msrb.mxu2 %v11958_v42  ;;  %7056 = vmatpush.bf16.msra.mxu0 %v11987_v25 }
 0x339   : > { %v6505_v52 = vmax.f32 %v6502_v51, 0.0  ;;  %v6333_v36 = vpop.f32.mrf.mxu1  ;;  %v6357_v62 = vpop.f32.mrf.mxu3  ;;  %7084 = vmatpush.bf16.msra.mxu1 %v12001_v39 }
 0x33a   : > { %v6358_v8 = vadd.f32 %v6357_v62, %v6344_v26  ;;  %v11985_v26 = vld [vmem:[%s17057_s3 + $0x120] sm:$0xff] }
 0x33b   : > { %v16899_v54 = vpack.c.bf16 %v6505_v52, %v6505_v52 }
 0x33c   : > { %6876 = vmatpush.bf16.msrb.mxu2 %v11957_v44  ;;  %7057 = vmatpush.bf16.msra.mxu0 %v11986_v21 }
 0x33d   : > { %v6585_v41 = vshrl.u32 %v16899_v54, 16  ;;  %6864 = vmatmul.bf16.vlgmr.msrb.gmra.mxu1 %v16899_v54 }
 0x33f   : > { %6715 = vmatmul.bf16.vlgmr.msra.gmra.mxu2 %v6585_v41  ;;  %v6498_v41 = vperm.slane %v16880_v34, 2  ;;  %v6935_v34 = vrot.slane %v16899_v54, 1  ;;  %v12004_v54 = vld [vmem:[%s17059_s5 + $0x8] sm:$0xff] }
 0x340   : > { %v6346_v3 = vpop.f32.mrf.mxu2  ;;  %7058 = vmatpush.bf16.msra.mxu0 %v11985_v26  ;;  %7136 = vmatpush.bf16.msra.mxu2 %v12006_v63 }
 0x341   : > { %v6359_v38 = vpop.f32.mrf.mxu3 }
 0x344   : > { %7137 = vmatpush.bf16.msra.mxu2 %v12005_v19 }
 0x348   : > { %7138 = vmatpush.bf16.msra.mxu2 %v12004_v54 }
 0x350   : > { %v6370_v4 = vpop.f32.mrf.mxu0 }
 0x351   : > { %v6371_v15 = vadd.f32 %v6370_v4, %v6358_v8  ;;  %v6383_v43 = vpop.f32.mrf.mxu1 }
 0x353   : > { %v6384_v53 = vadd.f32 %v6383_v43, %v6371_v15 }
 0x358   : > { %v6396_v14 = vpop.f32.mrf.mxu2  ;;  %v6372_v56 = vpop.f32.mrf.mxu0 }
 0x359   : > { %v6397_v55 = vadd.f32 %v6396_v14, %v6384_v53  ;;  %v6409_v59 = vpop.f32.mrf.mxu3  ;;  %v6385_v60 = vpop.f32.mrf.mxu1 }
 0x35b   : > { %v6410_v57 = vadd.f32 %v6409_v59, %v6397_v55 }
 0x35d   : > { %v6492_v12 = vadd.f32 %v6410_v57, %v16623_v31  ;;  %v12000_v31 = vld [vmem:[%s17057_s3 + $0x198] sm:$0xff] }
 0x35f   : > { %v6503_v0 = vadd.f32 %v6497_v61, %v6492_v12  ;;  %v12003_v12 = vld [vmem:[%s17059_s5] sm:$0xff] }
 0x360   : > { %v6398_v1 = vpop.f32.mrf.mxu2  ;;  %7139 = vmatpush.bf16.msra.mxu2 %v12003_v12 }
 0x361   : > { %v6506_v2 = vmax.f32 %v6503_v0, 0.0  ;;  %v6411_v37 = vpop.f32.mrf.mxu3 }
 0x363   : > { %v16926_v24 = vpack.c.bf16 %v6506_v2, %v6506_v2 }
 0x365   : > { %v6588_v6 = vshrl.u32 %v16926_v24, 16  ;;  %6877 = vmatmul.bf16.vlgmr.msrb.gmra.mxu2 %v16926_v24  ;;  %v6936_v53 = vrot.slane %v16926_v24, 1  ;;  %v12007_v24 = vld [vmem:[%s17061_s7] sm:$0xff] }
 0x367   : > { %6728 = vmatmul.bf16.vlgmr.msra.gmra.mxu3 %v6588_v6 }
 0x368   : > { %7064 = vmatpush.bf16.msra.mxu3 %v12000_v31 }
 0x36c   : > { %7065 = vmatpush.bf16.msra.mxu3 %v11999_v30 }
 0x370   : > { %v6422_v20 = vpop.f32.mrf.mxu0  ;;  %7066 = vmatpush.bf16.msra.mxu3 %v11998_v28 }
 0x371   : > { %v6435_v10 = vpop.f32.mrf.mxu1 }
 0x372   : > { %v6436_v51 = vadd.f32 %v6435_v10, %v6422_v20 }
 0x374   : > { %7067 = vmatpush.bf16.msra.mxu3 %v11997_v13  ;;  %v7091_v13 = vld [vmem:[%s17058_s4] sm:$0x1] }
 0x378   : > { %v6424_v16 = vpop.f32.mrf.mxu0  ;;  %v6448_v47 = vpop.f32.mrf.mxu2  ;;  %7068 = vmatpush.bf16.msra.mxu3 %v11996_v49  ;;  %v7103_v49 = vld [vmem:[%s17060_s6] sm:$0x1] }
 0x379   : > { %v6437_v18 = vpop.f32.mrf.mxu1  ;;  %v6461_v33 = vpop.f32.mrf.mxu3  ;;  %v6449_v50 = vadd.f32 %v6448_v47, %v6436_v51 }
 0x37b   : > { %v6462_v52 = vadd.f32 %v6461_v33, %v6449_v50 }
 0x37c   : > { %7069 = vmatpush.bf16.msra.mxu3 %v11995_v27 }
 0x380   : > { %v6450_v58 = vpop.f32.mrf.mxu2  ;;  %7070 = vmatpush.bf16.msra.mxu3 %v11994_v29 }
 0x381   : > { %v6463_v46 = vpop.f32.mrf.mxu3 }
 0x382   : > { %v7151_v46 = vld [vmem:[%s17062_s8] sm:$0x1] }
 0x384   : > { %7071 = vmatpush.bf16.msra.mxu3 %v11993_v32 }
 0x390   : > { %v6474_v36 = vpop.f32.mrf.mxu0 }
 0x391   : > { %v6475_v42 = vadd.f32 %v6474_v36, %v6462_v52  ;;  %v6487_v62 = vpop.f32.mrf.mxu1 }
 0x393   : > { %v6488_v40 = vadd.f32 %v6487_v62, %v6475_v42 }
 0x395   : > { %v6493_v44 = vadd.f32 %v6488_v40, %v16801_v45 }
 0x397   : > { %v6504_v48 = vadd.f32 %v6498_v41, %v6493_v44 }
 0x398   : > { %v6476_v3 = vpop.f32.mrf.mxu0 }
 0x399   : > { %v6507_v38 = vmax.f32 %v6504_v48, 0.0  ;;  %v6489_v8 = vpop.f32.mrf.mxu1 }
 0x39b   : > { %v6510_v4 = vpack.c.bf16 %v6507_v38, %v6507_v38 }
 0x39d   : > { %v6591_v15 = vshrl.u32 %v6510_v4, 16  ;;  %v6937_v43 = vrot.slane %v6510_v4, 1  ;;  %11091 = vmatmul.msk.bf16.vlgmr.msrb.gmra.mxu3 %vm6703_vm0, %v6510_v4 }
 0x39f   : > { %11018 = vmatmul.msk.bf16.vlgmr.msrb.gmra.mxu0 %vm6703_vm0, %v6591_v15  ;;  %11200 = vmatmul.msk.bf16.vlgmr.msra.gmra.mxu1 %vm6703_vm0, %v6937_v43 }
 0x3a0   : > { %7173 = vmatpush.bf16.msrb.mxu0 %v12008_v5 }
 0x3a4   : > { %7174 = vmatpush.bf16.msrb.mxu0 %v12007_v24 }
 0x3ad   : > { %7072 = vmatmul.bf16.vlgmr.msra.gmra.mxu3 %v6936_v53 }
 0x3af   : > { %7059 = vmatmul.bf16.vlgmr.msra.gmra.mxu0 %v6935_v34 }
 0x3ba   : > { %v6865_v45 = vpop.f32.mrf.mxu1 }
 0x3c2   : > { %v6716_v14 = vpop.f32.mrf.mxu2  ;;  %v6867_v55 = vpop.f32.mrf.mxu1 }
 0x3ca   : > { %v6718_v56 = vpop.f32.mrf.mxu2 }
 0x3e8   : > { %v6878_v59 = vpop.f32.mrf.mxu2 }
 0x3ea   : > { %v6729_v60 = vpop.f32.mrf.mxu3 }
 0x3eb   : > { %v6730_v0 = vadd.f32 %v6729_v60, %v6716_v14 }
 0x3f0   : > { %v6880_v57 = vpop.f32.mrf.mxu2 }
 0x3f2   : > { %v6731_v61 = vpop.f32.mrf.mxu3 }
 0x41c   : > { %v6742_v1 = vpop.f32.mrf.mxu0  ;;  %v7086_v22 = vpop.f32.mrf.mxu1 }
 0x41d   : > { %v6743_v2 = vadd.f32 %v6742_v1, %v6730_v0 }
 0x41f   : > { %v6866_v37 = vadd.f32 %v6865_v45, %v6743_v2 }
 0x420   : > { %v6891_v31 = vpop.f32.mrf.mxu3 }
 0x421   : > { %v6879_v6 = vadd.f32 %v6878_v59, %v6866_v37 }
 0x423   : > { %v6892_v11 = vadd.f32 %v6891_v31, %v6879_v6 }
 0x424   : > { %v6744_v7 = vpop.f32.mrf.mxu0  ;;  %v7088_v30 = vpop.f32.mrf.mxu1 }
 0x428   : > { %v6893_v20 = vpop.f32.mrf.mxu3 }
 0x42c   : > { %v7060_v9 = vpop.f32.mrf.mxu0 }
 0x430   : > { %v7073_v10 = vpop.f32.mrf.mxu3 }
 0x431   : > { %v7074_v28 = vadd.f32 %v7073_v10, %v7060_v9 }
 0x433   : > { %v7087_v23 = vadd.f32 %v7086_v22, %v7074_v28 }
 0x434   : > { %v7062_v16 = vpop.f32.mrf.mxu0 }
 0x435   : > { %v7090_v17 = vadd.f32 %v7087_v23, %v6892_v11 }
 0x437   : > { %v7092_v39 = vadd.f32 %v7091_v13, %v7090_v17 }
 0x438   : > { %v7075_v18 = vpop.f32.mrf.mxu3 }
 0x439   : > { %v7093_v47 = vmax.f32 %v7092_v39, 0.0 }
 0x43b   : > { %v7094_v33 = vpack.c.bf16 %v7093_v47, %v7093_v47 }
 0x43d   : > { %11217 = vmatmul.msk.bf16.vlgmr.msra.gmra.mxu2 %vm7128_vm1, %v7094_v33 }
 0x4c0   : > { %v7141_v35 = vpop.f32.mrf.mxu2 }
 0x4c1   : > { %v7142_v27 = vadd.f32 %v7141_v35, %v7103_v49 }
 0x4c3   : > { %v7145_v25 = vmax.f32 %v7142_v27, 0.0 }
 0x4c5   : > { %v7146_v29 = vpack.c.bf16 %v7145_v25, %v7145_v25 }
 0x4c7   : > { %11226 = vmatmul.msk.bf16.vlgmr.msrb.gmra.mxu0 %vm6703_vm0, %v7146_v29 }
 0x4c8   : > { %v7143_v58 = vpop.f32.mrf.mxu2 }
 0x544   : > { %v7176_v21 = vpop.f32.mrf.mxu0 }
 0x545   : > { %v7177_v51 = vadd.f32 %v7176_v21, %v7151_v46 }
 0x547   : > { %v7180_v32 = vmax.f32 %v7177_v51, 0.0 }
 0x549   : > { %7182 = vst.msk [vmem:[%s371_s23] sm:$0x1] %vm7181_vm2, %v7180_v32 }
 0x54a   : > { %12078 = shalt.err (!%p12075_p5)
}
 0x54b   : > { %12012 = dma.vmem_to_hbm [thread:$0]  (%p12203_p6), %s7195_s24, 16, %s7197_s25, %s7184_s26  }
 0x54c   : > { %v7178_v26 = vpop.f32.mrf.mxu0 }
 0x54d PF: > { %s7208_s28 = sand.u32 1, %s12101_s30   ;;  %p12015_p7 = pnand %p7259_p9, %p12207_p8 }
 0x54e   : > { %s7209_s22 = scalar_lea.sflag [#allocation4], %s7208_s28 }
 0x54f   : > { %p12016_p10 = pneg %p12015_p7 }
 0x551   : > { %12096 = dma.done.wait (%p12016_p10), %s7209_s22, 16  }
 0x552   : > { %12098 = vsyncadd (%p12016_p10), %s7209_s22, 4294967280  ;;  %p19_p11 = scmp.ge.s32.totalorder %s12188_s15, 4   ;;  %s17070_s30 = smov %s12105_s10 }
 0x553   : > { %s17071_s10 = smov %s12109_s11  ;;  %s17072_s11 = smov %s12201_s18 }
 0x554   : > { %s17073_s12 = smov %s12188_s15  ;;  %21 = sbr.rel (!%p19_p11) target bundleno = 5 (0x5), region = 125 }
 0x559   :  { %7214 = vsyncpa [#allocation4], 1 }
 0x55a   :  { %7216 = vsyncpa [#allocation4 + $0x1], 1 }

</bundles_post_ra>
